<compile_context>
chip_gen: v6e
topology: v6e:2x2x1
jax: 0.10.0
libtpu: 0.0.40
codegen_flags: <defaults>
</compile_context>

<pallas_src>
import math
import functools

import jax
import jax.numpy as jnp
from jax.experimental import pallas as pl
from jax.experimental.pallas import tpu as pltpu


# ----------------------------------------------------------------------------
# In-kernel SAB layer (= MAB(X, X), bn=False) on a flattened (TB*N, d_in) block
# ----------------------------------------------------------------------------
def _sab_block(X2, wqkv_ref, bqkv_ref, wo_ref, bo_ref,
               *, TB, N, dim_V, num_heads):
    """Returns (TB*N, dim_V) float32."""
    f32 = jnp.float32
    # Matmul operands follow the (optionally bf16) weight dtype; accumulation,
    # bias, softmax and residuals stay f32.
    if wqkv_ref.dtype != f32:
        cast = lambda a: a.astype(wqkv_ref.dtype)
    else:
        cast = lambda a: a

    # Fused Q/K/V projection: one (TB*N, d_in) @ (d_in, 3*dim_V) MXU matmul.
    P = (jnp.dot(cast(X2), wqkv_ref[...], preferred_element_type=f32)
         + bqkv_ref[...])
    Q = P[:, 0 * dim_V:1 * dim_V].reshape(TB, N, dim_V)   # free leading-dim split
    K = P[:, 1 * dim_V:2 * dim_V].reshape(TB, N, dim_V)
    V = P[:, 2 * dim_V:3 * dim_V].reshape(TB, N, dim_V)

    scale = 1.0 / math.sqrt(dim_V)
    ds = dim_V // num_heads

    def head_attn(h):
        sl = slice(h * ds, (h + 1) * ds)
        qh, kh, vh = Q[:, :, sl], K[:, :, sl], V[:, :, sl]
        # trans-B contraction on the MXU; no explicit transpose / XLU work.
        s = jnp.einsum('bqd,bkd->bqk', qh * scale, kh,
                       preferred_element_type=f32)
        s = s - jnp.max(s, axis=-1, keepdims=True)
        p = jnp.exp(s)
        p = p / jnp.sum(p, axis=-1, keepdims=True)        # exact divide (parity)
        return qh + jnp.einsum('bqk,bkd->bqd', p, vh,
                               preferred_element_type=f32)

    if num_heads == 1:
        O = head_attn(0)                                  # (TB, N, dim_V)
    else:
        # In-register head assembly: lane-axis concat of static slices.
        # No VMEM scratch round-trip, no masked 32-lane stores.
        O = jnp.concatenate([head_attn(h) for h in range(num_heads)], axis=-1)

    Of = O.reshape(TB * N, dim_V)                         # free leading-dim merge
    return Of + jnp.maximum(
        jnp.dot(cast(Of), wo_ref[...], preferred_element_type=f32)
        + bo_ref[...], 0.0)


# ----------------------------------------------------------------------------
# Fused kernel: SAB1 -> SAB2, one batch block per grid step
# ----------------------------------------------------------------------------
def _tdp_kernel(x_ref,
                wqkv1_ref, bqkv1_ref, wo1_ref, bo1_ref,
                wqkv2_ref, bqkv2_ref, wo2_ref, bo2_ref,
                out_ref,
                *, TB, N, d_in, d1, h1, d2, h2):
    X2 = x_ref[...].reshape(TB * N, d_in)                 # free leading-dim merge
    O1 = _sab_block(X2, wqkv1_ref, bqkv1_ref, wo1_ref, bo1_ref,
                    TB=TB, N=N, dim_V=d1, num_heads=h1)
    O2 = _sab_block(O1, wqkv2_ref, bqkv2_ref, wo2_ref, bo2_ref,
                    TB=TB, N=N, dim_V=d2, num_heads=h2)
    out_ref[...] = O2.astype(out_ref.dtype)               # dense (TB*N, d2) slab


def trajectory_decoder_pooling(x, sab1_params, sab2_params,
                               *, num_heads1=4, num_heads2=1,
                               block_rows=1024,
                               use_bf16_matmul=False,
                               vmem_limit_bytes=None):
    """x: (B, N, 20) -> (B, N, obs_act_dim). Matches the PyTorch forward."""
    B, N, d_in = x.shape
    wq1, bq1, wk1, bk1, wv1, bv1, wo1, bo1 = sab1_params
    wq2, bq2, wk2, bk2, wv2, bv2, wo2, bo2 = sab2_params
    d1 = wq1.shape[1]
    d2 = wq2.shape[1]

    mm_dtype = jnp.bfloat16 if use_bf16_matmul else jnp.float32
    # Host-side fusion of the three projection matrices per layer.
    wqkv1 = jnp.concatenate([wq1, wk1, wv1], axis=1).astype(mm_dtype)  # (d_in, 3*d1)
    bqkv1 = jnp.concatenate([bq1, bk1, bv1], axis=1)                   # (1, 3*d1)
    wqkv2 = jnp.concatenate([wq2, wk2, wv2], axis=1).astype(mm_dtype)  # (d1, 3*d2)
    bqkv2 = jnp.concatenate([bq2, bk2, bv2], axis=1)                   # (1, 3*d2)
    wo1c = wo1.astype(mm_dtype)
    wo2c = wo2.astype(mm_dtype)

    # Batch block: target ~block_rows flattened rows per grid step (full MXU
    # M dimension, amortised step overhead).  Keep the grid length even when
    # multi-step so the "parallel" axis can shard across v7x's 2 TensorCores.
    TB = max(1, min(B, max(1, block_rows // N)))
    nb = pl.cdiv(B, TB)
    if nb > 1 and nb % 2 == 1:
        nb += 1
    B_pad = nb * TB
    if B_pad != B:
        x = jnp.pad(x, ((0, B_pad - B), (0, 0), (0, 0)))

    kernel = functools.partial(_tdp_kernel, TB=TB, N=N, d_in=d_in,
                               d1=d1, h1=num_heads1, d2=d2, h2=num_heads2)

    def resident(a):
        nd = a.ndim
        return pl.BlockSpec(a.shape, lambda i, _nd=nd: (0,) * _nd)

    out2d = pl.pallas_call(
        kernel,
        out_shape=jax.ShapeDtypeStruct((B_pad * N, d2), jnp.float32),
        grid=(nb,),
        in_specs=[
            pl.BlockSpec((TB, N, d_in), lambda i: (i, 0, 0)),
            resident(wqkv1), resident(bqkv1), resident(wo1c), resident(bo1),
            resident(wqkv2), resident(bqkv2), resident(wo2c), resident(bo2),
        ],
        out_specs=pl.BlockSpec((TB * N, d2), lambda i: (i, 0)),
        compiler_params=pltpu.CompilerParams(
            dimension_semantics=("parallel",),
            vmem_limit_bytes=vmem_limit_bytes),
    )(x, wqkv1, bqkv1, wo1c, bo1, wqkv2, bqkv2, wo2c, bo2)

    return out2d[:B * N].reshape(B, N, d2)


# ----------------------------------------------------------------------------
# Parameter construction (nn.Linear-style; weights stored (in, out))
# ----------------------------------------------------------------------------
def _linear_params(key, d_in, d_out):
    k1, k2 = jax.random.split(key)
    bound = 1.0 / math.sqrt(d_in)
    w = jax.random.uniform(k1, (d_in, d_out), jnp.float32, -bound, bound)
    b = jax.random.uniform(k2, (1, d_out), jnp.float32, -bound, bound)
    return w, b


def make_mab_params(key, dim_Q, dim_K, dim_V):
    keys = jax.random.split(key, 4)
    wq, bq = _linear_params(keys[0], dim_Q, dim_V)
    wk, bk = _linear_params(keys[1], dim_K, dim_V)
    wv, bv = _linear_params(keys[2], dim_K, dim_V)
    wo, bo = _linear_params(keys[3], dim_V, dim_V)
    return (wq, bq, wk, bk, wv, bv, wo, bo)


# ----------------------------------------------------------------------------
# Pure-JAX reference (mirrors the PyTorch forward exactly)
# ----------------------------------------------------------------------------
def _mab_ref(Q, K, params, num_heads, dim_V):
    wq, bq, wk, bk, wv, bv, wo, bo = params
    Qp = Q @ wq + bq
    Kp = K @ wk + bk
    Vp = K @ wv + bv
    Q_ = jnp.concatenate(jnp.split(Qp, num_heads, axis=2), axis=0)
    K_ = jnp.concatenate(jnp.split(Kp, num_heads, axis=2), axis=0)
    V_ = jnp.concatenate(jnp.split(Vp, num_heads, axis=2), axis=0)
    A = jax.nn.softmax(
        jnp.einsum('bqd,bkd->bqk', Q_, K_) / math.sqrt(dim_V), axis=2)
    O = Q_ + jnp.einsum('bqk,bkd->bqd', A, V_)
    O = jnp.concatenate(jnp.split(O, num_heads, axis=0), axis=2)
    return O + jax.nn.relu(O @ wo + bo)


def _tdp_ref(X, p1, p2, h1, h2, d1, d2):
    H = _mab_ref(X, X, p1, h1, d1)       # SAB1
    return _mab_ref(H, H, p2, h2, d2)    # SAB2


if __name__ == "__main__":
    B, N = 16, 8
    dim_in = 20            # SAB1 dim_in is hard-coded to 20 in the module
    dim_hidden = 128       # SAB1 dim_out
    obs_act_dim = 32       # SAB2 dim_out (module ctor arg)
    h1, h2 = 4, 1

    key = jax.random.PRNGKey(0)
    kx, k1, k2 = jax.random.split(key, 3)
    X = jax.random.normal(kx, (B, N, dim_in), dtype=jnp.float32)
    p1 = make_mab_params(k1, dim_in, dim_in, dim_hidden)
    p2 = make_mab_params(k2, dim_hidden, dim_hidden, obs_act_dim)

    out = trajectory_decoder_pooling(X, p1, p2,
                                     num_heads1=h1, num_heads2=h2)
    out = jax.block_until_ready(out)

    ref = _tdp_ref(X, p1, p2, h1, h2, dim_hidden, obs_act_dim)
    assert out.shape == (B, N, obs_act_dim)
    err = float(jnp.max(jnp.abs(out - ref)))
    # softmax denominator is exact now; residual tolerance only covers MXU vs
    # XLA f32 matmul rounding differences
    assert jnp.allclose(out, ref, atol=2e-3, rtol=2e-3), f"max err {err}"

    print("KERNEL_OK")
</pallas_src>

<mosaic_0001>
module attributes {stable_mosaic.version = 11 : i64} {
  func.func @_tdp_kernel(%arg0: i32, %arg1: memref<16x8x20xf32, #tpu.memory_space<vmem>>, %arg2: memref<20x384xf32, #tpu.memory_space<vmem>>, %arg3: memref<1x384xf32, #tpu.memory_space<vmem>>, %arg4: memref<128x128xf32, #tpu.memory_space<vmem>>, %arg5: memref<1x128xf32, #tpu.memory_space<vmem>>, %arg6: memref<128x96xf32, #tpu.memory_space<vmem>>, %arg7: memref<1x96xf32, #tpu.memory_space<vmem>>, %arg8: memref<32x32xf32, #tpu.memory_space<vmem>>, %arg9: memref<1x32xf32, #tpu.memory_space<vmem>>, %arg10: memref<128x32xf32, #tpu.memory_space<vmem>>) attributes {dimension_semantics = [#tpu.dimension_semantics<parallel>], iteration_bounds = array<i64: 1>, scalar_prefetch = 0 : i64, scratch_operands = 0 : i64, tpu.core_type = #tpu.core_type<tc>, window_params = [{transform_indices = @transform_0, window_bounds = array<i64: 16, 8, 20>}, {pipeline_mode = #tpu.pipeline_mode<synchronous>, transform_indices = @transform_1, window_bounds = array<i64: 20, 384>}, {pipeline_mode = #tpu.pipeline_mode<synchronous>, transform_indices = @transform_2, window_bounds = array<i64: 1, 384>}, {pipeline_mode = #tpu.pipeline_mode<synchronous>, transform_indices = @transform_3, window_bounds = array<i64: 128, 128>}, {pipeline_mode = #tpu.pipeline_mode<synchronous>, transform_indices = @transform_4, window_bounds = array<i64: 1, 128>}, {pipeline_mode = #tpu.pipeline_mode<synchronous>, transform_indices = @transform_5, window_bounds = array<i64: 128, 96>}, {pipeline_mode = #tpu.pipeline_mode<synchronous>, transform_indices = @transform_6, window_bounds = array<i64: 1, 96>}, {pipeline_mode = #tpu.pipeline_mode<synchronous>, transform_indices = @transform_7, window_bounds = array<i64: 32, 32>}, {pipeline_mode = #tpu.pipeline_mode<synchronous>, transform_indices = @transform_8, window_bounds = array<i64: 1, 32>}, {transform_indices = @transform_9, window_bounds = array<i64: 128, 32>}]} {
    %c0 = arith.constant 0 : index
    %c0_0 = arith.constant 0 : index
    %c0_1 = arith.constant 0 : index
    %0 = vector.load %arg1[%c0, %c0_0, %c0_1] : memref<16x8x20xf32, #tpu.memory_space<vmem>>, vector<16x8x20xf32>
    %1 = vector.shape_cast %0 : vector<16x8x20xf32> to vector<128x20xf32>
    %c0_2 = arith.constant 0 : index
    %c0_3 = arith.constant 0 : index
    %2 = vector.load %arg2[%c0_2, %c0_3] : memref<20x384xf32, #tpu.memory_space<vmem>>, vector<20x384xf32>
    %cst = arith.constant dense<0.000000e+00> : vector<128x384xf32>
    %3 = tpu.matmul %1, %2, %cst {dimension_numbers = #tpu.dot_dimension_numbers<[1], [0], [0], [1], [0, 0, 1, 1], [], []>} : vector<128x20xf32>, vector<20x384xf32>, vector<128x384xf32> -> vector<128x384xf32>
    %c0_4 = arith.constant 0 : index
    %c0_5 = arith.constant 0 : index
    %4 = vector.load %arg3[%c0_4, %c0_5] : memref<1x384xf32, #tpu.memory_space<vmem>>, vector<1x384xf32>
    %5 = vector.broadcast %4 : vector<1x384xf32> to vector<128x384xf32>
    %6 = arith.addf %3, %5 : vector<128x384xf32>
    %7 = vector.extract_strided_slice %6 {offsets = [0, 0], sizes = [128, 128], strides = [1, 1]} : vector<128x384xf32> to vector<128x128xf32>
    %8 = vector.shape_cast %7 : vector<128x128xf32> to vector<16x8x128xf32>
    %9 = vector.extract_strided_slice %6 {offsets = [0, 128], sizes = [128, 128], strides = [1, 1]} : vector<128x384xf32> to vector<128x128xf32>
    %10 = vector.shape_cast %9 : vector<128x128xf32> to vector<16x8x128xf32>
    %11 = vector.extract_strided_slice %6 {offsets = [0, 256], sizes = [128, 128], strides = [1, 1]} : vector<128x384xf32> to vector<128x128xf32>
    %12 = vector.shape_cast %11 : vector<128x128xf32> to vector<16x8x128xf32>
    %13 = vector.extract_strided_slice %8 {offsets = [0, 0, 0], sizes = [16, 8, 32], strides = [1, 1, 1]} : vector<16x8x128xf32> to vector<16x8x32xf32>
    %14 = vector.extract_strided_slice %10 {offsets = [0, 0, 0], sizes = [16, 8, 32], strides = [1, 1, 1]} : vector<16x8x128xf32> to vector<16x8x32xf32>
    %15 = vector.extract_strided_slice %12 {offsets = [0, 0, 0], sizes = [16, 8, 32], strides = [1, 1, 1]} : vector<16x8x128xf32> to vector<16x8x32xf32>
    %cst_6 = arith.constant 0.0883883461 : f32
    %16 = vector.broadcast %cst_6 : f32 to vector<16x8x32xf32>
    %17 = arith.mulf %13, %16 : vector<16x8x32xf32>
    "tpu.trace_start"() <{level = 10 : i32, message = "bqd,bkd->bqk"}> : () -> ()
    %cst_7 = arith.constant dense<0.000000e+00> : vector<16x8x8xf32>
    %18 = tpu.matmul %17, %14, %cst_7 {dimension_numbers = #tpu.dot_dimension_numbers<[2], [2], [1], [1], [0, 0, 0, 1, 1, 1], [0], [0]>} : vector<16x8x32xf32>, vector<16x8x32xf32>, vector<16x8x8xf32> -> vector<16x8x8xf32>
    "tpu.trace_stop"() : () -> ()
    %cst_8 = arith.constant dense<0xFF800000> : vector<16x8xf32>
    %19 = vector.multi_reduction <maximumf>, %18, %cst_8 [2] : vector<16x8x8xf32> to vector<16x8xf32>
    %20 = vector.shape_cast %19 : vector<16x8xf32> to vector<16x8x1xf32>
    %21 = vector.broadcast %20 : vector<16x8x1xf32> to vector<16x8x8xf32>
    %22 = arith.subf %18, %21 : vector<16x8x8xf32>
    %23 = math.exp %22 : vector<16x8x8xf32>
    %cst_9 = arith.constant dense<0.000000e+00> : vector<16x8xf32>
    %24 = vector.multi_reduction <add>, %23, %cst_9 [2] : vector<16x8x8xf32> to vector<16x8xf32>
    %25 = vector.shape_cast %24 : vector<16x8xf32> to vector<16x8x1xf32>
    %26 = vector.broadcast %25 : vector<16x8x1xf32> to vector<16x8x8xf32>
    %27 = arith.divf %23, %26 : vector<16x8x8xf32>
    "tpu.trace_start"() <{level = 10 : i32, message = "bqk,bkd->bqd"}> : () -> ()
    %cst_10 = arith.constant dense<0.000000e+00> : vector<16x8x32xf32>
    %28 = tpu.matmul %27, %15, %cst_10 {dimension_numbers = #tpu.dot_dimension_numbers<[2], [1], [1], [2], [0, 0, 0, 1, 1, 2], [0], [0]>} : vector<16x8x8xf32>, vector<16x8x32xf32>, vector<16x8x32xf32> -> vector<16x8x32xf32>
    "tpu.trace_stop"() : () -> ()
    %29 = arith.addf %13, %28 : vector<16x8x32xf32>
    %30 = vector.extract_strided_slice %8 {offsets = [0, 0, 32], sizes = [16, 8, 32], strides = [1, 1, 1]} : vector<16x8x128xf32> to vector<16x8x32xf32>
    %31 = vector.extract_strided_slice %10 {offsets = [0, 0, 32], sizes = [16, 8, 32], strides = [1, 1, 1]} : vector<16x8x128xf32> to vector<16x8x32xf32>
    %32 = vector.extract_strided_slice %12 {offsets = [0, 0, 32], sizes = [16, 8, 32], strides = [1, 1, 1]} : vector<16x8x128xf32> to vector<16x8x32xf32>
    %cst_11 = arith.constant 0.0883883461 : f32
    %33 = vector.broadcast %cst_11 : f32 to vector<16x8x32xf32>
    %34 = arith.mulf %30, %33 : vector<16x8x32xf32>
    "tpu.trace_start"() <{level = 10 : i32, message = "bqd,bkd->bqk"}> : () -> ()
    %cst_12 = arith.constant dense<0.000000e+00> : vector<16x8x8xf32>
    %35 = tpu.matmul %34, %31, %cst_12 {dimension_numbers = #tpu.dot_dimension_numbers<[2], [2], [1], [1], [0, 0, 0, 1, 1, 1], [0], [0]>} : vector<16x8x32xf32>, vector<16x8x32xf32>, vector<16x8x8xf32> -> vector<16x8x8xf32>
    "tpu.trace_stop"() : () -> ()
    %cst_13 = arith.constant dense<0xFF800000> : vector<16x8xf32>
    %36 = vector.multi_reduction <maximumf>, %35, %cst_13 [2] : vector<16x8x8xf32> to vector<16x8xf32>
    %37 = vector.shape_cast %36 : vector<16x8xf32> to vector<16x8x1xf32>
    %38 = vector.broadcast %37 : vector<16x8x1xf32> to vector<16x8x8xf32>
    %39 = arith.subf %35, %38 : vector<16x8x8xf32>
    %40 = math.exp %39 : vector<16x8x8xf32>
    %cst_14 = arith.constant dense<0.000000e+00> : vector<16x8xf32>
    %41 = vector.multi_reduction <add>, %40, %cst_14 [2] : vector<16x8x8xf32> to vector<16x8xf32>
    %42 = vector.shape_cast %41 : vector<16x8xf32> to vector<16x8x1xf32>
    %43 = vector.broadcast %42 : vector<16x8x1xf32> to vector<16x8x8xf32>
    %44 = arith.divf %40, %43 : vector<16x8x8xf32>
    "tpu.trace_start"() <{level = 10 : i32, message = "bqk,bkd->bqd"}> : () -> ()
    %cst_15 = arith.constant dense<0.000000e+00> : vector<16x8x32xf32>
    %45 = tpu.matmul %44, %32, %cst_15 {dimension_numbers = #tpu.dot_dimension_numbers<[2], [1], [1], [2], [0, 0, 0, 1, 1, 2], [0], [0]>} : vector<16x8x8xf32>, vector<16x8x32xf32>, vector<16x8x32xf32> -> vector<16x8x32xf32>
    "tpu.trace_stop"() : () -> ()
    %46 = arith.addf %30, %45 : vector<16x8x32xf32>
    %47 = vector.extract_strided_slice %8 {offsets = [0, 0, 64], sizes = [16, 8, 32], strides = [1, 1, 1]} : vector<16x8x128xf32> to vector<16x8x32xf32>
    %48 = vector.extract_strided_slice %10 {offsets = [0, 0, 64], sizes = [16, 8, 32], strides = [1, 1, 1]} : vector<16x8x128xf32> to vector<16x8x32xf32>
    %49 = vector.extract_strided_slice %12 {offsets = [0, 0, 64], sizes = [16, 8, 32], strides = [1, 1, 1]} : vector<16x8x128xf32> to vector<16x8x32xf32>
    %cst_16 = arith.constant 0.0883883461 : f32
    %50 = vector.broadcast %cst_16 : f32 to vector<16x8x32xf32>
    %51 = arith.mulf %47, %50 : vector<16x8x32xf32>
    "tpu.trace_start"() <{level = 10 : i32, message = "bqd,bkd->bqk"}> : () -> ()
    %cst_17 = arith.constant dense<0.000000e+00> : vector<16x8x8xf32>
    %52 = tpu.matmul %51, %48, %cst_17 {dimension_numbers = #tpu.dot_dimension_numbers<[2], [2], [1], [1], [0, 0, 0, 1, 1, 1], [0], [0]>} : vector<16x8x32xf32>, vector<16x8x32xf32>, vector<16x8x8xf32> -> vector<16x8x8xf32>
    "tpu.trace_stop"() : () -> ()
    %cst_18 = arith.constant dense<0xFF800000> : vector<16x8xf32>
    %53 = vector.multi_reduction <maximumf>, %52, %cst_18 [2] : vector<16x8x8xf32> to vector<16x8xf32>
    %54 = vector.shape_cast %53 : vector<16x8xf32> to vector<16x8x1xf32>
    %55 = vector.broadcast %54 : vector<16x8x1xf32> to vector<16x8x8xf32>
    %56 = arith.subf %52, %55 : vector<16x8x8xf32>
    %57 = math.exp %56 : vector<16x8x8xf32>
    %cst_19 = arith.constant dense<0.000000e+00> : vector<16x8xf32>
    %58 = vector.multi_reduction <add>, %57, %cst_19 [2] : vector<16x8x8xf32> to vector<16x8xf32>
    %59 = vector.shape_cast %58 : vector<16x8xf32> to vector<16x8x1xf32>
    %60 = vector.broadcast %59 : vector<16x8x1xf32> to vector<16x8x8xf32>
    %61 = arith.divf %57, %60 : vector<16x8x8xf32>
    "tpu.trace_start"() <{level = 10 : i32, message = "bqk,bkd->bqd"}> : () -> ()
    %cst_20 = arith.constant dense<0.000000e+00> : vector<16x8x32xf32>
    %62 = tpu.matmul %61, %49, %cst_20 {dimension_numbers = #tpu.dot_dimension_numbers<[2], [1], [1], [2], [0, 0, 0, 1, 1, 2], [0], [0]>} : vector<16x8x8xf32>, vector<16x8x32xf32>, vector<16x8x32xf32> -> vector<16x8x32xf32>
    "tpu.trace_stop"() : () -> ()
    %63 = arith.addf %47, %62 : vector<16x8x32xf32>
    %64 = vector.extract_strided_slice %8 {offsets = [0, 0, 96], sizes = [16, 8, 32], strides = [1, 1, 1]} : vector<16x8x128xf32> to vector<16x8x32xf32>
    %65 = vector.extract_strided_slice %10 {offsets = [0, 0, 96], sizes = [16, 8, 32], strides = [1, 1, 1]} : vector<16x8x128xf32> to vector<16x8x32xf32>
    %66 = vector.extract_strided_slice %12 {offsets = [0, 0, 96], sizes = [16, 8, 32], strides = [1, 1, 1]} : vector<16x8x128xf32> to vector<16x8x32xf32>
    %cst_21 = arith.constant 0.0883883461 : f32
    %67 = vector.broadcast %cst_21 : f32 to vector<16x8x32xf32>
    %68 = arith.mulf %64, %67 : vector<16x8x32xf32>
    "tpu.trace_start"() <{level = 10 : i32, message = "bqd,bkd->bqk"}> : () -> ()
    %cst_22 = arith.constant dense<0.000000e+00> : vector<16x8x8xf32>
    %69 = tpu.matmul %68, %65, %cst_22 {dimension_numbers = #tpu.dot_dimension_numbers<[2], [2], [1], [1], [0, 0, 0, 1, 1, 1], [0], [0]>} : vector<16x8x32xf32>, vector<16x8x32xf32>, vector<16x8x8xf32> -> vector<16x8x8xf32>
    "tpu.trace_stop"() : () -> ()
    %cst_23 = arith.constant dense<0xFF800000> : vector<16x8xf32>
    %70 = vector.multi_reduction <maximumf>, %69, %cst_23 [2] : vector<16x8x8xf32> to vector<16x8xf32>
    %71 = vector.shape_cast %70 : vector<16x8xf32> to vector<16x8x1xf32>
    %72 = vector.broadcast %71 : vector<16x8x1xf32> to vector<16x8x8xf32>
    %73 = arith.subf %69, %72 : vector<16x8x8xf32>
    %74 = math.exp %73 : vector<16x8x8xf32>
    %cst_24 = arith.constant dense<0.000000e+00> : vector<16x8xf32>
    %75 = vector.multi_reduction <add>, %74, %cst_24 [2] : vector<16x8x8xf32> to vector<16x8xf32>
    %76 = vector.shape_cast %75 : vector<16x8xf32> to vector<16x8x1xf32>
    %77 = vector.broadcast %76 : vector<16x8x1xf32> to vector<16x8x8xf32>
    %78 = arith.divf %74, %77 : vector<16x8x8xf32>
    "tpu.trace_start"() <{level = 10 : i32, message = "bqk,bkd->bqd"}> : () -> ()
    %cst_25 = arith.constant dense<0.000000e+00> : vector<16x8x32xf32>
    %79 = tpu.matmul %78, %66, %cst_25 {dimension_numbers = #tpu.dot_dimension_numbers<[2], [1], [1], [2], [0, 0, 0, 1, 1, 2], [0], [0]>} : vector<16x8x8xf32>, vector<16x8x32xf32>, vector<16x8x32xf32> -> vector<16x8x32xf32>
    "tpu.trace_stop"() : () -> ()
    %80 = arith.addf %64, %79 : vector<16x8x32xf32>
    %81 = tpu.concatenate %29, %46, %63, %80 in 2 : vector<16x8x32xf32>, vector<16x8x32xf32>, vector<16x8x32xf32>, vector<16x8x32xf32> -> vector<16x8x128xf32>
    %82 = vector.shape_cast %81 : vector<16x8x128xf32> to vector<128x128xf32>
    %c0_26 = arith.constant 0 : index
    %c0_27 = arith.constant 0 : index
    %83 = vector.load %arg4[%c0_26, %c0_27] : memref<128x128xf32, #tpu.memory_space<vmem>>, vector<128x128xf32>
    %cst_28 = arith.constant dense<0.000000e+00> : vector<128x128xf32>
    %84 = tpu.matmul %82, %83, %cst_28 {dimension_numbers = #tpu.dot_dimension_numbers<[1], [0], [0], [1], [0, 0, 1, 1], [], []>} : vector<128x128xf32>, vector<128x128xf32>, vector<128x128xf32> -> vector<128x128xf32>
    %c0_29 = arith.constant 0 : index
    %c0_30 = arith.constant 0 : index
    %85 = vector.load %arg5[%c0_29, %c0_30] : memref<1x128xf32, #tpu.memory_space<vmem>>, vector<1x128xf32>
    %86 = vector.broadcast %85 : vector<1x128xf32> to vector<128x128xf32>
    %87 = arith.addf %84, %86 : vector<128x128xf32>
    %cst_31 = arith.constant 0.000000e+00 : f32
    %88 = vector.broadcast %cst_31 : f32 to vector<128x128xf32>
    %89 = arith.maximumf %87, %88 : vector<128x128xf32>
    %90 = arith.addf %82, %89 : vector<128x128xf32>
    %c0_32 = arith.constant 0 : index
    %c0_33 = arith.constant 0 : index
    %91 = vector.load %arg6[%c0_32, %c0_33] : memref<128x96xf32, #tpu.memory_space<vmem>>, vector<128x96xf32>
    %cst_34 = arith.constant dense<0.000000e+00> : vector<128x96xf32>
    %92 = tpu.matmul %90, %91, %cst_34 {dimension_numbers = #tpu.dot_dimension_numbers<[1], [0], [0], [1], [0, 0, 1, 1], [], []>} : vector<128x128xf32>, vector<128x96xf32>, vector<128x96xf32> -> vector<128x96xf32>
    %c0_35 = arith.constant 0 : index
    %c0_36 = arith.constant 0 : index
    %93 = vector.load %arg7[%c0_35, %c0_36] : memref<1x96xf32, #tpu.memory_space<vmem>>, vector<1x96xf32>
    %94 = vector.broadcast %93 : vector<1x96xf32> to vector<128x96xf32>
    %95 = arith.addf %92, %94 : vector<128x96xf32>
    %96 = vector.extract_strided_slice %95 {offsets = [0, 0], sizes = [128, 32], strides = [1, 1]} : vector<128x96xf32> to vector<128x32xf32>
    %97 = vector.shape_cast %96 : vector<128x32xf32> to vector<16x8x32xf32>
    %98 = vector.extract_strided_slice %95 {offsets = [0, 32], sizes = [128, 32], strides = [1, 1]} : vector<128x96xf32> to vector<128x32xf32>
    %99 = vector.shape_cast %98 : vector<128x32xf32> to vector<16x8x32xf32>
    %100 = vector.extract_strided_slice %95 {offsets = [0, 64], sizes = [128, 32], strides = [1, 1]} : vector<128x96xf32> to vector<128x32xf32>
    %101 = vector.shape_cast %100 : vector<128x32xf32> to vector<16x8x32xf32>
    %cst_37 = arith.constant 0.176776692 : f32
    %102 = vector.broadcast %cst_37 : f32 to vector<16x8x32xf32>
    %103 = arith.mulf %97, %102 : vector<16x8x32xf32>
    "tpu.trace_start"() <{level = 10 : i32, message = "bqd,bkd->bqk"}> : () -> ()
    %cst_38 = arith.constant dense<0.000000e+00> : vector<16x8x8xf32>
    %104 = tpu.matmul %103, %99, %cst_38 {dimension_numbers = #tpu.dot_dimension_numbers<[2], [2], [1], [1], [0, 0, 0, 1, 1, 1], [0], [0]>} : vector<16x8x32xf32>, vector<16x8x32xf32>, vector<16x8x8xf32> -> vector<16x8x8xf32>
    "tpu.trace_stop"() : () -> ()
    %cst_39 = arith.constant dense<0xFF800000> : vector<16x8xf32>
    %105 = vector.multi_reduction <maximumf>, %104, %cst_39 [2] : vector<16x8x8xf32> to vector<16x8xf32>
    %106 = vector.shape_cast %105 : vector<16x8xf32> to vector<16x8x1xf32>
    %107 = vector.broadcast %106 : vector<16x8x1xf32> to vector<16x8x8xf32>
    %108 = arith.subf %104, %107 : vector<16x8x8xf32>
    %109 = math.exp %108 : vector<16x8x8xf32>
    %cst_40 = arith.constant dense<0.000000e+00> : vector<16x8xf32>
    %110 = vector.multi_reduction <add>, %109, %cst_40 [2] : vector<16x8x8xf32> to vector<16x8xf32>
    %111 = vector.shape_cast %110 : vector<16x8xf32> to vector<16x8x1xf32>
    %112 = vector.broadcast %111 : vector<16x8x1xf32> to vector<16x8x8xf32>
    %113 = arith.divf %109, %112 : vector<16x8x8xf32>
    "tpu.trace_start"() <{level = 10 : i32, message = "bqk,bkd->bqd"}> : () -> ()
    %cst_41 = arith.constant dense<0.000000e+00> : vector<16x8x32xf32>
    %114 = tpu.matmul %113, %101, %cst_41 {dimension_numbers = #tpu.dot_dimension_numbers<[2], [1], [1], [2], [0, 0, 0, 1, 1, 2], [0], [0]>} : vector<16x8x8xf32>, vector<16x8x32xf32>, vector<16x8x32xf32> -> vector<16x8x32xf32>
    "tpu.trace_stop"() : () -> ()
    %115 = arith.addf %97, %114 : vector<16x8x32xf32>
    %116 = vector.shape_cast %115 : vector<16x8x32xf32> to vector<128x32xf32>
    %c0_42 = arith.constant 0 : index
    %c0_43 = arith.constant 0 : index
    %117 = vector.load %arg8[%c0_42, %c0_43] : memref<32x32xf32, #tpu.memory_space<vmem>>, vector<32x32xf32>
    %cst_44 = arith.constant dense<0.000000e+00> : vector<128x32xf32>
    %118 = tpu.matmul %116, %117, %cst_44 {dimension_numbers = #tpu.dot_dimension_numbers<[1], [0], [0], [1], [0, 0, 1, 1], [], []>} : vector<128x32xf32>, vector<32x32xf32>, vector<128x32xf32> -> vector<128x32xf32>
    %c0_45 = arith.constant 0 : index
    %c0_46 = arith.constant 0 : index
    %119 = vector.load %arg9[%c0_45, %c0_46] : memref<1x32xf32, #tpu.memory_space<vmem>>, vector<1x32xf32>
    %120 = vector.broadcast %119 : vector<1x32xf32> to vector<128x32xf32>
    %121 = arith.addf %118, %120 : vector<128x32xf32>
    %cst_47 = arith.constant 0.000000e+00 : f32
    %122 = vector.broadcast %cst_47 : f32 to vector<128x32xf32>
    %123 = arith.maximumf %121, %122 : vector<128x32xf32>
    %124 = arith.addf %116, %123 : vector<128x32xf32>
    %c0_48 = arith.constant 0 : index
    %c0_49 = arith.constant 0 : index
    %125 = vector.load %arg10[%c0_48, %c0_49] : memref<128x32xf32, #tpu.memory_space<vmem>>, vector<128x32xf32>
    tpu.vector_store %arg10[%c0_48, %c0_49], %124 {strides = array<i32>} : memref<128x32xf32, #tpu.memory_space<vmem>>, vector<128x32xf32>,
    return
  }
  func.func @transform_0(%arg0: i32) -> (i32, i32, i32) {
    %c0_i32 = arith.constant 0 : i32
    %c0_i32_0 = arith.constant 0 : i32
    %c0_i32_1 = arith.constant 0 : i32
    return %arg0, %c0_i32, %c0_i32_0 : i32, i32, i32
  }
  func.func @transform_1(%arg0: i32) -> (i32, i32) {
    %c0_i32 = arith.constant 0 : i32
    %c0_i32_0 = arith.constant 0 : i32
    %c0_i32_1 = arith.constant 0 : i32
    return %c0_i32, %c0_i32_0 : i32, i32
  }
  func.func @transform_2(%arg0: i32) -> (i32, i32) {
    %c0_i32 = arith.constant 0 : i32
    %c0_i32_0 = arith.constant 0 : i32
    %c0_i32_1 = arith.constant 0 : i32
    return %c0_i32, %c0_i32_0 : i32, i32
  }
  func.func @transform_3(%arg0: i32) -> (i32, i32) {
    %c0_i32 = arith.constant 0 : i32
    %c0_i32_0 = arith.constant 0 : i32
    %c0_i32_1 = arith.constant 0 : i32
    return %c0_i32, %c0_i32_0 : i32, i32
  }
  func.func @transform_4(%arg0: i32) -> (i32, i32) {
    %c0_i32 = arith.constant 0 : i32
    %c0_i32_0 = arith.constant 0 : i32
    %c0_i32_1 = arith.constant 0 : i32
    return %c0_i32, %c0_i32_0 : i32, i32
  }
  func.func @transform_5(%arg0: i32) -> (i32, i32) {
    %c0_i32 = arith.constant 0 : i32
    %c0_i32_0 = arith.constant 0 : i32
    %c0_i32_1 = arith.constant 0 : i32
    return %c0_i32, %c0_i32_0 : i32, i32
  }
  func.func @transform_6(%arg0: i32) -> (i32, i32) {
    %c0_i32 = arith.constant 0 : i32
    %c0_i32_0 = arith.constant 0 : i32
    %c0_i32_1 = arith.constant 0 : i32
    return %c0_i32, %c0_i32_0 : i32, i32
  }
  func.func @transform_7(%arg0: i32) -> (i32, i32) {
    %c0_i32 = arith.constant 0 : i32
    %c0_i32_0 = arith.constant 0 : i32
    %c0_i32_1 = arith.constant 0 : i32
    return %c0_i32, %c0_i32_0 : i32, i32
  }
  func.func @transform_8(%arg0: i32) -> (i32, i32) {
    %c0_i32 = arith.constant 0 : i32
    %c0_i32_0 = arith.constant 0 : i32
    %c0_i32_1 = arith.constant 0 : i32
    return %c0_i32, %c0_i32_0 : i32, i32
  }
  func.func @transform_9(%arg0: i32) -> (i32, i32) {
    %c0_i32 = arith.constant 0 : i32
    %c0_i32_0 = arith.constant 0 : i32
    return %arg0, %c0_i32 : i32, i32
  }
}

</mosaic_0001>

<bundles_post_ra>
// kernel: tpu_custom_call.1
= control target key start
LH: loop header
LB: loop body
LE: loop exit
PB: predicated region body
PF: predicated region fallthrough
CT: control target
= control target key end

     0   :  { %14 = vsyncpa [#allocation3], 0  ;;  %s20069_s0 = inlined_call_operand.vmem [shape: f32[16,8,20], index: 0, kind: input, shape index: {}]   ;;  %s20070_s1 = inlined_call_operand.vmem [shape: f32[20,384], index: 1, kind: input, shape index: {}]   ;;  %s20071_s2 = inlined_call_operand.hbm [shape: f32[1,384], index: 2, kind: input, shape index: {}]   ;;  %s20072_s3 = inlined_call_operand.hbm [shape: f32[128,128], index: 3, kind: input, shape index: {}]   ;;  %s20073_s4 = inlined_call_operand.vmem [shape: f32[1,128], index: 4, kind: input, shape index: {}]   ;;  %s20074_s5 = inlined_call_operand.vmem [shape: f32[128,96], index: 5, kind: input, shape index: {}]   ;;  %s20075_s6 = inlined_call_operand.vmem [shape: f32[1,96], index: 6, kind: input, shape index: {}]   ;;  %s20076_s7 = inlined_call_operand.vmem [shape: f32[32,32], index: 7, kind: input, shape index: {}]   ;;  %s20077_s8 = inlined_call_operand.vmem [shape: f32[1,32], index: 8, kind: input, shape index: {}]   ;;  %s20078_s9 = inlined_call_operand.vmem [shape: f32[128,32], index: 9, kind: output, shape index: {}]  }
   0x1   :  { %15 = vsyncpa [#allocation5], 0  ;;  %s16653_s30 = smov [#allocation2]   ;;  %s16654_s11 = smov [#allocation4]  }
   0x2   :  { %s26_s10 = sshll.u32 %s16653_s30, 4  ;;  %s35_s12 = sshll.u32 %s16654_s11, 4  ;;  %s27_s10 = int_to_ptr.vmem [resolvable:$true] %s26_s10  ;;  %s36_s12 = int_to_ptr.vmem [resolvable:$true] %s35_s12 }
   0x3   :  { %s16617_s13 = scalar_lea.vmem %s27_s10, 48  ;;  %s16621_s14 = scalar_lea.vmem %s27_s10, 64 }
   0x4   :  { %p16618_p0 = scmp.ne.s32.totalorder %s27_s10, %s16617_s13  ;;  %p16622_p1 = scmp.lt.s32.totalorder %s27_s10, %s27_s10 }
   0x5   :  { %p16623_p2 = scmp.lt.s32.totalorder %s16621_s14, %s16617_s13 }
   0x7   :  { %p16624_p3 = por %p16623_p2, %p16622_p1 }
   0x9   :  { %p16625_p4 = pnand %p16624_p3, %p16618_p0 }
   0xb   :  { %16628 = shalt.err (!%p16625_p4)
}
   0xc   :  { %29 = dma.hbm_to_vmem [thread:$0]  %s20071_s2, 48, %s27_s10, [#allocation3]  }
   0xd   :  { %s16637_s17 = scalar_lea.vmem %s36_s12, 2048  ;;  %p16642_p6 = scmp.lt.s32.totalorder %s36_s12, %s36_s12 }
   0xe   :  { %p16638_p5 = scmp.ne.s32.totalorder %s36_s12, %s16637_s17  ;;  %p16643_p7 = scmp.lt.s32.totalorder %s16637_s17, %s16637_s17 }
  0x10   :  { %p16644_p8 = por %p16643_p7, %p16642_p6 }
  0x12   :  { %p16645_p9 = pnand %p16644_p8, %p16638_p5 }
  0x14   :  { %16648 = shalt.err (!%p16645_p9)
}
  0x15   :  { %s16655_s18 = smov 128   ;;  %s16656_s19 = smov 8  }
  0x16   :  { %41 = dma.hbm_to_vmem [thread:$0]  %s20072_s3, 2048, %s36_s12, [#allocation5], %s16655_s18, %s16655_s18, %s16656_s19  }
  0x17   :  { %16649 = dma.done.wait [#allocation3], 48  }
  0x18   :  { %16650 = vsyncadd [#allocation3], 4294967248 }
  0x19   :  { %16651 = dma.done.wait [#allocation5], 2048  }
  0x1a   :  { %16652 = vsyncadd [#allocation5], 4294965248  ;;  %v20097_v0 = vmov 0.0   ;;  %vm149_vm0 = vcmask 1043456   ;;  %v81_v1 = vld [vmem:[%s20070_s1 + $0x38] sm:$0xf]  ;;  %v85_v26 = vlaneseq }
  0x1b   :  { %223 = vmatprep.mubr.f32.mxu0 %v20097_v0  ;;  %295 = vmatprep.mubr.f32.mxu1 %v20097_v0  ;;  %v80_v2 = vld [vmem:[%s20070_s1 + $0x30] sm:$0xf]  ;;  %v78_v3 = vld [vmem:[%s20070_s1 + $0x20] sm:$0xff]  ;;  %v77_v4 = vld [vmem:[%s20070_s1 + $0x18] sm:$0xff]  ;;  %vm100_vm1 = vcmask 162816   ;;  %vm16658_vm2 = vmmov 0  }
  0x1c   :  { %14583 = vmatprep.subr.msk.mxu0 %vm149_vm0, %v81_v1  ;;  %16274 = vmatprep.subr.msk.mxu1 %vm149_vm0, %v81_v1  ;;  %v75_v5 = vld [vmem:[%s20070_s1 + $0x8] sm:$0xff]  ;;  %v74_v6 = vld [vmem:[%s20070_s1] sm:$0xff]  ;;  %v60_v13 = vld [vmem:[%s20069_s0 + $0x10] sm:$0xff]  ;;  %v16857_v27 = vshrl.u32 %v85_v26, 7  ;;  %vm481_vm3 = vcmask 261120   ;;  %vm1698_vm4 = vcmask 64512  }
  0x1d   :  { %14584 = vmatpush1.msk.msra.mxu0 %vm149_vm0, %v80_v2  ;;  %16277 = vmatpush1.msk.msra.mxu1 %vm149_vm0, %v80_v2  ;;  %v58_v7 = vld [vmem:[%s20069_s0] sm:$0xff]  ;;  %v59_v10 = vld [vmem:[%s20069_s0 + $0x8] sm:$0xff]  ;;  %v72_v14 = vld [vmem:[%s20069_s0 + $0x70] sm:$0xff]  ;;  %s16660_s24 = smov 64   ;;  %s16661_s25 = smov 32   ;;  %vm11251_vm5 = vcmask 523264  }
  0x1e   :  { %187 = vmatprep.subr.mxu0 %v78_v3  ;;  %16275 = vmatprep.subr.mxu1 %v78_v3  ;;  %v16748_v8 = vld [vmem:[%s20069_s0 + $0x60] sm:$0xff]  ;;  %v71_v11 = vld [vmem:[%s20069_s0 + $0x68] sm:$0xff]  ;;  %v76_v15 = vld [vmem:[%s20070_s1 + $0x10] sm:$0xff]  ;;  %v87_v28 = vsub.s32 0, %v16857_v27  ;;  %v91_v30 = vsub.s32 1, %v16857_v27  ;;  %v95_v60 = vsub.s32 2, %v16857_v27 }
  0x1f   :  { %188 = vmatpush1.msra.mxu0 %v77_v4  ;;  %16278 = vmatpush1.msra.mxu1 %v77_v4  ;;  %v82_v9 = vld [vmem:[%s20070_s1 + $0x40] sm:$0xf]  ;;  %v79_v12 = vld [vmem:[%s20070_s1 + $0x28] sm:$0xff]  ;;  %v61_v16 = vld [vmem:[%s20069_s0 + $0x18] sm:$0xff]  ;;  %vm11268_vm6 = vcmask 785408  }
  0x20   :  { %189 = vmatprep.subr.mxu0 %v75_v5  ;;  %16276 = vmatprep.subr.mxu1 %v75_v5  ;;  %v73_v17 = vld [vmem:[%s20069_s0 + $0x78] sm:$0xff]  ;;  %v62_v18 = vld [vmem:[%s20069_s0 + $0x20] sm:$0xff]  ;;  %v63_v19 = vld [vmem:[%s20069_s0 + $0x28] sm:$0xff] }
  0x21   :  { %190 = vmatpush1.msra.mxu0 %v74_v6  ;;  %16279 = vmatpush1.msra.mxu1 %v74_v6  ;;  %v64_v20 = vld [vmem:[%s20069_s0 + $0x30] sm:$0xff]  ;;  %v65_v21 = vld [vmem:[%s20069_s0 + $0x38] sm:$0xff]  ;;  %v66_v22 = vld [vmem:[%s20069_s0 + $0x40] sm:$0xff] }
  0x22   :  { %14585 = vmatmul.mubr.msk.f32.vlgmr.msra.gmra.mxu0 %vm100_vm1, %v58_v7  ;;  %14597 = vmatmul.mubr.msk.f32.vlgmr.msra.gmra.mxu1 %vm100_vm1, %v16748_v8  ;;  %v67_v23 = vld [vmem:[%s20069_s0 + $0x48] sm:$0xff]  ;;  %v68_v24 = vld [vmem:[%s20069_s0 + $0x50] sm:$0xff]  ;;  %v69_v25 = vld [vmem:[%s20069_s0 + $0x58] sm:$0xff]  ;;  %s16659_s0 = smov 96  }
  0x23   :  { %229 = vmatprep.mubr.f32.mxu0 %v20097_v0  ;;  %301 = vmatprep.mubr.f32.mxu1 %v20097_v0  ;;  %v83_v29 = vld [vmem:[#allocation2] sm:$0x7] }
  0x24   :  { %15300 = vmatprep.subr.msk.mxu1 %vm149_vm0, %v82_v9  ;;  %15370 = vmatprep.subr.mxu0 %v20097_v0  ;;  %v16861_v31 = vrot.slane %v83_v29, %v87_v28  ;;  %v16863_v32 = vrot.slane %v83_v29, %v91_v30  ;;  %v16966_v5 = vrot.slane %v83_v29, %v95_v60 }
  0x25   :  { %15301 = vmatpush3.msk.msra.mxu1 %vm149_vm0, %v82_v9 }
  0x26   :  { %14586 = vmatmul.mubr.msk.f32.gmra.mxu0 %vm100_vm1, %v59_v10  ;;  %14598 = vmatmul.mubr.msk.f32.gmra.mxu1 %vm100_vm1, %v71_v11 }
  0x27   :  { %235 = vmatprep.mubr.f32.mxu0 %v20097_v0  ;;  %307 = vmatprep.mubr.f32.mxu1 %v20097_v0 }
  0x28   :  { %15302 = vmatprep.subr.mxu1 %v79_v12 }
  0x29   :  { %15303 = vmatpush3.msra.mxu1 %v79_v12 }
  0x2a   :  { %14587 = vmatmul.mubr.msk.f32.gmra.mxu0 %vm100_vm1, %v60_v13  ;;  %14599 = vmatmul.mubr.msk.f32.gmra.mxu1 %vm100_vm1, %v72_v14 }
  0x2b   :  { %241 = vmatprep.mubr.f32.mxu0 %v20097_v0  ;;  %313 = vmatprep.mubr.f32.mxu1 %v20097_v0 }
  0x2c   :  { %15304 = vmatprep.subr.mxu1 %v76_v15 }
  0x2d   :  { %15305 = vmatpush3.msra.mxu1 %v76_v15 }
  0x2e   :  { %14588 = vmatmul.mubr.msk.f32.gmra.mxu0 %vm100_vm1, %v61_v16  ;;  %14600 = vmatmul.mubr.msk.f32.gmra.mxu1 %vm100_vm1, %v73_v17 }
  0x2f   :  { %247 = vmatprep.mubr.f32.mxu0 %v20097_v0  ;;  %15306 = vmatprep.mubr.msk.f32.mxu1 %vm100_vm1, %v58_v7 }
  0x30   :  { %15330 = vmatprep.subr.mxu1 %v20097_v0 }
  0x32   :  { %14589 = vmatmul.mubr.msk.f32.gmra.mxu0 %vm100_vm1, %v62_v18  ;;  %15307 = vmatmul.mubr.msk.f32.vlgmr.msra.gmra.mxu1 %vm100_vm1, %v59_v10 }
  0x33   :  { %253 = vmatprep.mubr.f32.mxu0 %v20097_v0  ;;  %15309 = vmatprep.mubr.msk.f32.mxu1 %vm100_vm1, %v60_v13 }
  0x36   :  { %14590 = vmatmul.mubr.msk.f32.gmra.mxu0 %vm100_vm1, %v63_v19  ;;  %15310 = vmatmul.mubr.msk.f32.gmra.mxu1 %vm100_vm1, %v61_v16 }
  0x37   :  { %259 = vmatprep.mubr.f32.mxu0 %v20097_v0  ;;  %15312 = vmatprep.mubr.msk.f32.mxu1 %vm100_vm1, %v62_v18 }
  0x3a   :  { %14591 = vmatmul.mubr.msk.f32.gmra.mxu0 %vm100_vm1, %v64_v20  ;;  %15313 = vmatmul.mubr.msk.f32.gmra.mxu1 %vm100_vm1, %v63_v19 }
  0x3b   :  { %265 = vmatprep.mubr.f32.mxu0 %v20097_v0  ;;  %15315 = vmatprep.mubr.msk.f32.mxu1 %vm100_vm1, %v64_v20 }
  0x3e   :  { %14592 = vmatmul.mubr.msk.f32.gmra.mxu0 %vm100_vm1, %v65_v21  ;;  %15316 = vmatmul.mubr.msk.f32.gmra.mxu1 %vm100_vm1, %v65_v21 }
  0x3f   :  { %271 = vmatprep.mubr.f32.mxu0 %v20097_v0  ;;  %15318 = vmatprep.mubr.msk.f32.mxu1 %vm100_vm1, %v66_v22 }
  0x42   :  { %14593 = vmatmul.mubr.msk.f32.gmra.mxu0 %vm100_vm1, %v66_v22  ;;  %15319 = vmatmul.mubr.msk.f32.gmra.mxu1 %vm100_vm1, %v67_v23 }
  0x43   :  { %277 = vmatprep.mubr.f32.mxu0 %v20097_v0  ;;  %15321 = vmatprep.mubr.msk.f32.mxu1 %vm100_vm1, %v68_v24 }
  0x46   :  { %14594 = vmatmul.mubr.msk.f32.gmra.mxu0 %vm100_vm1, %v67_v23  ;;  %15322 = vmatmul.mubr.msk.f32.gmra.mxu1 %vm100_vm1, %v69_v25 }
  0x47   :  { %283 = vmatprep.mubr.f32.mxu0 %v20097_v0  ;;  %15324 = vmatprep.mubr.msk.f32.mxu1 %vm100_vm1, %v16748_v8 }
  0x4a   :  { %14595 = vmatmul.mubr.msk.f32.gmra.mxu0 %vm100_vm1, %v68_v24  ;;  %15325 = vmatmul.mubr.msk.f32.gmra.mxu1 %vm100_vm1, %v71_v11 }
  0x4b   :  { %289 = vmatprep.mubr.f32.mxu0 %v20097_v0  ;;  %15327 = vmatprep.mubr.msk.f32.mxu1 %vm100_vm1, %v72_v14 }
  0x4e   :  { %14596 = vmatmul.mubr.msk.f32.gmra.mxu0 %vm100_vm1, %v69_v25  ;;  %15328 = vmatmul.mubr.msk.f32.gmra.mxu1 %vm100_vm1, %v73_v17 }
  0x4f   :  { %15332 = vmatprep.mubr.msk.f32.mxu1 %vm16658_vm2, %v20097_v0  ;;  %15372 = vmatprep.mubr.msk.f32.mxu0 %vm16658_vm2, %v20097_v0 }
  0xe2   :  { %v225_v33 = vpop.f32.mrf.mxu0  ;;  %v16865_v34 = vpop.f32.mrf.mxu1 }
  0xe3   :  { %v16868_v35 = vadd.f32 %v225_v33, %v16861_v31 }
  0xe4   :  { %v227_v36 = vpop.f32.mrf.mxu0  ;;  %v16870_v37 = vpop.f32.mrf.mxu1 }
  0xe5   :  { %20161 = vst [vmem:[#allocation8_spill] sm:$0xff] %v16868_v35  ;;  %v16873_v38 = vadd.f32 %v227_v36, %v16863_v32  ;;  %v16876_v39 = vmul.f32 0.088388346, %v16868_v35 }
  0xe6   :  { %v231_v40 = vpop.f32.mrf.mxu0  ;;  %v16878_v41 = vpop.f32.mrf.mxu1 }
  0xe7   :  { %20162 = vst [vmem:[#allocation9_spill] sm:$0xff] %v16873_v38  ;;  %20163 = vst [vmem:[#allocation10_spill] sm:$0xff] %v16876_v39  ;;  %3061 = vrot.lane.b32.xlu0 %v16873_v38, %s16659_s0  ;;  %15331 = vmatpush3.xpose.msk.msra.mxu1 %vm481_vm3, %v16873_v38  ;;  %v16885_v42 = vadd.f32 %v231_v40, %v16861_v31 }
  0xe8   :  { %3059 = vrot.lane.b32.xlu1 %v16876_v39, %s16659_s0  ;;  %v233_v43 = vpop.f32.mrf.mxu0  ;;  %15335 = vmatprep.subr.mxu1 %v20097_v0  ;;  %v16890_v44 = vpop.f32.mrf.mxu1 }
  0xe9   :  { %20164 = vst [vmem:[#allocation11_spill] sm:$0xff] %v16885_v42  ;;  %v16893_v45 = vadd.f32 %v233_v43, %v16863_v32  ;;  %v16907_v50 = vmul.f32 0.088388346, %v16885_v42 }
  0xea   :  { %v237_v46 = vpop.f32.mrf.mxu0  ;;  %15333 = vmatmul.mubr.msk.f32.vlgmr.msra.gmra.mxu1 %vm481_vm3, %v16876_v39  ;;  %v16897_v47 = vpop.f32.mrf.mxu1 }
  0xeb   :  { %20165 = vst [vmem:[#allocation12_spill] sm:$0xff] %v16893_v45  ;;  %15336 = vmatpush3.xpose.msk.msra.mxu1 %vm481_vm3, %v16893_v45  ;;  %15337 = vmatprep.mubr.msk.f32.mxu1 %vm16658_vm2, %v20097_v0  ;;  %v16904_v48 = vadd.f32 %v237_v46, %v16861_v31  ;;  %20167 = vst [vmem:[#allocation14_spill] sm:$0xff] %v16907_v50 }
  0xec   :  { %v239_v49 = vpop.f32.mrf.mxu0  ;;  %15340 = vmatprep.subr.mxu1 %v20097_v0  ;;  %3139 = vrot.lane.b32.xlu1 %v16893_v45, %s16659_s0  ;;  %v16912_v51 = vpop.f32.mrf.mxu1 }
  0xed   :  { %20166 = vst [vmem:[#allocation13_spill] sm:$0xff] %v16904_v48  ;;  %v16915_v52 = vadd.f32 %v239_v49, %v16863_v32  ;;  %v16929_v57 = vmul.f32 0.088388346, %v16904_v48 }
  0xee   :  { %v243_v53 = vpop.f32.mrf.mxu0  ;;  %15338 = vmatmul.mubr.msk.f32.vlgmr.msra.gmra.mxu1 %vm481_vm3, %v16907_v50  ;;  %v16919_v54 = vpop.f32.mrf.mxu1 }
  0xef   :  { %20168 = vst [vmem:[#allocation15_spill] sm:$0xff] %v16915_v52  ;;  %15341 = vmatpush3.xpose.msk.msra.mxu1 %vm481_vm3, %v16915_v52  ;;  %15342 = vmatprep.mubr.msk.f32.mxu1 %vm16658_vm2, %v20097_v0  ;;  %v16926_v55 = vadd.f32 %v243_v53, %v16861_v31  ;;  %20170 = vst [vmem:[#allocation17_spill] sm:$0xff] %v16929_v57 }
  0xf0   :  { %v245_v56 = vpop.f32.mrf.mxu0  ;;  %15345 = vmatprep.subr.mxu1 %v20097_v0  ;;  %3217 = vrot.lane.b32.xlu0 %v16915_v52, %s16659_s0  ;;  %v16934_v58 = vpop.f32.mrf.mxu1 }
  0xf1   :  { %20169 = vst [vmem:[#allocation16_spill] sm:$0xff] %v16926_v55  ;;  %v16937_v59 = vadd.f32 %v245_v56, %v16863_v32  ;;  %3137 = vrot.lane.b32.xlu1 %v16907_v50, %s16659_s0  ;;  %v16954_v2 = vmul.f32 0.088388346, %v16926_v55 }
  0xf2   :  { %v249_v61 = vpop.f32.mrf.mxu0  ;;  %15343 = vmatmul.mubr.msk.f32.vlgmr.msra.gmra.mxu1 %vm481_vm3, %v16929_v57  ;;  %v16944_v62 = vpop.f32.mrf.mxu1 }
  0xf3   :  { %20171 = vst [vmem:[#allocation18_spill] sm:$0xff] %v16937_v59  ;;  %15346 = vmatpush3.xpose.msk.msra.mxu1 %vm481_vm3, %v16937_v59  ;;  %15347 = vmatprep.mubr.msk.f32.mxu1 %vm16658_vm2, %v20097_v0  ;;  %v16951_v63 = vadd.f32 %v249_v61, %v16861_v31  ;;  %20173 = vst [vmem:[#allocation20_spill] sm:$0xff] %v16954_v2 }
  0xf4   :  { %v251_v1 = vpop.f32.mrf.mxu0  ;;  %15350 = vmatprep.subr.mxu1 %v20097_v0  ;;  %3215 = vrot.lane.b32.xlu0 %v16929_v57, %s16659_s0  ;;  %v16959_v3 = vpop.f32.mrf.mxu1 }
  0xf5   :  { %20172 = vst [vmem:[#allocation19_spill] sm:$0xff] %v16951_v63  ;;  %v16962_v4 = vadd.f32 %v251_v1, %v16863_v32  ;;  %3295 = vrot.lane.b32.xlu1 %v16937_v59, %s16659_s0  ;;  %v16981_v11 = vmul.f32 0.088388346, %v16951_v63 }
  0xf6   :  { %v255_v6 = vpop.f32.mrf.mxu0  ;;  %15348 = vmatmul.mubr.msk.f32.vlgmr.msra.gmra.mxu1 %vm481_vm3, %v16954_v2  ;;  %v15311_v7 = vpop.f32.mrf.mxu1 }
  0xf7   :  { %20174 = vst [vmem:[#allocation21_spill] sm:$0xff] %v16962_v4  ;;  %15351 = vmatpush3.xpose.msk.msra.mxu1 %vm481_vm3, %v16962_v4  ;;  %15352 = vmatprep.mubr.msk.f32.mxu1 %vm16658_vm2, %v20097_v0  ;;  %v16975_v8 = vadd.f32 %v15311_v7, %v16966_v5  ;;  %v16978_v9 = vadd.f32 %v255_v6, %v16861_v31  ;;  %20177 = vst [vmem:[#allocation24_spill] sm:$0xff] %v16981_v11 }
  0xf8   :  { %v257_v10 = vpop.f32.mrf.mxu0  ;;  %15355 = vmatprep.subr.mxu1 %v20097_v0  ;;  %v16984_v12 = vpop.f32.mrf.mxu1 }
  0xf9   :  { %20175 = vst [vmem:[#allocation22_spill] sm:$0xff] %v16975_v8  ;;  %20176 = vst [vmem:[#allocation23_spill] sm:$0xff] %v16978_v9  ;;  %v16987_v13 = vadd.f32 %v257_v10, %v16863_v32  ;;  %3293 = vrot.lane.b32.xlu1 %v16954_v2, %s16659_s0  ;;  %v17004_v19 = vmul.f32 0.088388346, %v16978_v9 }
  0xfa   :  { %v261_v14 = vpop.f32.mrf.mxu0  ;;  %15353 = vmatmul.mubr.msk.f32.vlgmr.msra.gmra.mxu1 %vm481_vm3, %v16981_v11  ;;  %v15314_v15 = vpop.f32.mrf.mxu1 }
  0xfb   :  { %20178 = vst [vmem:[#allocation25_spill] sm:$0xff] %v16987_v13  ;;  %15356 = vmatpush3.xpose.msk.msra.mxu1 %vm481_vm3, %v16987_v13  ;;  %15357 = vmatprep.mubr.msk.f32.mxu1 %vm16658_vm2, %v20097_v0  ;;  %v16998_v16 = vadd.f32 %v15314_v15, %v16966_v5  ;;  %v17001_v17 = vadd.f32 %v261_v14, %v16861_v31  ;;  %20181 = vst [vmem:[#allocation28_spill] sm:$0xff] %v17004_v19 }
  0xfc   :  { %v263_v18 = vpop.f32.mrf.mxu0  ;;  %15360 = vmatprep.subr.mxu1 %v20097_v0  ;;  %v17007_v20 = vpop.f32.mrf.mxu1 }
  0xfd   :  { %20179 = vst [vmem:[#allocation26_spill] sm:$0xff] %v16998_v16  ;;  %20180 = vst [vmem:[#allocation27_spill] sm:$0xff] %v17001_v17  ;;  %v17010_v21 = vadd.f32 %v263_v18, %v16863_v32  ;;  %v17025_v27 = vmul.f32 0.088388346, %v17001_v17 }
  0xfe   :  { %v267_v22 = vpop.f32.mrf.mxu0  ;;  %15358 = vmatmul.mubr.msk.f32.vlgmr.msra.gmra.mxu1 %vm481_vm3, %v17004_v19  ;;  %v15317_v23 = vpop.f32.mrf.mxu1 }
  0xff   :  { %20182 = vst [vmem:[#allocation29_spill] sm:$0xff] %v17010_v21  ;;  %15361 = vmatpush3.xpose.msk.msra.mxu1 %vm481_vm3, %v17010_v21  ;;  %15362 = vmatprep.mubr.msk.f32.mxu1 %vm16658_vm2, %v20097_v0  ;;  %v17019_v24 = vadd.f32 %v15317_v23, %v16966_v5  ;;  %v17022_v25 = vadd.f32 %v267_v22, %v16861_v31 }
 0x100   :  { %v269_v26 = vpop.f32.mrf.mxu0  ;;  %15365 = vmatprep.subr.mxu1 %v20097_v0  ;;  %v17028_v28 = vpop.f32.mrf.mxu1 }
 0x101   :  { %20183 = vst [vmem:[#allocation30_spill] sm:$0xff] %v17019_v24  ;;  %20184 = vst [vmem:[#allocation31_spill] sm:$0xff] %v17022_v25  ;;  %v17031_v29 = vadd.f32 %v269_v26, %v16863_v32  ;;  %v17046_v46 = vmul.f32 0.088388346, %v17022_v25 }
 0x102   :  { %v273_v30 = vpop.f32.mrf.mxu0  ;;  %15363 = vmatmul.mubr.msk.f32.vlgmr.msra.gmra.mxu1 %vm481_vm3, %v17025_v27  ;;  %v15320_v33 = vpop.f32.mrf.mxu1 }
 0x103   :  { %20185 = vst [vmem:[#allocation32_spill] sm:$0xff] %v17031_v29  ;;  %15366 = vmatpush3.xpose.msk.msra.mxu1 %vm481_vm3, %v17031_v29  ;;  %15367 = vmatprep.mubr.msk.f32.mxu1 %vm16658_vm2, %v20097_v0  ;;  %v17040_v36 = vadd.f32 %v15320_v33, %v16966_v5  ;;  %v17043_v40 = vadd.f32 %v273_v30, %v16861_v31 }
 0x104   :  { %v275_v43 = vpop.f32.mrf.mxu0  ;;  %15375 = vmatprep.subr.mxu1 %v20097_v0  ;;  %v17049_v49 = vpop.f32.mrf.mxu1 }
 0x105   :  { %20186 = vst [vmem:[#allocation33_spill] sm:$0xff] %v17040_v36  ;;  %20187 = vst [vmem:[#allocation34_spill] sm:$0xff] %v17043_v40  ;;  %v17052_v53 = vadd.f32 %v275_v43, %v16863_v32  ;;  %v17064_v1 = vmul.f32 0.088388346, %v17043_v40  ;;  %v17118_v40 = vadd.f32 %v16870_v37, %v16863_v32  ;;  %v17135_v37 = vadd.f32 %v16912_v51, %v16863_v32 }
 0x106   :  { %v279_v56 = vpop.f32.mrf.mxu0  ;;  %15368 = vmatmul.mubr.msk.f32.vlgmr.msra.gmra.mxu1 %vm481_vm3, %v17046_v46  ;;  %v15323_v60 = vpop.f32.mrf.mxu1  ;;  %v17164_v51 = vadd.f32 %v16919_v54, %v16861_v31  ;;  %v17200_v54 = vadd.f32 %v16944_v62, %v16966_v5 }
 0x107   :  { %15371 = vmatpush3.xpose.msk.msra.mxu0 %vm481_vm3, %v17052_v53  ;;  %15377 = vmatprep.mubr.msk.f32.mxu1 %vm16658_vm2, %v20097_v0  ;;  %v17061_v61 = vadd.f32 %v15323_v60, %v16966_v5  ;;  %v17067_v6 = vadd.f32 %v279_v56, %v16861_v31 }
 0x108   :  { %v281_v7 = vpop.f32.mrf.mxu0  ;;  %15380 = vmatprep.subr.mxu0 %v20097_v0  ;;  %v17070_v10 = vpop.f32.mrf.mxu1  ;;  %20197 = vst [vmem:[#allocation44_spill] sm:$0xff] %v17164_v51  ;;  %20199 = vst [vmem:[#allocation46_spill] sm:$0xff] %v17200_v54 }
 0x109   :  { %20188 = vst [vmem:[#allocation35_spill] sm:$0xff] %v17061_v61  ;;  %20189 = vst [vmem:[#allocation36_spill] sm:$0xff] %v17067_v6  ;;  %v17073_v14 = vadd.f32 %v281_v7, %v16863_v32  ;;  %v17088_v30 = vmul.f32 0.088388346, %v17067_v6 }
 0x10a   :  { %v285_v15 = vpop.f32.mrf.mxu0  ;;  %15373 = vmatmul.mubr.msk.f32.vlgmr.msra.gmra.mxu0 %vm481_vm3, %v17064_v1  ;;  %v15326_v18 = vpop.f32.mrf.mxu1 }
 0x10b   :  { %15376 = vmatpush3.xpose.msk.msra.mxu1 %vm481_vm3, %v17073_v14  ;;  %15382 = vmatprep.mubr.msk.f32.mxu0 %vm16658_vm2, %v20097_v0  ;;  %v17082_v22 = vadd.f32 %v15326_v18, %v16966_v5  ;;  %v17085_v23 = vadd.f32 %v285_v15, %v16861_v31  ;;  %v17107_v15 = vadd.f32 %v16865_v34, %v16861_v31 }
 0x10c   :  { %v287_v26 = vpop.f32.mrf.mxu0  ;;  %15385 = vmatprep.subr.mxu1 %v20097_v0  ;;  %v17091_v33 = vpop.f32.mrf.mxu1  ;;  %v17125_v34 = vadd.f32 %v16897_v47, %v16861_v31 }
 0x10d   :  { %20190 = vst [vmem:[#allocation37_spill] sm:$0xff] %v17082_v22  ;;  %20191 = vst [vmem:[#allocation38_spill] sm:$0xff] %v17085_v23  ;;  %v17094_v43 = vadd.f32 %v287_v26, %v16863_v32  ;;  %v17113_v6 = vmul.f32 0.088388346, %v17085_v23  ;;  %v17152_v23 = vadd.f32 %v16890_v44, %v16863_v32  ;;  %v17172_v44 = vadd.f32 %v16934_v58, %v16863_v32 }
 0x10e   :  { %v291_v56 = vpop.f32.mrf.mxu0  ;;  %15378 = vmatmul.mubr.msk.f32.vlgmr.msra.gmra.mxu1 %vm481_vm3, %v17088_v30  ;;  %v15329_v60 = vpop.f32.mrf.mxu1  ;;  %20193 = vst [vmem:[#allocation40_spill] sm:$0xff] %v17107_v15  ;;  %20195 = vst [vmem:[#allocation42_spill] sm:$0xff] %v17125_v34 }
 0x10f   :  { %15381 = vmatpush3.xpose.msk.msra.mxu0 %vm481_vm3, %v17094_v43  ;;  %15387 = vmatprep.mubr.msk.f32.mxu1 %vm16658_vm2, %v20097_v0  ;;  %v17103_v7 = vadd.f32 %v15329_v60, %v16966_v5  ;;  %v17110_v18 = vadd.f32 %v291_v56, %v16861_v31  ;;  %v17139_v56 = vadd.f32 %v16878_v41, %v16861_v31  ;;  %v17160_v41 = vmul.f32 0.088388346, %v17125_v34 }
 0x110   :  { %v293_v26 = vpop.f32.mrf.mxu0  ;;  %15390 = vmatprep.subr.mxu0 %v20097_v0  ;;  %v17183_v31 = vadd.f32 %v16959_v3, %v16966_v5  ;;  %v17213_v58 = vpop.f32.mrf.mxu1 }
 0x111   :  { %20192 = vst [vmem:[#allocation39_spill] sm:$0xff] %v17103_v7  ;;  %20194 = vst [vmem:[#allocation41_spill] sm:$0xff] %v17110_v18  ;;  %v17121_v60 = vadd.f32 %v293_v26, %v16863_v32  ;;  %v17144_v47 = vmul.f32 0.088388346, %v17110_v18  ;;  %v17147_v26 = vmul.f32 0.088388346, %v17107_v15 }
 0x112   :  { %15383 = vmatmul.mubr.msk.f32.vlgmr.msra.gmra.mxu0 %vm481_vm3, %v17113_v6  ;;  %20196 = vst [vmem:[#allocation43_spill] sm:$0xff] %v17139_v56  ;;  %v17179_v25 = vmul.f32 0.088388346, %v17139_v56  ;;  %20198 = vst [vmem:[#allocation45_spill] sm:$0xff] %v17183_v31  ;;  %v17192_v32 = vmul.f32 0.088388346, %v17164_v51 }
 0x113   :  { %15386 = vmatpush3.xpose.msk.msra.mxu1 %vm481_vm3, %v17121_v60  ;;  %15391 = vmatpush3.xpose.msk.msra.mxu0 %vm481_vm3, %v17118_v40 }
 0x114   :  { %15392 = vmatprep.mubr.msk.f32.mxu0 %vm16658_vm2, %v20097_v0  ;;  %15395 = vmatprep.subr.mxu1 %v20097_v0 }
 0x115   :  { %15400 = vmatprep.subr.mxu0 %v20097_v0 }
 0x116   :  { %15388 = vmatmul.mubr.msk.f32.vlgmr.msra.gmra.mxu1 %vm481_vm3, %v17144_v47  ;;  %15393 = vmatmul.mubr.msk.f32.vlgmr.msra.gmra.mxu0 %vm481_vm3, %v17147_v26 }
 0x117   :  { %15396 = vmatpush3.xpose.msk.msra.mxu1 %vm481_vm3, %v17152_v23  ;;  %15401 = vmatpush3.xpose.msk.msra.mxu0 %vm481_vm3, %v17135_v37 }
 0x118   :  { %15397 = vmatprep.mubr.msk.f32.mxu1 %vm16658_vm2, %v20097_v0  ;;  %15402 = vmatprep.mubr.msk.f32.mxu0 %vm16658_vm2, %v20097_v0 }
 0x119   :  { %15405 = vmatprep.subr.mxu1 %v20097_v0  ;;  %15410 = vmatprep.subr.mxu0 %v20097_v0 }
 0x11a   :  { %15398 = vmatmul.mubr.msk.f32.vlgmr.msra.gmra.mxu1 %vm481_vm3, %v17179_v25  ;;  %15403 = vmatmul.mubr.msk.f32.vlgmr.msra.gmra.mxu0 %vm481_vm3, %v17160_v41 }
 0x11b   :  { %15406 = vmatpush3.xpose.msk.msra.mxu1 %vm481_vm3, %v17172_v44  ;;  %15407 = vmatprep.mubr.msk.f32.mxu1 %vm16658_vm2, %v20097_v0 }
 0x11c   :  { %15415 = vmatprep.subr.mxu1 %v20097_v0  ;;  %15411 = vmatpush3.msra.mxu0 %v17183_v31 }
 0x11d   :  { %15412 = vmatprep.mubr.msk.f32.mxu0 %vm16658_vm2, %v20097_v0  ;;  %15420 = vmatprep.subr.mxu0 %v20097_v0 }
 0x11e   :  { %15408 = vmatmul.mubr.msk.f32.vlgmr.msra.gmra.mxu1 %vm481_vm3, %v17192_v32 }
 0x11f   :  { %15416 = vmatpush3.msra.mxu1 %v17200_v54  ;;  %15417 = vmatprep.mubr.msk.f32.mxu1 %vm16658_vm2, %v20097_v0 }
 0x120   :  { %15425 = vmatprep.subr.mxu1 %v20097_v0 }
 0x1aa   :  { %v17215_v62 = vpop.f32.mrf.mxu1 }
 0x1ab   :  { %v1699_v3 = vsel %vm1698_vm4, %v17215_v62, -inf }
 0x1ac   :  { %1700 = vmax.xlane.f32.xlu0 %v1699_v3  ;;  %v15334_v17 = vpop.f32.mrf.mxu1 }
 0x1ae   :  { %v17219_v9 = vpop.f32.mrf.mxu1 }
 0x1af   :  { %v1702_v63 = vsel %vm1698_vm4, %v17219_v9, -inf }
 0x1b0   :  { %1703 = vmax.xlane.f32.xlu0 %v1702_v63  ;;  %v15339_v55 = vpop.f32.mrf.mxu1 }
 0x1b2   :  { %v17223_v48 = vpop.f32.mrf.mxu1 }
 0x1b3   :  { %v1705_v0 = vsel %vm1698_vm4, %v17223_v48, -inf }
 0x1b4   :  { %1706 = vmax.xlane.f32.xlu1 %v1705_v0  ;;  %v15344_v42 = vpop.f32.mrf.mxu1 }
 0x1b6   :  { %v17227_v35 = vpop.f32.mrf.mxu1 }
 0x1b7   :  { %v1708_v3 = vsel %vm1698_vm4, %v17227_v35, -inf }
 0x1b8   :  { %1709 = vmax.xlane.f32.xlu1 %v1708_v3  ;;  %v15349_v17 = vpop.f32.mrf.mxu1 }
 0x1ba   :  { %v17231_v34 = vpop.f32.mrf.mxu1 }
 0x1bb   :  { %v1711_v63 = vsel %vm1698_vm4, %v17231_v34, -inf }
 0x1bc   :  { %1712 = vmax.xlane.f32.xlu0 %v1711_v63  ;;  %v15354_v55 = vpop.f32.mrf.mxu1 }
 0x1be   :  { %v17235_v15 = vpop.f32.mrf.mxu1 }
 0x1bf   :  { %v1714_v0 = vsel %vm1698_vm4, %v17235_v15, -inf }
 0x1c0   :  { %1715 = vmax.xlane.f32.xlu1 %v1714_v0  ;;  %v15359_v42 = vpop.f32.mrf.mxu1 }
 0x1c2   :  { %v17239_v51 = vpop.f32.mrf.mxu1 }
 0x1c3   :  { %v1717_v3 = vsel %vm1698_vm4, %v17239_v51, -inf }
 0x1c4   :  { %1718 = vmax.xlane.f32.xlu0 %v1717_v3  ;;  %v15364_v17 = vpop.f32.mrf.mxu1 }
 0x1c6   :  { %v17243_v56 = vpop.f32.mrf.mxu1 }
 0x1c7   :  { %v1720_v63 = vsel %vm1698_vm4, %v17243_v56, -inf }
 0x1c8   :  { %1721 = vmax.xlane.f32.xlu1 %v1720_v63  ;;  %v15369_v55 = vpop.f32.mrf.mxu1 }
 0x1ca   :  { %v17247_v18 = vpop.f32.mrf.mxu0 }
 0x1cb   :  { %v1723_v0 = vsel %vm1698_vm4, %v17247_v18, -inf }
 0x1cc   :  { %1724 = vmax.xlane.f32.xlu0 %v1723_v0  ;;  %v15374_v42 = vpop.f32.mrf.mxu0 }
 0x1ce   :  { %v17251_v57 = vpop.f32.mrf.mxu1 }
 0x1cf   :  { %v1726_v3 = vsel %vm1698_vm4, %v17251_v57, -inf }
 0x1d0   :  { %1727 = vmax.xlane.f32.xlu1 %v1726_v3  ;;  %v15379_v17 = vpop.f32.mrf.mxu1 }
 0x1d2   :  { %v17255_v2 = vpop.f32.mrf.mxu0 }
 0x1d3   :  { %v1729_v63 = vsel %vm1698_vm4, %v17255_v2, -inf }
 0x1d4   :  { %v15384_v55 = vpop.f32.mrf.mxu0  ;;  %1730 = vmax.xlane.f32.xlu0 %v1729_v63 }
 0x1d6   :  { %v17259_v52 = vpop.f32.mrf.mxu1  ;;  %v17261_v59 = vpop.f32.mrf.mxu0 }
 0x1d7   :  { %v1735_v0 = vsel %vm1698_vm4, %v17261_v59, -inf  ;;  %v1732_v42 = vsel %vm1698_vm4, %v17259_v52, -inf }
 0x1d8   :  { %v15394_v39 = vpop.f32.mrf.mxu0  ;;  %1736 = vmax.xlane.f32.xlu0 %v1735_v0  ;;  %1733 = vmax.xlane.f32.xlu1 %v1732_v42  ;;  %v15389_v3 = vpop.f32.mrf.mxu1 }
 0x1d9   :  { %v17293_v0 = vpop.permute.xlu0 %3061 }
 0x1da   :  { %v17267_v17 = vpop.f32.mrf.mxu1  ;;  %v17269_v50 = vpop.f32.mrf.mxu0  ;;  %20201 = vst [vmem:[#allocation48_spill] sm:$0xff] %v17293_v0 }
 0x1db   :  { %v1741_v63 = vsel %vm1698_vm4, %v17269_v50, -inf  ;;  %v1738_v55 = vsel %vm1698_vm4, %v17267_v17, -inf }
 0x1dc   :  { %1742 = vmax.xlane.f32.xlu0 %v1741_v63  ;;  %1739 = vmax.xlane.f32.xlu1 %v1738_v55  ;;  %v15399_v38 = vpop.f32.mrf.mxu1  ;;  %v15404_v45 = vpop.f32.mrf.mxu0 }
 0x1dd   :  { %v17289_v45 = vpop.permute.xlu1 %3059  ;;  %v17297_v3 = vpop.permute.xlu0 %3217 }
 0x1de   :  { %v17275_v7 = vpop.f32.mrf.mxu1  ;;  %20200 = vst [vmem:[#allocation47_spill] sm:$0xff] %v17289_v45  ;;  %20203 = vst [vmem:[#allocation50_spill] sm:$0xff] %v17297_v3 }
 0x1df   :  { %v1744_v38 = vsel %vm1698_vm4, %v17275_v7, -inf }
 0x1e0   :  { %v15409_v39 = vpop.f32.mrf.mxu1 }
 0x1e1   :  { %v17295_v42 = vpop.permute.xlu1 %3139  ;;  %v17301_v55 = vpop.permute.xlu0 %3215 }
 0x1e2   :  { %20202 = vst [vmem:[#allocation49_spill] sm:$0xff] %v17295_v42  ;;  %20205 = vst [vmem:[#allocation52_spill] sm:$0xff] %v17301_v55 }
 0x1e5   :  { %v17299_v63 = vpop.permute.xlu1 %3137 }
 0x1e6   :  { %20204 = vst [vmem:[#allocation51_spill] sm:$0xff] %v17299_v63 }
 0x1e9   :  { %v17303_v39 = vpop.permute.xlu1 %3295 }
 0x1ea   :  { %20206 = vst [vmem:[#allocation53_spill] sm:$0xff] %v17303_v39 }
 0x1ed   :  { %3451 = vrot.lane.b32.xlu1 %v16987_v13, %s16659_s0 }
 0x1f1   :  { %3449 = vrot.lane.b32.xlu1 %v17004_v19, %s16659_s0 }
 0x1f2   :  { %3373 = vrot.lane.b32.xlu0 %v16962_v4, %s16659_s0  ;;  %v17306_v4 = vpop.permute.xlu1 %3293 }
 0x1f6   :  { %3371 = vrot.lane.b32.xlu0 %v16981_v11, %s16659_s0 }
 0x1fa   :  { %3529 = vrot.lane.b32.xlu0 %v17010_v21, %s16659_s0 }
 0x215   :  { %1745 = vmax.xlane.f32.xlu1 %v1744_v38 }
 0x226   :  { %3607 = vrot.lane.b32.xlu1 %v17031_v29, %s16659_s0 }
 0x235   :  { %v1701_v21 = vpop.xlane.xlu0 %1700 }
 0x236   :  { %v1747_v38 = vsub.f32 %v17215_v62, %v1701_v21 }
 0x238   :  { %v1763_v11 = vmul.f32 1.442695, %v1747_v38 }
 0x239   :  { %v1704_v19 = vpop.xlane.xlu0 %1703 }
 0x23a   :  { %16289 = vpow2.f32 %v1763_v11  ;;  %v1748_v29 = vsub.f32 %v17219_v9, %v1704_v19 }
 0x23c   :  { %v1765_v13 = vmul.f32 1.442695, %v1748_v29 }
 0x23d   :  { %v1707_v42 = vpop.xlane.xlu1 %1706 }
 0x23e   :  { %16291 = vpow2.f32 %v1765_v13  ;;  %v1749_v3 = vsub.f32 %v17223_v48, %v1707_v42 }
 0x240   :  { %v1767_v63 = vmul.f32 1.442695, %v1749_v3 }
 0x241   :  { %v1710_v45 = vpop.xlane.xlu1 %1709 }
 0x242   :  { %16293 = vpow2.f32 %v1767_v63  ;;  %v1750_v39 = vsub.f32 %v17227_v35, %v1710_v45 }
 0x244   :  { %v1769_v55 = vmul.f32 1.442695, %v1750_v39 }
 0x245   :  { %v1713_v0 = vpop.xlane.xlu0 %1712 }
 0x246   :  { %16295 = vpow2.f32 %v1769_v55  ;;  %v1751_v21 = vsub.f32 %v17231_v34, %v1713_v0 }
 0x247   :  { %v17312_v62 = vpop.eup %16289 }
 0x248   :  { %v1771_v11 = vmul.f32 1.442695, %v1751_v21  ;;  %v1795_v9 = vsel %vm1698_vm4, %v17312_v62, 0.0 }
 0x249   :  { %v1716_v19 = vpop.xlane.xlu1 %1715  ;;  %1796 = vadd.xlane.f32.xlu0 %v1795_v9 }
 0x24a   :  { %16297 = vpow2.f32 %v1771_v11  ;;  %v1752_v48 = vsub.f32 %v17235_v15, %v1716_v19 }
 0x24b   :  { %v17317_v13 = vpop.eup %16291 }
 0x24c   :  { %v1773_v29 = vmul.f32 1.442695, %v1752_v48  ;;  %v1798_v35 = vsel %vm1698_vm4, %v17317_v13, 0.0 }
 0x24d   :  { %v1719_v45 = vpop.xlane.xlu0 %1718  ;;  %1799 = vadd.xlane.f32.xlu1 %v1798_v35 }
 0x24e   :  { %16299 = vpow2.f32 %v1773_v29  ;;  %v1753_v34 = vsub.f32 %v17239_v51, %v1719_v45 }
 0x24f   :  { %v17322_v0 = vpop.eup %16293 }
 0x250   :  { %v1775_v42 = vmul.f32 1.442695, %v1753_v34  ;;  %v1801_v3 = vsel %vm1698_vm4, %v17322_v0, 0.0 }
 0x251   :  { %1802 = vadd.xlane.f32.xlu0 %v1801_v3  ;;  %v1722_v63 = vpop.xlane.xlu1 %1721 }
 0x252   :  { %16301 = vpow2.f32 %v1775_v42  ;;  %v1754_v15 = vsub.f32 %v17243_v56, %v1722_v63 }
 0x253   :  { %v17327_v55 = vpop.eup %16295 }
 0x254   :  { %v1777_v39 = vmul.f32 1.442695, %v1754_v15  ;;  %v1804_v38 = vsel %vm1698_vm4, %v17327_v55, 0.0 }
 0x255   :  { %v1725_v21 = vpop.xlane.xlu0 %1724  ;;  %1805 = vadd.xlane.f32.xlu1 %v1804_v38 }
 0x256   :  { %16303 = vpow2.f32 %v1777_v39  ;;  %v1755_v51 = vsub.f32 %v17247_v18, %v1725_v21 }
 0x257   :  { %v17332_v11 = vpop.eup %16297 }
 0x258   :  { %v1779_v9 = vmul.f32 1.442695, %v1755_v51  ;;  %v1807_v19 = vsel %vm1698_vm4, %v17332_v11, 0.0 }
 0x259   :  { %1808 = vadd.xlane.f32.xlu0 %v1807_v19  ;;  %v1728_v48 = vpop.xlane.xlu1 %1727 }
 0x25a   :  { %16305 = vpow2.f32 %v1779_v9  ;;  %v1756_v56 = vsub.f32 %v17251_v57, %v1728_v48 }
 0x25b   :  { %v17337_v29 = vpop.eup %16299 }
 0x25c   :  { %v1781_v35 = vmul.f32 1.442695, %v1756_v56  ;;  %v1810_v45 = vsel %vm1698_vm4, %v17337_v29, 0.0 }
 0x25d   :  { %v1731_v34 = vpop.xlane.xlu0 %1730  ;;  %1811 = vadd.xlane.f32.xlu1 %v1810_v45 }
 0x25e   :  { %16307 = vpow2.f32 %v1781_v35  ;;  %v1757_v18 = vsub.f32 %v17255_v2, %v1731_v34 }
 0x25f   :  { %v17342_v42 = vpop.eup %16301 }
 0x260   :  { %v1783_v3 = vmul.f32 1.442695, %v1757_v18  ;;  %v1813_v63 = vsel %vm1698_vm4, %v17342_v42, 0.0 }
 0x261   :  { %1814 = vadd.xlane.f32.xlu0 %v1813_v63  ;;  %v1737_v15 = vpop.xlane.xlu0 %1736  ;;  %v1734_v57 = vpop.xlane.xlu1 %1733 }
 0x262   :  { %16309 = vpow2.f32 %v1783_v3  ;;  %v1759_v39 = vsub.f32 %v17261_v59, %v1737_v15  ;;  %v1758_v38 = vsub.f32 %v17259_v52, %v1734_v57 }
 0x263   :  { %v17348_v21 = vpop.eup %16303 }
 0x264   :  { %v1787_v51 = vmul.f32 1.442695, %v1759_v39  ;;  %v1785_v9 = vmul.f32 1.442695, %v1758_v38  ;;  %v1816_v2 = vsel %vm1698_vm4, %v17348_v21, 0.0 }
 0x265   :  { %v1743_v19 = vpop.xlane.xlu0 %1742  ;;  %v1740_v48 = vpop.xlane.xlu1 %1739  ;;  %1817 = vadd.xlane.f32.xlu1 %v1816_v2 }
 0x266   :  { %16311 = vpow2.f32 %v1787_v51  ;;  %v1761_v56 = vsub.f32 %v17269_v50, %v1743_v19  ;;  %v1760_v35 = vsub.f32 %v17267_v17, %v1740_v48 }
 0x267   :  { %v17354_v45 = vpop.eup %16305  ;;  %16313 = vpow2.f32 %v1785_v9 }
 0x268   :  { %v1791_v59 = vmul.f32 1.442695, %v1761_v56  ;;  %v1789_v52 = vmul.f32 1.442695, %v1760_v35  ;;  %v1819_v34 = vsel %vm1698_vm4, %v17354_v45, 0.0 }
 0x269   :  { %1820 = vadd.xlane.f32.xlu0 %v1819_v34  ;;  %v17390_v19 = vpop.permute.xlu1 %3451  ;;  %v17417_v34 = vadd.f32 %v16984_v12, %v16966_v5  ;;  %v17437_v12 = vadd.f32 %v17028_v28, %v16966_v5 }
 0x26a   :  { %16315 = vpow2.f32 %v1791_v59 }
 0x26b   :  { %v17358_v18 = vpop.eup %16307  ;;  %16317 = vpow2.f32 %v1789_v52  ;;  %20207 = vst [vmem:[#allocation54_spill] sm:$0xff] %v17417_v34  ;;  %20209 = vst [vmem:[#allocation56_spill] sm:$0xff] %v17437_v12 }
 0x26c   :  { %v1822_v3 = vsel %vm1698_vm4, %v17358_v18, 0.0 }
 0x26d   :  { %1823 = vadd.xlane.f32.xlu1 %v1822_v3  ;;  %v17394_v48 = vpop.permute.xlu1 %3449  ;;  %v17425_v3 = vadd.f32 %v17007_v20, %v16966_v5 }
 0x26f   :  { %v17362_v50 = vpop.eup %16309  ;;  %20208 = vst [vmem:[#allocation55_spill] sm:$0xff] %v17425_v3 }
 0x270   :  { %v1825_v17 = vsel %vm1698_vm4, %v17362_v50, 0.0 }
 0x271   :  { %1826 = vadd.xlane.f32.xlu0 %v1825_v17  ;;  %v17429_v17 = vpop.permute.xlu0 %3373 }
 0x273   :  { %v17366_v63 = vpop.eup %16311 }
 0x274   :  { %v17368_v15 = vpop.eup %16313  ;;  %v1831_v57 = vsel %vm1698_vm4, %v17366_v63, 0.0 }
 0x275   :  { %1832 = vadd.xlane.f32.xlu0 %v1831_v57  ;;  %v1828_v39 = vsel %vm1698_vm4, %v17368_v15, 0.0  ;;  %v17441_v20 = vpop.permute.xlu0 %3371  ;;  %v17451_v57 = vadd.f32 %v17049_v49, %v16966_v5  ;;  %v17467_v49 = vadd.f32 %v17070_v10, %v16966_v5 }
 0x276   :  { %1829 = vadd.xlane.f32.xlu1 %v1828_v39 }
 0x277   :  { %v17374_v38 = vpop.eup %16315  ;;  %20210 = vst [vmem:[#allocation57_spill] sm:$0xff] %v17451_v57  ;;  %20211 = vst [vmem:[#allocation58_spill] sm:$0xff] %v17467_v49 }
 0x278   :  { %v17376_v51 = vpop.eup %16317  ;;  %v1837_v9 = vsel %vm1698_vm4, %v17374_v38, 0.0 }
 0x279   :  { %1838 = vadd.xlane.f32.xlu0 %v1837_v9  ;;  %v1834_v2 = vsel %vm1698_vm4, %v17376_v51, 0.0  ;;  %v17453_v28 = vpop.permute.xlu0 %3529 }
 0x27a   :  { %1835 = vadd.xlane.f32.xlu1 %v1834_v2 }
 0x28b   :  { %3605 = vrot.lane.b32.xlu1 %v17046_v46, %s16659_s0 }
 0x28f   :  { %3763 = vrot.lane.b32.xlu1 %v17073_v14, %s16659_s0  ;;  %3527 = vrot.lane.b32.xlu0 %v17025_v27, %s16659_s0 }
 0x293   :  { %3685 = vrot.lane.b32.xlu0 %v17052_v53, %s16659_s0 }
 0x297   :  { %3683 = vrot.lane.b32.xlu0 %v17064_v1, %s16659_s0 }
 0x29b   :  { %3841 = vrot.lane.b32.xlu0 %v17094_v43, %s16659_s0 }
 0x29e   :  { %v1746_v56 = vpop.xlane.xlu1 %1745 }
 0x29f   :  { %v1762_v35 = vsub.f32 %v17275_v7, %v1746_v56  ;;  %3839 = vrot.lane.b32.xlu0 %v17113_v6, %s16659_s0  ;;  %v17475_v56 = vadd.f32 %v17091_v33, %v16966_v5  ;;  %v17487_v33 = vadd.f32 %v17213_v58, %v16966_v5  ;;  %v20215_v58 = vld [vmem:[#allocation39_spill] sm:$0xff] }
 0x2a1   :  { %v1793_v59 = vmul.f32 1.442695, %v1762_v35  ;;  %20212 = vst [vmem:[#allocation59_spill] sm:$0xff] %v17475_v56  ;;  %20213 = vst [vmem:[#allocation60_spill] sm:$0xff] %v17487_v33 }
 0x2a2   :  { %v17459_v39 = vpop.permute.xlu1 %3607 }
 0x2a3   :  { %16319 = vpow2.f32 %v1793_v59  ;;  %3997 = vrot.lane.b32.xlu0 %v17118_v40, %s16659_s0 }
 0x2a7   :  { %3995 = vrot.lane.b32.xlu0 %v17147_v26, %s16659_s0 }
 0x2ab   :  { %4153 = vrot.lane.b32.xlu0 %v17135_v37, %s16659_s0 }
 0x2af   :  { %4151 = vrot.lane.b32.xlu0 %v17160_v41, %s16659_s0 }
 0x2b0   :  { %v17409_v52 = vpop.eup %16319 }
 0x2b1   :  { %v1840_v7 = vsel %vm1698_vm4, %v17409_v52, 0.0 }
 0x2b3   :  { %1841 = vadd.xlane.f32.xlu1 %v1840_v7  ;;  %4484 = vrot.lane.b32.xlu0 %v17183_v31, %s16659_s0 }
 0x2b7   :  { %4638 = vrot.lane.b32.xlu0 %v17417_v34, %s16659_s0 }
 0x2bb   :  { %4715 = vrot.lane.b32.xlu0 %v16975_v8, %s16659_s0 }
 0x2bf   :  { %4792 = vrot.lane.b32.xlu0 %v17425_v3, %s16659_s0 }
 0x2c3   :  { %4869 = vrot.lane.b32.xlu0 %v16998_v16, %s16659_s0 }
 0x2c4   :  { %3761 = vrot.lane.b32.xlu1 %v17088_v30, %s16659_s0 }
 0x2c7   :  { %4946 = vrot.lane.b32.xlu0 %v17437_v12, %s16659_s0 }
 0x2c8   :  { %3919 = vrot.lane.b32.xlu1 %v17121_v60, %s16659_s0 }
 0x2cb   :  { %5023 = vrot.lane.b32.xlu0 %v17019_v24, %s16659_s0 }
 0x2cc   :  { %3917 = vrot.lane.b32.xlu1 %v17144_v47, %s16659_s0 }
 0x2cf   :  { %5100 = vrot.lane.b32.xlu0 %v17451_v57, %s16659_s0 }
 0x2d0   :  { %4075 = vrot.lane.b32.xlu1 %v17152_v23, %s16659_s0 }
 0x2d2   :  { %v1797_v9 = vpop.xlane.xlu0 %1796 }
 0x2d3   :  { %16321 = vrcp.f32 %v1797_v9  ;;  %5177 = vrot.lane.b32.xlu0 %v17040_v36, %s16659_s0 }
 0x2d4   :  { %4073 = vrot.lane.b32.xlu1 %v17179_v25, %s16659_s0 }
 0x2d6   :  { %v1800_v2 = vpop.xlane.xlu1 %1799 }
 0x2d7   :  { %16323 = vrcp.f32 %v1800_v2  ;;  %5254 = vrot.lane.b32.xlu0 %v17467_v49, %s16659_s0 }
 0x2d8   :  { %4231 = vrot.lane.b32.xlu1 %v17172_v44, %s16659_s0 }
 0x2da   :  { %v1803_v35 = vpop.xlane.xlu0 %1802 }
 0x2db   :  { %16325 = vrcp.f32 %v1803_v35  ;;  %5408 = vrot.lane.b32.xlu0 %v17475_v56, %s16659_s0 }
 0x2dc   :  { %4229 = vrot.lane.b32.xlu1 %v17192_v32, %s16659_s0 }
 0x2de   :  { %v1806_v10 = vpop.xlane.xlu1 %1805 }
 0x2df   :  { %16327 = vrcp.f32 %v1806_v10  ;;  %5485 = vrot.lane.b32.xlu0 %v17082_v22, %s16659_s0  ;;  %v20214_v10 = vmov 0.0  }
 0x2e0   :  { %v16322_v59 = vpop.eup %16321  ;;  %4561 = vrot.lane.b32.xlu1 %v17200_v54, %s16659_s0 }
 0x2e1   :  { %v1844_v7 = vmul.f32 %v16322_v59, %v17312_v62  ;;  %v20216_v59 = vld [vmem:[#allocation12_spill] sm:$0xff] }
 0x2e2   :  { %v1809_v9 = vpop.xlane.xlu0 %1808 }
 0x2e3   :  { %16329 = vrcp.f32 %v1809_v9  ;;  %5562 = vrot.lane.b32.xlu0 %v17487_v33, %s16659_s0  ;;  %15413 = vmatmul.mubr.msk.f32.vlgmr.msra.gmra.mxu0 %vm1698_vm4, %v1844_v7  ;;  %v20217_v9 = vld [vmem:[#allocation9_spill] sm:$0xff] }
 0x2e4   :  { %v16324_v2 = vpop.eup %16323  ;;  %15421 = vmatpush3.msra.mxu0 %v17417_v34  ;;  %5331 = vrot.lane.b32.xlu1 %v17061_v61, %s16659_s0 }
 0x2e5   :  { %v1846_v35 = vmul.f32 %v16324_v2, %v17317_v13  ;;  %15422 = vmatprep.mubr.msk.f32.mxu0 %vm16658_vm2, %v20214_v10  ;;  %15430 = vmatprep.subr.mxu0 %v20214_v10 }
 0x2e6   :  { %v1812_v5 = vpop.xlane.xlu1 %1811 }
 0x2e7   :  { %16331 = vrcp.f32 %v1812_v5  ;;  %5639 = vrot.lane.b32.xlu0 %v20215_v58, %s16659_s0  ;;  %15418 = vmatmul.mubr.msk.f32.vlgmr.msra.gmra.mxu1 %vm1698_vm4, %v1846_v35  ;;  %v20218_v35 = vld [vmem:[#allocation14_spill] sm:$0xff] }
 0x2e8   :  { %v16326_v62 = vpop.eup %16325  ;;  %5875 = vrot.lane.b32.xlu1 %v20216_v59, %s16660_s24  ;;  %15426 = vmatpush3.msra.mxu1 %v16975_v8 }
 0x2e9   :  { %v1848_v13 = vmul.f32 %v16326_v62, %v17322_v0  ;;  %15427 = vmatprep.mubr.msk.f32.mxu1 %vm16658_vm2, %v20214_v10  ;;  %15435 = vmatprep.subr.mxu1 %v20214_v10  ;;  %v20219_v62 = vld [vmem:[#allocation10_spill] sm:$0xff] }
 0x2ea   :  { %v1815_v7 = vpop.xlane.xlu0 %1814 }
 0x2eb   :  { %16333 = vrcp.f32 %v1815_v7  ;;  %5797 = vrot.lane.b32.xlu0 %v20217_v9, %s16660_s24  ;;  %15423 = vmatmul.mubr.msk.f32.vlgmr.msra.gmra.mxu0 %vm1698_vm4, %v1848_v13  ;;  %v20220_v7 = vld [vmem:[#allocation18_spill] sm:$0xff] }
 0x2ec   :  { %v16328_v2 = vpop.eup %16327  ;;  %15431 = vmatpush3.msra.mxu0 %v17425_v3  ;;  %5873 = vrot.lane.b32.xlu1 %v20218_v35, %s16660_s24 }
 0x2ed   :  { %v1850_v0 = vmul.f32 %v16328_v2, %v17327_v55  ;;  %15432 = vmatprep.mubr.msk.f32.mxu0 %vm16658_vm2, %v20214_v10  ;;  %15440 = vmatprep.subr.mxu0 %v20214_v10 }
 0x2ee   :  { %v1818_v5 = vpop.xlane.xlu1 %1817 }
 0x2ef   :  { %16335 = vrcp.f32 %v1818_v5  ;;  %5795 = vrot.lane.b32.xlu0 %v20219_v62, %s16660_s24  ;;  %15428 = vmatmul.mubr.msk.f32.vlgmr.msra.gmra.mxu1 %vm1698_vm4, %v1850_v0  ;;  %v20221_v5 = vld [vmem:[#allocation15_spill] sm:$0xff] }
 0x2f0   :  { %v16330_v13 = vpop.eup %16329  ;;  %6031 = vrot.lane.b32.xlu1 %v20220_v7, %s16660_s24  ;;  %15436 = vmatpush3.msra.mxu1 %v16998_v16  ;;  %v20253_v7 = vld [vmem:[#allocation20_spill] sm:$0xff] }
 0x2f1   :  { %v1852_v55 = vmul.f32 %v16330_v13, %v17332_v11  ;;  %15437 = vmatprep.mubr.msk.f32.mxu1 %vm16658_vm2, %v20214_v10  ;;  %15445 = vmatprep.subr.mxu1 %v20214_v10 }
 0x2f2   :  { %v1821_v2 = vpop.xlane.xlu0 %1820 }
 0x2f3   :  { %16337 = vrcp.f32 %v1821_v2  ;;  %5953 = vrot.lane.b32.xlu0 %v20221_v5, %s16660_s24  ;;  %15433 = vmatmul.mubr.msk.f32.vlgmr.msra.gmra.mxu0 %vm1698_vm4, %v1852_v55 }
 0x2f4   :  { %v16332_v0 = vpop.eup %16331  ;;  %15441 = vmatpush3.msra.mxu0 %v17437_v12  ;;  %15442 = vmatprep.mubr.msk.f32.mxu0 %vm16658_vm2, %v20214_v10 }
 0x2f5   :  { %v1854_v11 = vmul.f32 %v16332_v0, %v17337_v29  ;;  %15450 = vmatprep.subr.mxu0 %v20214_v10 }
 0x2f6   :  { %v1824_v13 = vpop.xlane.xlu1 %1823 }
 0x2f7   :  { %16339 = vrcp.f32 %v1824_v13  ;;  %15438 = vmatmul.mubr.msk.f32.vlgmr.msra.gmra.mxu1 %vm1698_vm4, %v1854_v11 }
 0x2f8   :  { %v16334_v2 = vpop.eup %16333  ;;  %15446 = vmatpush3.msra.mxu1 %v17019_v24  ;;  %15447 = vmatprep.mubr.msk.f32.mxu1 %vm16658_vm2, %v20214_v10 }
 0x2f9   :  { %v1856_v55 = vmul.f32 %v16334_v2, %v17342_v42  ;;  %15455 = vmatprep.subr.mxu1 %v20214_v10 }
 0x2fa   :  { %v1827_v5 = vpop.xlane.xlu0 %1826 }
 0x2fb   :  { %16341 = vrcp.f32 %v1827_v5  ;;  %15443 = vmatmul.mubr.msk.f32.vlgmr.msra.gmra.mxu0 %vm1698_vm4, %v1856_v55 }
 0x2fc   :  { %v16336_v29 = vpop.eup %16335  ;;  %15451 = vmatpush3.msra.mxu0 %v17451_v57  ;;  %15452 = vmatprep.mubr.msk.f32.mxu0 %vm16658_vm2, %v20214_v10 }
 0x2fd   :  { %v1858_v0 = vmul.f32 %v16336_v29, %v17348_v21  ;;  %15460 = vmatprep.subr.mxu0 %v20214_v10 }
 0x2fe   :  { %v1833_v11 = vpop.xlane.xlu0 %1832 }
 0x2ff   :  { %16343 = vrcp.f32 %v1833_v11  ;;  %v1830_v13 = vpop.xlane.xlu1 %1829  ;;  %15448 = vmatmul.mubr.msk.f32.vlgmr.msra.gmra.mxu1 %vm1698_vm4, %v1858_v0 }
 0x300   :  { %v16338_v42 = vpop.eup %16337  ;;  %16345 = vrcp.f32 %v1830_v13  ;;  %15456 = vmatpush3.msra.mxu1 %v17040_v36  ;;  %15457 = vmatprep.mubr.msk.f32.mxu1 %vm16658_vm2, %v20214_v10 }
 0x301   :  { %v1860_v5 = vmul.f32 %v16338_v42, %v17354_v45  ;;  %15465 = vmatprep.subr.mxu1 %v20214_v10 }
 0x302   :  { %v1839_v2 = vpop.xlane.xlu0 %1838 }
 0x303   :  { %16347 = vrcp.f32 %v1839_v2  ;;  %v1836_v21 = vpop.xlane.xlu1 %1835  ;;  %15453 = vmatmul.mubr.msk.f32.vlgmr.msra.gmra.mxu0 %vm1698_vm4, %v1860_v5 }
 0x304   :  { %v16340_v55 = vpop.eup %16339  ;;  %16349 = vrcp.f32 %v1836_v21  ;;  %15461 = vmatpush3.msra.mxu0 %v17467_v49  ;;  %15462 = vmatprep.mubr.msk.f32.mxu0 %vm16658_vm2, %v20214_v10 }
 0x305   :  { %v1862_v29 = vmul.f32 %v16340_v55, %v17358_v18  ;;  %15470 = vmatprep.subr.mxu0 %v20214_v10 }
 0x306   :  { %v3528_v0 = vpop.permute.xlu0 %3527 }
 0x307   :  { %15458 = vmatmul.mubr.msk.f32.vlgmr.msra.gmra.mxu1 %vm1698_vm4, %v1862_v29 }
 0x308   :  { %v16342_v45 = vpop.eup %16341  ;;  %15466 = vmatpush3.msra.mxu1 %v17061_v61  ;;  %15467 = vmatprep.mubr.msk.f32.mxu1 %vm16658_vm2, %v20214_v10 }
 0x309   :  { %v1864_v11 = vmul.f32 %v16342_v45, %v17362_v50  ;;  %15475 = vmatprep.subr.mxu1 %v20214_v10  ;;  %v20222_v45 = vld [vmem:[#allocation48_spill] sm:$0xff] }
 0x30a   :  { %v3686_v13 = vpop.permute.xlu0 %3685 }
 0x30b   :  { %15463 = vmatmul.mubr.msk.f32.vlgmr.msra.gmra.mxu0 %vm1698_vm4, %v1864_v11  ;;  %v20224_v11 = vld [vmem:[#allocation50_spill] sm:$0xff] }
 0x30c   :  { %v16344_v42 = vpop.eup %16343  ;;  %15471 = vmatpush3.msra.mxu0 %v17475_v56  ;;  %15472 = vmatprep.mubr.msk.f32.mxu0 %vm16658_vm2, %v20214_v10 }
 0x30d   :  { %v16346_v18 = vpop.eup %16345  ;;  %15480 = vmatprep.subr.mxu0 %v20214_v10  ;;  %v1868_v5 = vmul.f32 %v16344_v42, %v17366_v63 }
 0x30e   :  { %v3684_v2 = vpop.permute.xlu0 %3683  ;;  %v1866_v21 = vmul.f32 %v16346_v18, %v17368_v15  ;;  %v20225_v18 = vld [vmem:[#allocation52_spill] sm:$0xff] }
 0x30f   :  { %15473 = vmatmul.mubr.msk.f32.vlgmr.msra.gmra.mxu0 %vm1698_vm4, %v1868_v5 }
 0x310   :  { %v16348_v50 = vpop.eup %16347  ;;  %15468 = vmatmul.mubr.msk.f32.vlgmr.msra.gmra.mxu1 %vm1698_vm4, %v1866_v21  ;;  %15481 = vmatpush3.msra.mxu0 %v17487_v33 }
 0x311   :  { %v16350_v55 = vpop.eup %16349  ;;  %15476 = vmatpush3.msra.mxu1 %v17082_v22  ;;  %15482 = vmatprep.mubr.msk.f32.mxu0 %vm16658_vm2, %v20214_v10  ;;  %v1872_v29 = vmul.f32 %v16348_v50, %v17374_v38 }
 0x312   :  { %15490 = vmatprep.subr.mxu0 %v20214_v10  ;;  %v3842_v63 = vpop.permute.xlu0 %3841  ;;  %15477 = vmatprep.mubr.msk.f32.mxu1 %vm16658_vm2, %v20214_v10  ;;  %v1870_v15 = vmul.f32 %v16350_v55, %v17376_v51  ;;  %v20223_v51 = vld [vmem:[#allocation47_spill] sm:$0xff] }
 0x313   :  { %15485 = vmatprep.subr.mxu1 %v20214_v10  ;;  %15483 = vmatmul.mubr.msk.f32.vlgmr.msra.gmra.mxu0 %vm1698_vm4, %v1872_v29 }
 0x314   :  { %15478 = vmatmul.mubr.msk.f32.vlgmr.msra.gmra.mxu1 %vm1698_vm4, %v1870_v15  ;;  %15491 = vmatpush3.xpose.msk.msra.mxu0 %vm481_vm3, %v20222_v45  ;;  %v20227_v45 = vld [vmem:[#allocation51_spill] sm:$0xff] }
 0x315   :  { %15486 = vmatpush3.msra.mxu1 %v20215_v58  ;;  %15492 = vmatprep.mubr.msk.f32.mxu0 %vm16658_vm2, %v20214_v10 }
 0x316   :  { %15500 = vmatprep.subr.mxu0 %v20214_v10  ;;  %v3840_v38 = vpop.permute.xlu0 %3839  ;;  %15487 = vmatprep.mubr.msk.f32.mxu1 %vm16658_vm2, %v20214_v10 }
 0x317   :  { %15493 = vmatmul.mubr.msk.f32.vlgmr.msra.gmra.mxu0 %vm481_vm3, %v20223_v51  ;;  %15495 = vmatprep.subr.mxu1 %v20214_v10 }
 0x318   :  { %15501 = vmatpush3.xpose.msk.msra.mxu0 %vm481_vm3, %v20224_v11  ;;  %15502 = vmatprep.mubr.msk.f32.mxu0 %vm16658_vm2, %v20214_v10 }
 0x319   :  { %15510 = vmatprep.subr.mxu0 %v20214_v10 }
 0x31a   :  { %v3998_v42 = vpop.permute.xlu0 %3997 }
 0x31b   :  { %15503 = vmatmul.mubr.msk.f32.vlgmr.msra.gmra.mxu0 %vm481_vm3, %v20225_v18 }
 0x31c   :  { %15511 = vmatpush3.xpose.msk.msra.mxu0 %vm481_vm3, %v17429_v17  ;;  %15512 = vmatprep.mubr.msk.f32.mxu0 %vm16658_vm2, %v20214_v10 }
 0x31d   :  { %15520 = vmatprep.subr.mxu0 %v20214_v10 }
 0x31e   :  { %v3996_v5 = vpop.permute.xlu0 %3995 }
 0x31f   :  { %15513 = vmatmul.mubr.msk.f32.vlgmr.msra.gmra.mxu0 %vm481_vm3, %v17441_v20 }
 0x320   :  { %15521 = vmatpush3.xpose.msk.msra.mxu0 %vm481_vm3, %v17453_v28  ;;  %15522 = vmatprep.mubr.msk.f32.mxu0 %vm16658_vm2, %v20214_v10  ;;  %v3606_v28 = vpop.permute.xlu1 %3605 }
 0x321   :  { %15530 = vmatprep.subr.mxu0 %v20214_v10 }
 0x322   :  { %v4154_v17 = vpop.permute.xlu0 %4153 }
 0x323   :  { %15523 = vmatmul.mubr.msk.f32.vlgmr.msra.gmra.mxu0 %vm481_vm3, %v3528_v0 }
 0x324   :  { %15531 = vmatpush3.xpose.msk.msra.mxu0 %vm481_vm3, %v3686_v13  ;;  %15532 = vmatprep.mubr.msk.f32.mxu0 %vm16658_vm2, %v20214_v10  ;;  %v3764_v13 = vpop.permute.xlu1 %3763 }
 0x325   :  { %15540 = vmatprep.subr.mxu0 %v20214_v10 }
 0x326   :  { %v4152_v20 = vpop.permute.xlu0 %4151 }
 0x327   :  { %15533 = vmatmul.mubr.msk.f32.vlgmr.msra.gmra.mxu0 %vm481_vm3, %v3684_v2 }
 0x328   :  { %15541 = vmatpush3.xpose.msk.msra.mxu0 %vm481_vm3, %v3842_v63  ;;  %15542 = vmatprep.mubr.msk.f32.mxu0 %vm16658_vm2, %v20214_v10  ;;  %v20226_v63 = vld [vmem:[#allocation49_spill] sm:$0xff] }
 0x329   :  { %15550 = vmatprep.subr.mxu0 %v20214_v10 }
 0x32a   :  { %v4485_v0 = vpop.permute.xlu0 %4484 }
 0x32b   :  { %15543 = vmatmul.mubr.msk.f32.vlgmr.msra.gmra.mxu0 %vm481_vm3, %v3840_v38  ;;  %v20228_v38 = vld [vmem:[#allocation53_spill] sm:$0xff] }
 0x32c   :  { %15551 = vmatpush3.xpose.msk.msra.mxu0 %vm481_vm3, %v3998_v42  ;;  %15552 = vmatprep.mubr.msk.f32.mxu0 %vm16658_vm2, %v20214_v10 }
 0x32d   :  { %15560 = vmatprep.subr.mxu0 %v20214_v10 }
 0x32f   :  { %15553 = vmatmul.mubr.msk.f32.vlgmr.msra.gmra.mxu0 %vm481_vm3, %v3996_v5 }
 0x330   :  { %15561 = vmatpush3.xpose.msk.msra.mxu0 %vm481_vm3, %v4154_v17  ;;  %15562 = vmatprep.mubr.msk.f32.mxu0 %vm16658_vm2, %v20214_v10 }
 0x331   :  { %15570 = vmatprep.subr.mxu0 %v20214_v10 }
 0x333   :  { %15563 = vmatmul.mubr.msk.f32.vlgmr.msra.gmra.mxu0 %vm481_vm3, %v4152_v20 }
 0x334   :  { %15571 = vmatpush3.msra.mxu0 %v4485_v0  ;;  %15572 = vmatprep.mubr.msk.f32.mxu0 %vm16658_vm2, %v20214_v10 }
 0x335   :  { %15580 = vmatprep.subr.mxu0 %v20214_v10 }
 0x33c   :  { %v1842_v2 = vpop.xlane.xlu1 %1841 }
 0x33d   :  { %16351 = vrcp.f32 %v1842_v2 }
 0x340   :  { %v3762_v21 = vpop.permute.xlu1 %3761 }
 0x344   :  { %v3920_v50 = vpop.permute.xlu1 %3919 }
 0x348   :  { %v3918_v15 = vpop.permute.xlu1 %3917 }
 0x34a   :  { %v16352_v55 = vpop.eup %16351 }
 0x34b   :  { %v1874_v29 = vmul.f32 %v16352_v55, %v17409_v52 }
 0x34c   :  { %v4076_v52 = vpop.permute.xlu1 %4075 }
 0x34d   :  { %15488 = vmatmul.mubr.msk.f32.vlgmr.msra.gmra.mxu1 %vm1698_vm4, %v1874_v29 }
 0x34e   :  { %15496 = vmatpush3.xpose.msk.msra.mxu1 %vm481_vm3, %v20226_v63  ;;  %15497 = vmatprep.mubr.msk.f32.mxu1 %vm16658_vm2, %v20214_v10 }
 0x34f   :  { %15505 = vmatprep.subr.mxu1 %v20214_v10 }
 0x350   :  { %v4074_v51 = vpop.permute.xlu1 %4073 }
 0x351   :  { %15498 = vmatmul.mubr.msk.f32.vlgmr.msra.gmra.mxu1 %vm481_vm3, %v20227_v45 }
 0x352   :  { %15506 = vmatpush3.xpose.msk.msra.mxu1 %vm481_vm3, %v20228_v38  ;;  %15507 = vmatprep.mubr.msk.f32.mxu1 %vm16658_vm2, %v20214_v10 }
 0x353   :  { %15515 = vmatprep.subr.mxu1 %v20214_v10 }
 0x355   :  { %15508 = vmatmul.mubr.msk.f32.vlgmr.msra.gmra.mxu1 %vm481_vm3, %v17306_v4  ;;  %v4232_v4 = vpop.permute.xlu1 %4231 }
 0x356   :  { %15516 = vmatpush3.xpose.msk.msra.mxu1 %vm481_vm3, %v17390_v19  ;;  %15517 = vmatprep.mubr.msk.f32.mxu1 %vm16658_vm2, %v20214_v10 }
 0x357   :  { %15525 = vmatprep.subr.mxu1 %v20214_v10 }
 0x359   :  { %15518 = vmatmul.mubr.msk.f32.vlgmr.msra.gmra.mxu1 %vm481_vm3, %v17394_v48  ;;  %v4230_v19 = vpop.permute.xlu1 %4229 }
 0x35a   :  { %15526 = vmatpush3.xpose.msk.msra.mxu1 %vm481_vm3, %v17459_v39  ;;  %15527 = vmatprep.mubr.msk.f32.mxu1 %vm16658_vm2, %v20214_v10 }
 0x35b   :  { %15535 = vmatprep.subr.mxu1 %v20214_v10 }
 0x35d   :  { %15528 = vmatmul.mubr.msk.f32.vlgmr.msra.gmra.mxu1 %vm481_vm3, %v3606_v28  ;;  %v4562_v48 = vpop.permute.xlu1 %4561 }
 0x35e   :  { %15536 = vmatpush3.xpose.msk.msra.mxu1 %vm481_vm3, %v3764_v13  ;;  %15537 = vmatprep.mubr.msk.f32.mxu1 %vm16658_vm2, %v20214_v10 }
 0x35f   :  { %15545 = vmatprep.subr.mxu1 %v20214_v10 }
 0x361   :  { %15538 = vmatmul.mubr.msk.f32.vlgmr.msra.gmra.mxu1 %vm481_vm3, %v3762_v21 }
 0x362   :  { %15546 = vmatpush3.xpose.msk.msra.mxu1 %vm481_vm3, %v3920_v50  ;;  %15547 = vmatprep.mubr.msk.f32.mxu1 %vm16658_vm2, %v20214_v10 }
 0x363   :  { %15555 = vmatprep.subr.mxu1 %v20214_v10 }
 0x365   :  { %15548 = vmatmul.mubr.msk.f32.vlgmr.msra.gmra.mxu1 %vm481_vm3, %v3918_v15 }
 0x366   :  { %15556 = vmatpush3.xpose.msk.msra.mxu1 %vm481_vm3, %v4076_v52  ;;  %15557 = vmatprep.mubr.msk.f32.mxu1 %vm16658_vm2, %v20214_v10 }
 0x367   :  { %15565 = vmatprep.subr.mxu1 %v20214_v10 }
 0x369   :  { %15558 = vmatmul.mubr.msk.f32.vlgmr.msra.gmra.mxu1 %vm481_vm3, %v4074_v51 }
 0x36a   :  { %15566 = vmatpush3.xpose.msk.msra.mxu1 %vm481_vm3, %v4232_v4  ;;  %15567 = vmatprep.mubr.msk.f32.mxu1 %vm16658_vm2, %v20214_v10 }
 0x36b   :  { %15575 = vmatprep.subr.mxu1 %v20214_v10 }
 0x36d   :  { %15568 = vmatmul.mubr.msk.f32.vlgmr.msra.gmra.mxu1 %vm481_vm3, %v4230_v19 }
 0x36e   :  { %15576 = vmatpush3.msra.mxu1 %v4562_v48  ;;  %15577 = vmatprep.mubr.msk.f32.mxu1 %vm16658_vm2, %v20214_v10 }
 0x36f   :  { %15585 = vmatprep.subr.mxu1 %v20214_v10 }
 0x3a3   :  { %v17695_v39 = vpop.f32.mrf.mxu0 }
 0x3a4   :  { %20229 = vst [vmem:[#allocation48_spill] sm:$0xff] %v17695_v39 }
 0x3a5   :  { %v15414_v11 = vpop.f32.mrf.mxu0 }
 0x3a7   :  { %v17697_v42 = vpop.f32.mrf.mxu1 }
 0x3a8   :  { %20230 = vst [vmem:[#allocation47_spill] sm:$0xff] %v17697_v42 }
 0x3a9   :  { %v15419_v18 = vpop.f32.mrf.mxu1 }
 0x3ab   :  { %v17699_v5 = vpop.f32.mrf.mxu0 }
 0x3ac   :  { %20231 = vst [vmem:[#allocation50_spill] sm:$0xff] %v17699_v5 }
 0x3ad   :  { %v15424_v17 = vpop.f32.mrf.mxu0 }
 0x3af   :  { %v17701_v20 = vpop.f32.mrf.mxu1 }
 0x3b0   :  { %20232 = vst [vmem:[#allocation52_spill] sm:$0xff] %v17701_v20 }
 0x3b1   :  { %v15429_v28 = vpop.f32.mrf.mxu1 }
 0x3b3   :  { %v17703_v0 = vpop.f32.mrf.mxu0 }
 0x3b4   :  { %20233 = vst [vmem:[#allocation49_spill] sm:$0xff] %v17703_v0 }
 0x3b5   :  { %v15434_v13 = vpop.f32.mrf.mxu0 }
 0x3b7   :  { %v17705_v2 = vpop.f32.mrf.mxu1 }
 0x3b8   :  { %20234 = vst [vmem:[#allocation51_spill] sm:$0xff] %v17705_v2 }
 0x3b9   :  { %v15439_v21 = vpop.f32.mrf.mxu1 }
 0x3bb   :  { %v17707_v50 = vpop.f32.mrf.mxu0 }
 0x3bc   :  { %20235 = vst [vmem:[#allocation53_spill] sm:$0xff] %v17707_v50 }
 0x3bd   :  { %v15444_v55 = vpop.f32.mrf.mxu0 }
 0x3bf   :  { %v17709_v29 = vpop.f32.mrf.mxu1 }
 0x3c0   :  { %20236 = vst [vmem:[#allocation61_spill] sm:$0xff] %v17709_v29 }
 0x3c1   :  { %v15449_v63 = vpop.f32.mrf.mxu1 }
 0x3c3   :  { %v17711_v15 = vpop.f32.mrf.mxu0 }
 0x3c4   :  { %20237 = vst [vmem:[#allocation62_spill] sm:$0xff] %v17711_v15 }
 0x3c5   :  { %v15454_v45 = vpop.f32.mrf.mxu0 }
 0x3c7   :  { %v17713_v38 = vpop.f32.mrf.mxu1 }
 0x3c8   :  { %20238 = vst [vmem:[#allocation63_spill] sm:$0xff] %v17713_v38 }
 0x3c9   :  { %v15459_v52 = vpop.f32.mrf.mxu1 }
 0x3cb   :  { %v17715_v51 = vpop.f32.mrf.mxu0 }
 0x3cc   :  { %20239 = vst [vmem:[#allocation64_spill] sm:$0xff] %v17715_v51 }
 0x3cd   :  { %v15464_v4 = vpop.f32.mrf.mxu0 }
 0x3cf   :  { %v17717_v19 = vpop.f32.mrf.mxu0 }
 0x3d0   :  { %20240 = vst [vmem:[#allocation65_spill] sm:$0xff] %v17717_v19  ;;  %v17719_v48 = vpop.f32.mrf.mxu1 }
 0x3d1   :  { %20241 = vst [vmem:[#allocation66_spill] sm:$0xff] %v17719_v48  ;;  %v15474_v11 = vpop.f32.mrf.mxu0 }
 0x3d2   :  { %v15469_v18 = vpop.f32.mrf.mxu1 }
 0x3d3   :  { %v17721_v17 = vpop.f32.mrf.mxu0 }
 0x3d4   :  { %20242 = vst [vmem:[#allocation67_spill] sm:$0xff] %v17721_v17  ;;  %v17723_v28 = vpop.f32.mrf.mxu1 }
 0x3d5   :  { %20243 = vst [vmem:[#allocation68_spill] sm:$0xff] %v17723_v28  ;;  %v15484_v13 = vpop.f32.mrf.mxu0 }
 0x3d6   :  { %v15479_v21 = vpop.f32.mrf.mxu1 }
 0x3d7   :  { %v17725_v55 = vpop.f32.mrf.mxu0 }
 0x3d8   :  { %v4307_v63 = vsel %vm1698_vm4, %v17725_v55, -inf }
 0x3d9   :  { %4308 = vmax.xlane.f32.xlu0 %v4307_v63  ;;  %v15494_v45 = vpop.f32.mrf.mxu0 }
 0x3db   :  { %v17729_v52 = vpop.f32.mrf.mxu0 }
 0x3dc   :  { %v4313_v4 = vsel %vm1698_vm4, %v17729_v52, -inf }
 0x3dd   :  { %4314 = vmax.xlane.f32.xlu0 %v4313_v4  ;;  %v15504_v11 = vpop.f32.mrf.mxu0  ;;  %v17745_v4 = vpop.permute.xlu0 %4638 }
 0x3df   :  { %v17733_v18 = vpop.f32.mrf.mxu0 }
 0x3e1   :  { %v15514_v51 = vpop.f32.mrf.mxu0  ;;  %v17747_v11 = vpop.permute.xlu0 %4715 }
 0x3e2   :  { %20244 = vst [vmem:[#allocation69_spill] sm:$0xff] %v17747_v11 }
 0x3e3   :  { %v17735_v38 = vpop.f32.mrf.mxu0 }
 0x3e4   :  { %v4325_v28 = vsel %vm1698_vm4, %v17735_v38, -inf }
 0x3e5   :  { %v15524_v13 = vpop.f32.mrf.mxu0 }
 0x3e6   :  { %v17751_v13 = vpop.permute.xlu0 %4792 }
 0x3e7   :  { %v17737_v21 = vpop.f32.mrf.mxu0 }
 0x3e9   :  { %v15534_v15 = vpop.f32.mrf.mxu0 }
 0x3ea   :  { %v17759_v42 = vpop.permute.xlu0 %4869 }
 0x3eb   :  { %v17739_v29 = vpop.f32.mrf.mxu0  ;;  %20246 = vst [vmem:[#allocation71_spill] sm:$0xff] %v17759_v42 }
 0x3ed   :  { %v15544_v63 = vpop.f32.mrf.mxu0 }
 0x3ef   :  { %v17741_v45 = vpop.f32.mrf.mxu0 }
 0x3f1   :  { %v15554_v50 = vpop.f32.mrf.mxu0 }
 0x3f3   :  { %v17743_v2 = vpop.f32.mrf.mxu0 }
 0x3f5   :  { %v15564_v0 = vpop.f32.mrf.mxu0 }
 0x40d   :  { %v17749_v51 = vpop.f32.mrf.mxu1 }
 0x40e   :  { %20245 = vst [vmem:[#allocation70_spill] sm:$0xff] %v17749_v51 }
 0x40f   :  { %v15489_v20 = vpop.f32.mrf.mxu1 }
 0x410   :  { %v4319_v20 = vsel %vm1698_vm4, %v17733_v18, -inf }
 0x411   :  { %v17753_v5 = vpop.f32.mrf.mxu1 }
 0x412   :  { %v4310_v15 = vsel %vm1698_vm4, %v17753_v5, -inf }
 0x413   :  { %4311 = vmax.xlane.f32.xlu1 %v4310_v15  ;;  %v15499_v63 = vpop.f32.mrf.mxu1 }
 0x414   :  { %v17769_v63 = vpop.permute.xlu0 %4946 }
 0x415   :  { %v17757_v50 = vpop.f32.mrf.mxu1  ;;  %20247 = vst [vmem:[#allocation72_spill] sm:$0xff] %v17769_v63 }
 0x416   :  { %v4316_v0 = vsel %vm1698_vm4, %v17757_v50, -inf }
 0x417   :  { %4317 = vmax.xlane.f32.xlu0 %v4316_v0  ;;  %v15509_v39 = vpop.f32.mrf.mxu1 }
 0x418   :  { %v17779_v42 = vpop.permute.xlu0 %5023 }
 0x419   :  { %v17763_v17 = vpop.f32.mrf.mxu1  ;;  %20248 = vst [vmem:[#allocation73_spill] sm:$0xff] %v17779_v42 }
 0x41a   :  { %v4322_v19 = vsel %vm1698_vm4, %v17763_v17, -inf }
 0x41b   :  { %4320 = vmax.xlane.f32.xlu0 %v4319_v20  ;;  %4323 = vmax.xlane.f32.xlu1 %v4322_v19  ;;  %v15519_v15 = vpop.f32.mrf.mxu1  ;;  %v4331_v19 = vsel %vm1698_vm4, %v17737_v21, -inf }
 0x41c   :  { %v17791_v42 = vpop.permute.xlu0 %5100 }
 0x41d   :  { %v17771_v51 = vpop.f32.mrf.mxu1  ;;  %20249 = vst [vmem:[#allocation74_spill] sm:$0xff] %v17791_v42 }
 0x41e   :  { %v4328_v39 = vsel %vm1698_vm4, %v17771_v51, -inf }
 0x41f   :  { %4326 = vmax.xlane.f32.xlu0 %v4325_v28  ;;  %4329 = vmax.xlane.f32.xlu1 %v4328_v39  ;;  %v15529_v0 = vpop.f32.mrf.mxu1  ;;  %v4337_v28 = vsel %vm1698_vm4, %v17739_v29, -inf }
 0x420   :  { %v17801_v9 = vpop.permute.xlu0 %5177 }
 0x421   :  { %v17777_v48 = vpop.f32.mrf.mxu1  ;;  %20250 = vst [vmem:[#allocation75_spill] sm:$0xff] %v17801_v9 }
 0x422   :  { %v4334_v20 = vsel %vm1698_vm4, %v17777_v48, -inf }
 0x423   :  { %4332 = vmax.xlane.f32.xlu0 %v4331_v19  ;;  %4335 = vmax.xlane.f32.xlu1 %v4334_v20  ;;  %v15539_v15 = vpop.f32.mrf.mxu1  ;;  %v4343_v19 = vsel %vm1698_vm4, %v17741_v45, -inf }
 0x425   :  { %v17785_v63 = vpop.f32.mrf.mxu1 }
 0x426   :  { %v4340_v39 = vsel %vm1698_vm4, %v17785_v63, -inf }
 0x427   :  { %4338 = vmax.xlane.f32.xlu0 %v4337_v28  ;;  %4341 = vmax.xlane.f32.xlu1 %v4340_v39  ;;  %v15549_v0 = vpop.f32.mrf.mxu1  ;;  %v4349_v28 = vsel %vm1698_vm4, %v17743_v2, -inf }
 0x428   :  { %v17805_v0 = vpop.permute.xlu0 %5254 }
 0x429   :  { %v17793_v11 = vpop.f32.mrf.mxu1  ;;  %20251 = vst [vmem:[#allocation76_spill] sm:$0xff] %v17805_v0  ;;  %v20261_v0 = vld [vmem:[#allocation24_spill] sm:$0xff] }
 0x42a   :  { %v4346_v20 = vsel %vm1698_vm4, %v17793_v11, -inf }
 0x42b   :  { %4344 = vmax.xlane.f32.xlu0 %v4343_v19  ;;  %4347 = vmax.xlane.f32.xlu1 %v4346_v20  ;;  %v15559_v15 = vpop.f32.mrf.mxu1  ;;  %v20255_v19 = vld [vmem:[#allocation25_spill] sm:$0xff]  ;;  %v20256_v20 = vld [vmem:[#allocation28_spill] sm:$0xff] }
 0x42c   :  { %v17807_v42 = vpop.permute.xlu0 %5408  ;;  %v20257_v15 = vld [vmem:[#allocation17_spill] sm:$0xff] }
 0x42d   :  { %v17799_v62 = vpop.f32.mrf.mxu1  ;;  %20252 = vst [vmem:[#allocation77_spill] sm:$0xff] %v17807_v42 }
 0x42f   :  { %4350 = vmax.xlane.f32.xlu0 %v4349_v28  ;;  %v15569_v39 = vpop.f32.mrf.mxu1 }
 0x430   :  { %v17811_v33 = vpop.permute.xlu0 %5485  ;;  %v20259_v39 = vld [vmem:[#allocation21_spill] sm:$0xff] }
 0x431   :  { %20254 = vst [vmem:[#allocation78_spill] sm:$0xff] %v17811_v33 }
 0x434   :  { %v17819_v28 = vpop.permute.xlu0 %5562 }
 0x435   :  { %20258 = vst [vmem:[#allocation79_spill] sm:$0xff] %v17819_v28 }
 0x438   :  { %v17823_v42 = vpop.permute.xlu0 %5639 }
 0x439   :  { %20260 = vst [vmem:[#allocation80_spill] sm:$0xff] %v17823_v42  ;;  %v4352_v42 = vsel %vm1698_vm4, %v17799_v62, -inf }
 0x43c   :  { %6029 = vrot.lane.b32.xlu1 %v20253_v7, %s16660_s24  ;;  %v17827_v33 = vpop.permute.xlu0 %5797 }
 0x43d   :  { %20262 = vst [vmem:[#allocation81_spill] sm:$0xff] %v17827_v33 }
 0x440   :  { %6187 = vrot.lane.b32.xlu1 %v20255_v19, %s16660_s24  ;;  %v17829_v9 = vpop.permute.xlu0 %5795 }
 0x441   :  { %20263 = vst [vmem:[#allocation82_spill] sm:$0xff] %v17829_v9 }
 0x444   :  { %6185 = vrot.lane.b32.xlu1 %v20256_v20, %s16660_s24  ;;  %v17831_v19 = vpop.permute.xlu0 %5953 }
 0x445   :  { %5951 = vrot.lane.b32.xlu0 %v20257_v15, %s16660_s24  ;;  %20264 = vst [vmem:[#allocation83_spill] sm:$0xff] %v17831_v19 }
 0x449   :  { %6109 = vrot.lane.b32.xlu0 %v20259_v39, %s16660_s24 }
 0x44d   :  { %6107 = vrot.lane.b32.xlu0 %v20261_v0, %s16660_s24 }
 0x462   :  { %v4309_v20 = vpop.xlane.xlu0 %4308 }
 0x463   :  { %v4355_v7 = vsub.f32 %v17725_v55, %v4309_v20  ;;  %v17845_v55 = vpop.permute.xlu1 %5331 }
 0x464   :  { %20265 = vst [vmem:[#allocation84_spill] sm:$0xff] %v17845_v55 }
 0x465   :  { %v4371_v15 = vmul.f32 1.442695, %v4355_v7 }
 0x466   :  { %v4315_v35 = vpop.xlane.xlu0 %4314 }
 0x467   :  { %16353 = vpow2.f32 %v4371_v15  ;;  %v4357_v28 = vsub.f32 %v17729_v52, %v4315_v35  ;;  %v17847_v35 = vpop.permute.xlu1 %5875 }
 0x468   :  { %4353 = vmax.xlane.f32.xlu1 %v4352_v42  ;;  %20266 = vst [vmem:[#allocation85_spill] sm:$0xff] %v17847_v35 }
 0x469   :  { %v4375_v39 = vmul.f32 1.442695, %v4357_v28 }
 0x46b   :  { %16355 = vpow2.f32 %v4375_v39  ;;  %v17849_v52 = vpop.permute.xlu1 %5873 }
 0x46c   :  { %20267 = vst [vmem:[#allocation86_spill] sm:$0xff] %v17849_v52 }
 0x46f   :  { %v17851_v42 = vpop.permute.xlu1 %6031 }
 0x470   :  { %20268 = vst [vmem:[#allocation87_spill] sm:$0xff] %v17851_v42 }
 0x474   :  { %v17837_v0 = vpop.eup %16353 }
 0x475   :  { %v4403_v9 = vsel %vm1698_vm4, %v17837_v0, 0.0 }
 0x476   :  { %4404 = vadd.xlane.f32.xlu0 %v4403_v9 }
 0x478   :  { %v17841_v19 = vpop.eup %16355 }
 0x479   :  { %v4409_v7 = vsel %vm1698_vm4, %v17841_v19, 0.0 }
 0x47a   :  { %4410 = vadd.xlane.f32.xlu0 %v4409_v7 }
 0x49c   :  { %v4312_v20 = vpop.xlane.xlu1 %4311 }
 0x49d   :  { %v4356_v15 = vsub.f32 %v17753_v5, %v4312_v20 }
 0x49f   :  { %v4373_v28 = vmul.f32 1.442695, %v4356_v15 }
 0x4a0   :  { %v4318_v39 = vpop.xlane.xlu0 %4317 }
 0x4a1   :  { %16357 = vpow2.f32 %v4373_v28  ;;  %v4358_v9 = vsub.f32 %v17757_v50, %v4318_v39 }
 0x4a3   :  { %v4377_v33 = vmul.f32 1.442695, %v4358_v9 }
 0x4a4   :  { %v4321_v36 = vpop.xlane.xlu0 %4320  ;;  %v4324_v59 = vpop.xlane.xlu1 %4323 }
 0x4a5   :  { %16359 = vpow2.f32 %v4377_v33  ;;  %v4359_v7 = vsub.f32 %v17733_v18, %v4321_v36  ;;  %v4360_v35 = vsub.f32 %v17763_v17, %v4324_v59 }
 0x4a7   :  { %v4379_v55 = vmul.f32 1.442695, %v4359_v7  ;;  %v4381_v52 = vmul.f32 1.442695, %v4360_v35 }
 0x4a8   :  { %v4327_v31 = vpop.xlane.xlu0 %4326  ;;  %v4330_v42 = vpop.xlane.xlu1 %4329 }
 0x4a9   :  { %16361 = vpow2.f32 %v4379_v55  ;;  %v4361_v5 = vsub.f32 %v17735_v38, %v4327_v31  ;;  %v4362_v20 = vsub.f32 %v17771_v51, %v4330_v42 }
 0x4aa   :  { %16363 = vpow2.f32 %v4381_v52 }
 0x4ab   :  { %v4383_v15 = vmul.f32 1.442695, %v4361_v5  ;;  %v4385_v50 = vmul.f32 1.442695, %v4362_v20 }
 0x4ac   :  { %v4333_v28 = vpop.xlane.xlu0 %4332  ;;  %v4336_v39 = vpop.xlane.xlu1 %4335 }
 0x4ad   :  { %16365 = vpow2.f32 %v4383_v15  ;;  %v4363_v33 = vsub.f32 %v17737_v21, %v4333_v28  ;;  %v4364_v36 = vsub.f32 %v17777_v48, %v4336_v39 }
 0x4ae   :  { %v17861_v59 = vpop.eup %16357  ;;  %16367 = vpow2.f32 %v4385_v50 }
 0x4af   :  { %v4387_v17 = vmul.f32 1.442695, %v4363_v33  ;;  %v4389_v18 = vmul.f32 1.442695, %v4364_v36  ;;  %v4406_v31 = vsel %vm1698_vm4, %v17861_v59, 0.0 }
 0x4b0   :  { %v4339_v38 = vpop.xlane.xlu0 %4338  ;;  %v4342_v51 = vpop.xlane.xlu1 %4341  ;;  %4407 = vadd.xlane.f32.xlu1 %v4406_v31 }
 0x4b1   :  { %16369 = vpow2.f32 %v4387_v17  ;;  %v4365_v55 = vsub.f32 %v17739_v29, %v4339_v38  ;;  %v4366_v35 = vsub.f32 %v17785_v63, %v4342_v51 }
 0x4b2   :  { %v17867_v52 = vpop.eup %16359  ;;  %16371 = vpow2.f32 %v4389_v18 }
 0x4b3   :  { %v4391_v48 = vmul.f32 1.442695, %v4365_v55  ;;  %v4393_v21 = vmul.f32 1.442695, %v4366_v35  ;;  %v4412_v42 = vsel %vm1698_vm4, %v17867_v52, 0.0 }
 0x4b4   :  { %v4345_v9 = vpop.xlane.xlu0 %4344  ;;  %4413 = vadd.xlane.f32.xlu1 %v4412_v42  ;;  %v4348_v42 = vpop.xlane.xlu1 %4347 }
 0x4b5   :  { %16373 = vpow2.f32 %v4391_v48  ;;  %v4367_v7 = vsub.f32 %v17741_v45, %v4345_v9  ;;  %v20270_v9 = vld [vmem:[#allocation29_spill] sm:$0xff] }
 0x4b6   :  { %v17872_v5 = vpop.eup %16361  ;;  %16375 = vpow2.f32 %v4393_v21  ;;  %v20269_v21 = vld [vmem:[#allocation32_spill] sm:$0xff] }
 0x4b7   :  { %v17874_v20 = vpop.eup %16363  ;;  %v4395_v29 = vmul.f32 1.442695, %v4367_v7  ;;  %v4415_v63 = vsel %vm1698_vm4, %v17872_v5, 0.0 }
 0x4b8   :  { %4416 = vadd.xlane.f32.xlu0 %v4415_v63  ;;  %v4418_v15 = vsel %vm1698_vm4, %v17874_v20, 0.0  ;;  %v17916_v7 = vpop.permute.xlu1 %6029  ;;  %v4368_v63 = vsub.f32 %v17793_v11, %v4348_v42 }
 0x4b9   :  { %16377 = vpow2.f32 %v4395_v29  ;;  %4419 = vadd.xlane.f32.xlu1 %v4418_v15  ;;  %v4351_v15 = vpop.xlane.xlu0 %4350 }
 0x4ba   :  { %v17880_v50 = vpop.eup %16365 }
 0x4bb   :  { %v17882_v28 = vpop.eup %16367  ;;  %v4421_v45 = vsel %vm1698_vm4, %v17880_v50, 0.0 }
 0x4bc   :  { %4422 = vadd.xlane.f32.xlu0 %v4421_v45  ;;  %v4424_v39 = vsel %vm1698_vm4, %v17882_v28, 0.0  ;;  %v17922_v29 = vpop.permute.xlu1 %6187  ;;  %v4397_v45 = vmul.f32 1.442695, %v4368_v63 }
 0x4bd   :  { %4425 = vadd.xlane.f32.xlu1 %v4424_v39  ;;  %v4369_v39 = vsub.f32 %v17743_v2, %v4351_v15 }
 0x4be   :  { %v17888_v33 = vpop.eup %16369  ;;  %16379 = vpow2.f32 %v4397_v45 }
 0x4bf   :  { %v17890_v36 = vpop.eup %16371  ;;  %v4427_v17 = vsel %vm1698_vm4, %v17888_v33, 0.0 }
 0x4c0   :  { %4428 = vadd.xlane.f32.xlu0 %v4427_v17  ;;  %v4430_v18 = vsel %vm1698_vm4, %v17890_v36, 0.0  ;;  %v17928_v17 = vpop.permute.xlu1 %6185 }
 0x4c1   :  { %4431 = vadd.xlane.f32.xlu1 %v4430_v18  ;;  %v17932_v18 = vpop.permute.xlu0 %5951 }
 0x4c2   :  { %v17896_v31 = vpop.eup %16373 }
 0x4c3   :  { %v17898_v38 = vpop.eup %16375  ;;  %v4433_v51 = vsel %vm1698_vm4, %v17896_v31, 0.0 }
 0x4c4   :  { %4434 = vadd.xlane.f32.xlu0 %v4433_v51  ;;  %v4436_v55 = vsel %vm1698_vm4, %v17898_v38, 0.0  ;;  %v4399_v51 = vmul.f32 1.442695, %v4369_v39 }
 0x4c5   :  { %4437 = vadd.xlane.f32.xlu1 %v4436_v55  ;;  %v17937_v11 = vpop.permute.xlu0 %6109 }
 0x4c6   :  { %v17904_v35 = vpop.eup %16377  ;;  %16381 = vpow2.f32 %v4399_v51 }
 0x4c7   :  { %v4439_v48 = vsel %vm1698_vm4, %v17904_v35, 0.0 }
 0x4c8   :  { %4440 = vadd.xlane.f32.xlu0 %v4439_v48 }
 0x4c9   :  { %v17943_v2 = vpop.permute.xlu0 %6107 }
 0x4cb   :  { %v17945_v63 = vpop.eup %16379 }
 0x4cc   :  { %v4442_v15 = vsel %vm1698_vm4, %v17945_v63, 0.0 }
 0x4d3   :  { %v17951_v45 = vpop.eup %16381 }
 0x4d4   :  { %v4445_v51 = vsel %vm1698_vm4, %v17951_v45, 0.0 }
 0x4d6   :  { %6343 = vrot.lane.b32.xlu1 %v20269_v21, %s16660_s24 }
 0x4da   :  { %6341 = vrot.lane.b32.xlu1 %v17046_v46, %s16660_s24 }
 0x4de   :  { %6499 = vrot.lane.b32.xlu1 %v17073_v14, %s16660_s24  ;;  %6265 = vrot.lane.b32.xlu0 %v20270_v9, %s16660_s24 }
 0x4e2   :  { %6263 = vrot.lane.b32.xlu0 %v17025_v27, %s16660_s24 }
 0x4e6   :  { %6421 = vrot.lane.b32.xlu0 %v17052_v53, %s16660_s24 }
 0x4ea   :  { %6419 = vrot.lane.b32.xlu0 %v17064_v1, %s16660_s24 }
 0x4ee   :  { %6577 = vrot.lane.b32.xlu0 %v17094_v43, %s16660_s24 }
 0x4f1   :  { %v4354_v55 = vpop.xlane.xlu1 %4353 }
 0x4f2   :  { %v4370_v48 = vsub.f32 %v17799_v62, %v4354_v55  ;;  %6575 = vrot.lane.b32.xlu0 %v17113_v6, %s16660_s24 }
 0x4f4   :  { %v4401_v42 = vmul.f32 1.442695, %v4370_v48 }
 0x4f6   :  { %6733 = vrot.lane.b32.xlu0 %v17118_v40, %s16660_s24  ;;  %16383 = vpow2.f32 %v4401_v42 }
 0x4fa   :  { %6731 = vrot.lane.b32.xlu0 %v17147_v26, %s16660_s24 }
 0x4fe   :  { %6889 = vrot.lane.b32.xlu0 %v17135_v37, %s16660_s24 }
 0x4ff   :  { %v4405_v62 = vpop.xlane.xlu0 %4404 }
 0x500   :  { %16385 = vrcp.f32 %v4405_v62 }
 0x502   :  { %4443 = vadd.xlane.f32.xlu1 %v4442_v15  ;;  %6887 = vrot.lane.b32.xlu0 %v17160_v41, %s16660_s24 }
 0x503   :  { %v4411_v39 = vpop.xlane.xlu0 %4410  ;;  %v17957_v55 = vpop.eup %16383 }
 0x504   :  { %16387 = vrcp.f32 %v4411_v39  ;;  %v4448_v48 = vsel %vm1698_vm4, %v17957_v55, 0.0 }
 0x506   :  { %4446 = vadd.xlane.f32.xlu1 %v4445_v51  ;;  %7295 = vrot.lane.b32.xlu0 %v17200_v54, %s16660_s24 }
 0x50a   :  { %4449 = vadd.xlane.f32.xlu1 %v4448_v48  ;;  %7371 = vrot.lane.b32.xlu0 %v17417_v34, %s16660_s24  ;;  %v20274_v48 = vld [vmem:[#allocation14_spill] sm:$0xff] }
 0x50d   :  { %v16386_v42 = vpop.eup %16385 }
 0x50e   :  { %7447 = vrot.lane.b32.xlu0 %v16975_v8, %s16660_s24  ;;  %v4452_v62 = vmul.f32 %v16386_v42, %v17837_v0  ;;  %v20272_v0 = vld [vmem:[#allocation12_spill] sm:$0xff] }
 0x50f   :  { %v20275_v42 = vld [vmem:[#allocation60_spill] sm:$0xff] }
 0x510   :  { %15573 = vmatmul.mubr.msk.f32.vlgmr.msra.gmra.mxu0 %vm1698_vm4, %v4452_v62 }
 0x511   :  { %v16388_v15 = vpop.eup %16387  ;;  %15581 = vmatpush3.msra.mxu0 %v17745_v4  ;;  %15582 = vmatprep.mubr.msk.f32.mxu0 %vm16658_vm2, %v20214_v10  ;;  %v20271_v4 = vld [vmem:[#allocation45_spill] sm:$0xff] }
 0x512   :  { %7523 = vrot.lane.b32.xlu0 %v17425_v3, %s16660_s24  ;;  %15590 = vmatprep.subr.mxu0 %v20214_v10  ;;  %v4456_v39 = vmul.f32 %v16388_v15, %v17841_v19  ;;  %v20273_v19 = vld [vmem:[#allocation33_spill] sm:$0xff] }
 0x514   :  { %15583 = vmatmul.mubr.msk.f32.vlgmr.msra.gmra.mxu0 %vm1698_vm4, %v4456_v39  ;;  %v20276_v39 = vld [vmem:[#allocation18_spill] sm:$0xff] }
 0x515   :  { %15591 = vmatpush3.msra.mxu0 %v17751_v13  ;;  %15592 = vmatprep.mubr.msk.f32.mxu0 %vm16658_vm2, %v20214_v10 }
 0x516   :  { %7599 = vrot.lane.b32.xlu0 %v16998_v16, %s16660_s24  ;;  %15600 = vmatprep.subr.mxu0 %v20214_v10 }
 0x51a   :  { %7675 = vrot.lane.b32.xlu0 %v17437_v12, %s16660_s24 }
 0x51b   :  { %6497 = vrot.lane.b32.xlu1 %v17088_v30, %s16660_s24 }
 0x51e   :  { %7751 = vrot.lane.b32.xlu0 %v17019_v24, %s16660_s24 }
 0x51f   :  { %6655 = vrot.lane.b32.xlu1 %v17121_v60, %s16660_s24 }
 0x522   :  { %7827 = vrot.lane.b32.xlu0 %v17451_v57, %s16660_s24 }
 0x523   :  { %6653 = vrot.lane.b32.xlu1 %v17144_v47, %s16660_s24 }
 0x526   :  { %7979 = vrot.lane.b32.xlu0 %v17467_v49, %s16660_s24 }
 0x527   :  { %6811 = vrot.lane.b32.xlu1 %v17152_v23, %s16660_s24 }
 0x52a   :  { %8055 = vrot.lane.b32.xlu0 %v17061_v61, %s16660_s24 }
 0x52b   :  { %6809 = vrot.lane.b32.xlu1 %v17179_v25, %s16660_s24 }
 0x52e   :  { %8131 = vrot.lane.b32.xlu0 %v17475_v56, %s16660_s24 }
 0x52f   :  { %6967 = vrot.lane.b32.xlu1 %v17172_v44, %s16660_s24 }
 0x532   :  { %8207 = vrot.lane.b32.xlu0 %v17082_v22, %s16660_s24 }
 0x533   :  { %6965 = vrot.lane.b32.xlu1 %v17192_v32, %s16660_s24 }
 0x536   :  { %8359 = vrot.lane.b32.xlu0 %v20215_v58, %s16660_s24  ;;  %v20279_v58 = vld [vmem:[#allocation10_spill] sm:$0xff] }
 0x537   :  { %7219 = vrot.lane.b32.xlu1 %v20271_v4, %s16660_s24 }
 0x539   :  { %v4408_v13 = vpop.xlane.xlu1 %4407 }
 0x53a   :  { %16389 = vrcp.f32 %v4408_v13  ;;  %8595 = vrot.lane.b32.xlu0 %v20272_v0, %s16661_s25  ;;  %v20277_v13 = vld [vmem:[#allocation9_spill] sm:$0xff] }
 0x53b   :  { %7903 = vrot.lane.b32.xlu1 %v20273_v19, %s16660_s24 }
 0x53d   :  { %v4414_v51 = vpop.xlane.xlu1 %4413 }
 0x53e   :  { %16391 = vrcp.f32 %v4414_v51  ;;  %8593 = vrot.lane.b32.xlu0 %v20274_v48, %s16661_s25  ;;  %v20278_v51 = vld [vmem:[#allocation20_spill] sm:$0xff] }
 0x53f   :  { %8283 = vrot.lane.b32.xlu1 %v20275_v42, %s16660_s24 }
 0x541   :  { %v4417_v62 = vpop.xlane.xlu0 %4416 }
 0x542   :  { %16393 = vrcp.f32 %v4417_v62  ;;  %v4420_v15 = vpop.xlane.xlu1 %4419  ;;  %8751 = vrot.lane.b32.xlu0 %v20276_v39, %s16661_s25 }
 0x543   :  { %16395 = vrcp.f32 %v4420_v15  ;;  %8517 = vrot.lane.b32.xlu1 %v20277_v13, %s16661_s25  ;;  %v20280_v13 = vld [vmem:[#allocation15_spill] sm:$0xff] }
 0x545   :  { %v4423_v0 = vpop.xlane.xlu0 %4422 }
 0x546   :  { %16397 = vrcp.f32 %v4423_v0  ;;  %v4426_v49 = vpop.xlane.xlu1 %4425  ;;  %8749 = vrot.lane.b32.xlu0 %v20278_v51, %s16661_s25  ;;  %v20281_v0 = vld [vmem:[#allocation69_spill] sm:$0xff] }
 0x547   :  { %v16390_v48 = vpop.eup %16389  ;;  %16399 = vrcp.f32 %v4426_v49  ;;  %8515 = vrot.lane.b32.xlu1 %v20279_v58, %s16661_s25  ;;  %v20282_v51 = vld [vmem:[#allocation17_spill] sm:$0xff] }
 0x548   :  { %v4454_v62 = vmul.f32 %v16390_v48, %v17861_v59  ;;  %v20283_v48 = vld [vmem:[#allocation71_spill] sm:$0xff] }
 0x549   :  { %v4429_v42 = vpop.xlane.xlu0 %4428 }
 0x54a   :  { %16401 = vrcp.f32 %v4429_v42  ;;  %v4432_v39 = vpop.xlane.xlu1 %4431  ;;  %15578 = vmatmul.mubr.msk.f32.vlgmr.msra.gmra.mxu1 %vm1698_vm4, %v4454_v62 }
 0x54b   :  { %v16392_v15 = vpop.eup %16391  ;;  %16403 = vrcp.f32 %v4432_v39  ;;  %8673 = vrot.lane.b32.xlu1 %v20280_v13, %s16661_s25  ;;  %15586 = vmatpush3.msra.mxu1 %v20281_v0  ;;  %v20284_v0 = vld [vmem:[#allocation72_spill] sm:$0xff] }
 0x54c   :  { %15587 = vmatprep.mubr.msk.f32.mxu1 %vm16658_vm2, %v20214_v10  ;;  %15595 = vmatprep.subr.mxu1 %v20214_v10  ;;  %v4458_v49 = vmul.f32 %v16392_v15, %v17867_v52 }
 0x54d   :  { %v4435_v58 = vpop.xlane.xlu0 %4434 }
 0x54e   :  { %16405 = vrcp.f32 %v4435_v58  ;;  %v4438_v59 = vpop.xlane.xlu1 %4437  ;;  %15588 = vmatmul.mubr.msk.f32.vlgmr.msra.gmra.mxu1 %vm1698_vm4, %v4458_v49  ;;  %v20285_v49 = vld [vmem:[#allocation21_spill] sm:$0xff] }
 0x54f   :  { %v16394_v42 = vpop.eup %16393  ;;  %16407 = vrcp.f32 %v4438_v59  ;;  %8671 = vrot.lane.b32.xlu1 %v20282_v51, %s16661_s25  ;;  %15596 = vmatpush3.msra.mxu1 %v20283_v48  ;;  %v20286_v59 = vld [vmem:[#allocation73_spill] sm:$0xff]  ;;  %v20287_v48 = vld [vmem:[#allocation74_spill] sm:$0xff] }
 0x550   :  { %v16396_v62 = vpop.eup %16395  ;;  %15597 = vmatprep.mubr.msk.f32.mxu1 %vm16658_vm2, %v20214_v10  ;;  %15605 = vmatprep.subr.mxu1 %v20214_v10  ;;  %v4460_v52 = vmul.f32 %v16394_v42, %v17872_v5 }
 0x551   :  { %v4441_v39 = vpop.xlane.xlu0 %4440  ;;  %v4462_v15 = vmul.f32 %v16396_v62, %v17874_v20  ;;  %v20288_v62 = vld [vmem:[#allocation75_spill] sm:$0xff] }
 0x552   :  { %16409 = vrcp.f32 %v4441_v39  ;;  %15593 = vmatmul.mubr.msk.f32.vlgmr.msra.gmra.mxu0 %vm1698_vm4, %v4460_v52 }
 0x553   :  { %v16398_v13 = vpop.eup %16397  ;;  %15601 = vmatpush3.msra.mxu0 %v20284_v0  ;;  %8829 = vrot.lane.b32.xlu1 %v20285_v49, %s16661_s25 }
 0x554   :  { %v16400_v58 = vpop.eup %16399  ;;  %15598 = vmatmul.mubr.msk.f32.vlgmr.msra.gmra.mxu1 %vm1698_vm4, %v4462_v15  ;;  %15602 = vmatprep.mubr.msk.f32.mxu0 %vm16658_vm2, %v20214_v10  ;;  %v4464_v5 = vmul.f32 %v16398_v13, %v17880_v50  ;;  %v20290_v13 = vld [vmem:[#allocation84_spill] sm:$0xff] }
 0x555   :  { %15606 = vmatpush3.msra.mxu1 %v20286_v59  ;;  %15610 = vmatprep.subr.mxu0 %v20214_v10  ;;  %v4466_v20 = vmul.f32 %v16400_v58, %v17882_v28  ;;  %v20292_v58 = vld [vmem:[#allocation78_spill] sm:$0xff] }
 0x556   :  { %15607 = vmatprep.mubr.msk.f32.mxu1 %vm16658_vm2, %v20214_v10  ;;  %15615 = vmatprep.subr.mxu1 %v20214_v10 }
 0x557   :  { %v16402_v42 = vpop.eup %16401  ;;  %15603 = vmatmul.mubr.msk.f32.vlgmr.msra.gmra.mxu0 %vm1698_vm4, %v4464_v5 }
 0x558   :  { %v16404_v51 = vpop.eup %16403  ;;  %15608 = vmatmul.mubr.msk.f32.vlgmr.msra.gmra.mxu1 %vm1698_vm4, %v4466_v20  ;;  %15611 = vmatpush3.msra.mxu0 %v20287_v48  ;;  %v4468_v50 = vmul.f32 %v16402_v42, %v17888_v33  ;;  %v20289_v33 = vld [vmem:[#allocation76_spill] sm:$0xff]  ;;  %v6266_v20 = vpop.permute.xlu0 %6265 }
 0x559   :  { %15616 = vmatpush3.msra.mxu1 %v20288_v62  ;;  %15612 = vmatprep.mubr.msk.f32.mxu0 %vm16658_vm2, %v20214_v10  ;;  %v4470_v28 = vmul.f32 %v16404_v51, %v17890_v36 }
 0x55a   :  { %15620 = vmatprep.subr.mxu0 %v20214_v10  ;;  %15617 = vmatprep.mubr.msk.f32.mxu1 %vm16658_vm2, %v20214_v10 }
 0x55b   :  { %v16406_v52 = vpop.eup %16405  ;;  %15625 = vmatprep.subr.mxu1 %v20214_v10  ;;  %15613 = vmatmul.mubr.msk.f32.vlgmr.msra.gmra.mxu0 %vm1698_vm4, %v4468_v50 }
 0x55c   :  { %v16408_v39 = vpop.eup %16407  ;;  %15618 = vmatmul.mubr.msk.f32.vlgmr.msra.gmra.mxu1 %vm1698_vm4, %v4470_v28  ;;  %15621 = vmatpush3.msra.mxu0 %v20289_v33  ;;  %v4472_v15 = vmul.f32 %v16406_v52, %v17896_v31  ;;  %v20291_v31 = vld [vmem:[#allocation77_spill] sm:$0xff]  ;;  %v6264_v51 = vpop.permute.xlu0 %6263 }
 0x55d   :  { %15626 = vmatpush3.msra.mxu1 %v20290_v13  ;;  %15622 = vmatprep.mubr.msk.f32.mxu0 %vm16658_vm2, %v20214_v10  ;;  %v4474_v36 = vmul.f32 %v16408_v39, %v17898_v38  ;;  %v20293_v38 = vld [vmem:[#allocation79_spill] sm:$0xff] }
 0x55e   :  { %15630 = vmatprep.subr.mxu0 %v20214_v10  ;;  %15627 = vmatprep.mubr.msk.f32.mxu1 %vm16658_vm2, %v20214_v10 }
 0x55f   :  { %v16410_v0 = vpop.eup %16409  ;;  %15635 = vmatprep.subr.mxu1 %v20214_v10  ;;  %15623 = vmatmul.mubr.msk.f32.vlgmr.msra.gmra.mxu0 %vm1698_vm4, %v4472_v15 }
 0x560   :  { %15628 = vmatmul.mubr.msk.f32.vlgmr.msra.gmra.mxu1 %vm1698_vm4, %v4474_v36  ;;  %15631 = vmatpush3.msra.mxu0 %v20291_v31  ;;  %v4476_v49 = vmul.f32 %v16410_v0, %v17904_v35  ;;  %v6344_v35 = vpop.permute.xlu1 %6343  ;;  %v6422_v62 = vpop.permute.xlu0 %6421  ;;  %v20294_v36 = vld [vmem:[#allocation80_spill] sm:$0xff] }
 0x561   :  { %15636 = vmatpush3.msra.mxu1 %v20292_v58  ;;  %15632 = vmatprep.mubr.msk.f32.mxu0 %vm16658_vm2, %v20214_v10  ;;  %v20295_v58 = vld [vmem:[#allocation81_spill] sm:$0xff] }
 0x562   :  { %15640 = vmatprep.subr.mxu0 %v20214_v10  ;;  %15637 = vmatprep.mubr.msk.f32.mxu1 %vm16658_vm2, %v20214_v10 }
 0x563   :  { %15633 = vmatmul.mubr.msk.f32.vlgmr.msra.gmra.mxu0 %vm1698_vm4, %v4476_v49  ;;  %15645 = vmatprep.subr.mxu1 %v20214_v10 }
 0x564   :  { %15641 = vmatpush3.msra.mxu0 %v20293_v38  ;;  %15642 = vmatprep.mubr.msk.f32.mxu0 %vm16658_vm2, %v20214_v10  ;;  %v18103_v5 = vpop.permute.xlu1 %6341  ;;  %v6420_v39 = vpop.permute.xlu0 %6419 }
 0x565   :  { %15650 = vmatprep.subr.mxu0 %v20214_v10 }
 0x568   :  { %v18105_v59 = vpop.permute.xlu1 %6499  ;;  %v6578_v31 = vpop.permute.xlu0 %6577 }
 0x58b   :  { %v4444_v42 = vpop.xlane.xlu1 %4443 }
 0x58c   :  { %16411 = vrcp.f32 %v4444_v42  ;;  %v20297_v42 = vld [vmem:[#allocation85_spill] sm:$0xff] }
 0x58f   :  { %v4447_v48 = vpop.xlane.xlu1 %4446 }
 0x590   :  { %16413 = vrcp.f32 %v4447_v48  ;;  %v20298_v48 = vld [vmem:[#allocation83_spill] sm:$0xff] }
 0x593   :  { %v4450_v50 = vpop.xlane.xlu1 %4449 }
 0x594   :  { %16415 = vrcp.f32 %v4450_v50  ;;  %v6576_v50 = vpop.permute.xlu0 %6575 }
 0x597   :  { %v18107_v28 = vpop.permute.xlu1 %6497 }
 0x599   :  { %v16412_v52 = vpop.eup %16411 }
 0x59a   :  { %v4478_v33 = vmul.f32 %v16412_v52, %v17945_v63  ;;  %v20299_v52 = vld [vmem:[#allocation86_spill] sm:$0xff] }
 0x59b   :  { %v18110_v15 = vpop.permute.xlu1 %6655 }
 0x59c   :  { %15638 = vmatmul.mubr.msk.f32.vlgmr.msra.gmra.mxu1 %vm1698_vm4, %v4478_v33  ;;  %v20300_v33 = vld [vmem:[#allocation87_spill] sm:$0xff] }
 0x59d   :  { %v16414_v13 = vpop.eup %16413  ;;  %15646 = vmatpush3.msra.mxu1 %v20294_v36  ;;  %15647 = vmatprep.mubr.msk.f32.mxu1 %vm16658_vm2, %v20214_v10 }
 0x59e   :  { %v4480_v0 = vmul.f32 %v16414_v13, %v17951_v45  ;;  %15655 = vmatprep.subr.mxu1 %v20214_v10  ;;  %v20296_v45 = vld [vmem:[#allocation82_spill] sm:$0xff]  ;;  %v6734_v13 = vpop.permute.xlu0 %6733 }
 0x59f   :  { %v6654_v63 = vpop.permute.xlu1 %6653 }
 0x5a0   :  { %15643 = vmatmul.mubr.msk.f32.vlgmr.msra.gmra.mxu0 %vm1698_vm4, %v4480_v0 }
 0x5a1   :  { %v16416_v49 = vpop.eup %16415  ;;  %15651 = vmatpush3.xpose.msk.msra.mxu0 %vm481_vm3, %v20295_v58  ;;  %15652 = vmatprep.mubr.msk.f32.mxu0 %vm16658_vm2, %v20214_v10 }
 0x5a2   :  { %15660 = vmatprep.subr.mxu0 %v20214_v10  ;;  %v4482_v38 = vmul.f32 %v16416_v49, %v17957_v55 }
 0x5a3   :  { %v6812_v55 = vpop.permute.xlu1 %6811 }
 0x5a4   :  { %15648 = vmatmul.mubr.msk.f32.vlgmr.msra.gmra.mxu1 %vm1698_vm4, %v4482_v38  ;;  %15653 = vmatmul.mubr.msk.f32.vlgmr.msra.gmra.mxu0 %vm481_vm3, %v20296_v45 }
 0x5a5   :  { %15656 = vmatpush3.xpose.msk.msra.mxu1 %vm481_vm3, %v20297_v42  ;;  %15661 = vmatpush3.xpose.msk.msra.mxu0 %vm481_vm3, %v20298_v48 }
 0x5a6   :  { %15657 = vmatprep.mubr.msk.f32.mxu1 %vm16658_vm2, %v20214_v10  ;;  %15662 = vmatprep.mubr.msk.f32.mxu0 %vm16658_vm2, %v20214_v10 }
 0x5a7   :  { %15665 = vmatprep.subr.mxu1 %v20214_v10  ;;  %15670 = vmatprep.subr.mxu0 %v20214_v10 }
 0x5a8   :  { %15658 = vmatmul.mubr.msk.f32.vlgmr.msra.gmra.mxu1 %vm481_vm3, %v20299_v52  ;;  %15663 = vmatmul.mubr.msk.f32.vlgmr.msra.gmra.mxu0 %vm481_vm3, %v17932_v18  ;;  %v6810_v18 = vpop.permute.xlu1 %6809 }
 0x5a9   :  { %15666 = vmatpush3.xpose.msk.msra.mxu1 %vm481_vm3, %v20300_v33  ;;  %15671 = vmatpush3.xpose.msk.msra.mxu0 %vm481_vm3, %v17937_v11 }
 0x5aa   :  { %15667 = vmatprep.mubr.msk.f32.mxu1 %vm16658_vm2, %v20214_v10  ;;  %15672 = vmatprep.mubr.msk.f32.mxu0 %vm16658_vm2, %v20214_v10 }
 0x5ab   :  { %15675 = vmatprep.subr.mxu1 %v20214_v10  ;;  %15680 = vmatprep.subr.mxu0 %v20214_v10 }
 0x5ac   :  { %15668 = vmatmul.mubr.msk.f32.vlgmr.msra.gmra.mxu1 %vm481_vm3, %v17916_v7  ;;  %15673 = vmatmul.mubr.msk.f32.vlgmr.msra.gmra.mxu0 %vm481_vm3, %v17943_v2  ;;  %v6732_v7 = vpop.permute.xlu0 %6731 }
 0x5ad   :  { %15676 = vmatpush3.xpose.msk.msra.mxu1 %vm481_vm3, %v17922_v29  ;;  %15681 = vmatpush3.xpose.msk.msra.mxu0 %vm481_vm3, %v6266_v20  ;;  %v6968_v29 = vpop.permute.xlu1 %6967 }
 0x5ae   :  { %15677 = vmatprep.mubr.msk.f32.mxu1 %vm16658_vm2, %v20214_v10  ;;  %15682 = vmatprep.mubr.msk.f32.mxu0 %vm16658_vm2, %v20214_v10 }
 0x5af   :  { %15685 = vmatprep.subr.mxu1 %v20214_v10  ;;  %15690 = vmatprep.subr.mxu0 %v20214_v10 }
 0x5b0   :  { %15678 = vmatmul.mubr.msk.f32.vlgmr.msra.gmra.mxu1 %vm481_vm3, %v17928_v17  ;;  %15683 = vmatmul.mubr.msk.f32.vlgmr.msra.gmra.mxu0 %vm481_vm3, %v6264_v51  ;;  %v6890_v17 = vpop.permute.xlu0 %6889 }
 0x5b1   :  { %15686 = vmatpush3.xpose.msk.msra.mxu1 %vm481_vm3, %v6344_v35  ;;  %15691 = vmatpush3.xpose.msk.msra.mxu0 %vm481_vm3, %v6422_v62  ;;  %v6966_v11 = vpop.permute.xlu1 %6965 }
 0x5b2   :  { %15687 = vmatprep.mubr.msk.f32.mxu1 %vm16658_vm2, %v20214_v10  ;;  %15692 = vmatprep.mubr.msk.f32.mxu0 %vm16658_vm2, %v20214_v10 }
 0x5b3   :  { %15695 = vmatprep.subr.mxu1 %v20214_v10  ;;  %15700 = vmatprep.subr.mxu0 %v20214_v10 }
 0x5b4   :  { %15688 = vmatmul.mubr.msk.f32.vlgmr.msra.gmra.mxu1 %vm481_vm3, %v18103_v5  ;;  %15693 = vmatmul.mubr.msk.f32.vlgmr.msra.gmra.mxu0 %vm481_vm3, %v6420_v39  ;;  %v6888_v2 = vpop.permute.xlu0 %6887 }
 0x5b5   :  { %15696 = vmatpush3.xpose.msk.msra.mxu1 %vm481_vm3, %v18105_v59  ;;  %15701 = vmatpush3.xpose.msk.msra.mxu0 %vm481_vm3, %v6578_v31  ;;  %v7220_v35 = vpop.permute.xlu1 %7219 }
 0x5b6   :  { %15697 = vmatprep.mubr.msk.f32.mxu1 %vm16658_vm2, %v20214_v10  ;;  %15702 = vmatprep.mubr.msk.f32.mxu0 %vm16658_vm2, %v20214_v10 }
 0x5b7   :  { %15705 = vmatprep.subr.mxu1 %v20214_v10  ;;  %15710 = vmatprep.subr.mxu0 %v20214_v10 }
 0x5b8   :  { %15698 = vmatmul.mubr.msk.f32.vlgmr.msra.gmra.mxu1 %vm481_vm3, %v18107_v28  ;;  %15703 = vmatmul.mubr.msk.f32.vlgmr.msra.gmra.mxu0 %vm481_vm3, %v6576_v50  ;;  %v7296_v5 = vpop.permute.xlu0 %7295 }
 0x5b9   :  { %15706 = vmatpush3.xpose.msk.msra.mxu1 %vm481_vm3, %v18110_v15  ;;  %15711 = vmatpush3.xpose.msk.msra.mxu0 %vm481_vm3, %v6734_v13 }
 0x5ba   :  { %15707 = vmatprep.mubr.msk.f32.mxu1 %vm16658_vm2, %v20214_v10  ;;  %15712 = vmatprep.mubr.msk.f32.mxu0 %vm16658_vm2, %v20214_v10 }
 0x5bb   :  { %15715 = vmatprep.subr.mxu1 %v20214_v10  ;;  %15720 = vmatprep.subr.mxu0 %v20214_v10 }
 0x5bc   :  { %15708 = vmatmul.mubr.msk.f32.vlgmr.msra.gmra.mxu1 %vm481_vm3, %v6654_v63  ;;  %15713 = vmatmul.mubr.msk.f32.vlgmr.msra.gmra.mxu0 %vm481_vm3, %v6732_v7 }
 0x5bd   :  { %15716 = vmatpush3.xpose.msk.msra.mxu1 %vm481_vm3, %v6812_v55  ;;  %15721 = vmatpush3.xpose.msk.msra.mxu0 %vm481_vm3, %v6890_v17 }
 0x5be   :  { %15717 = vmatprep.mubr.msk.f32.mxu1 %vm16658_vm2, %v20214_v10  ;;  %15722 = vmatprep.mubr.msk.f32.mxu0 %vm16658_vm2, %v20214_v10 }
 0x5bf   :  { %15725 = vmatprep.subr.mxu1 %v20214_v10  ;;  %15730 = vmatprep.subr.mxu0 %v20214_v10 }
 0x5c0   :  { %15718 = vmatmul.mubr.msk.f32.vlgmr.msra.gmra.mxu1 %vm481_vm3, %v6810_v18  ;;  %15723 = vmatmul.mubr.msk.f32.vlgmr.msra.gmra.mxu0 %vm481_vm3, %v6888_v2 }
 0x5c1   :  { %15726 = vmatpush3.xpose.msk.msra.mxu1 %vm481_vm3, %v6968_v29  ;;  %15731 = vmatpush3.msra.mxu0 %v7220_v35 }
 0x5c2   :  { %15727 = vmatprep.mubr.msk.f32.mxu1 %vm16658_vm2, %v20214_v10  ;;  %15735 = vmatprep.subr.mxu1 %v20214_v10 }
 0x5c3   :  { %15732 = vmatprep.mubr.msk.f32.mxu0 %vm16658_vm2, %v20214_v10  ;;  %15740 = vmatprep.subr.mxu0 %v20214_v10 }
 0x5c4   :  { %15728 = vmatmul.mubr.msk.f32.vlgmr.msra.gmra.mxu1 %vm481_vm3, %v6966_v11 }
 0x5c5   :  { %15736 = vmatpush3.msra.mxu1 %v7296_v5  ;;  %15737 = vmatprep.mubr.msk.f32.mxu1 %vm16658_vm2, %v20214_v10 }
 0x5c6   :  { %15745 = vmatprep.subr.mxu1 %v20214_v10 }
 0x5d0   :  { %v18223_v59 = vpop.f32.mrf.mxu0 }
 0x5d1   :  { %20301 = vst [vmem:[#allocation32_spill] sm:$0xff] %v18223_v59 }
 0x5d2   :  { %v15574_v20 = vpop.f32.mrf.mxu0 }
 0x5d4   :  { %v18225_v51 = vpop.f32.mrf.mxu0 }
 0x5d5   :  { %20302 = vst [vmem:[#allocation29_spill] sm:$0xff] %v18225_v51 }
 0x5d6   :  { %v15584_v62 = vpop.f32.mrf.mxu0 }
 0x60a   :  { %v18227_v28 = vpop.f32.mrf.mxu1 }
 0x60b   :  { %20303 = vst [vmem:[#allocation12_spill] sm:$0xff] %v18227_v28 }
 0x60c   :  { %v15579_v39 = vpop.f32.mrf.mxu1 }
 0x60e   :  { %v18229_v15 = vpop.f32.mrf.mxu1 }
 0x60f   :  { %20304 = vst [vmem:[#allocation14_spill] sm:$0xff] %v18229_v15 }
 0x610   :  { %v15589_v36 = vpop.f32.mrf.mxu1 }
 0x612   :  { %v18231_v0 = vpop.f32.mrf.mxu0 }
 0x613   :  { %20305 = vst [vmem:[#allocation18_spill] sm:$0xff] %v18231_v0 }
 0x614   :  { %v18233_v31 = vpop.f32.mrf.mxu1  ;;  %v15594_v49 = vpop.f32.mrf.mxu0 }
 0x615   :  { %20306 = vst [vmem:[#allocation9_spill] sm:$0xff] %v18233_v31 }
 0x616   :  { %v15599_v58 = vpop.f32.mrf.mxu1 }
 0x617   :  { %v18235_v63 = vpop.f32.mrf.mxu0 }
 0x618   :  { %20307 = vst [vmem:[#allocation20_spill] sm:$0xff] %v18235_v63  ;;  %v18237_v38 = vpop.f32.mrf.mxu1 }
 0x619   :  { %20308 = vst [vmem:[#allocation10_spill] sm:$0xff] %v18237_v38  ;;  %v15604_v45 = vpop.f32.mrf.mxu0 }
 0x61a   :  { %v15609_v42 = vpop.f32.mrf.mxu1 }
 0x61b   :  { %v18239_v48 = vpop.f32.mrf.mxu0 }
 0x61c   :  { %20309 = vst [vmem:[#allocation15_spill] sm:$0xff] %v18239_v48  ;;  %v18241_v50 = vpop.f32.mrf.mxu1 }
 0x61d   :  { %20310 = vst [vmem:[#allocation69_spill] sm:$0xff] %v18241_v50  ;;  %v15614_v55 = vpop.f32.mrf.mxu0  ;;  %v18351_v50 = vpop.permute.xlu1 %7903 }
 0x61e   :  { %v15619_v52 = vpop.f32.mrf.mxu1 }
 0x61f   :  { %v18243_v33 = vpop.f32.mrf.mxu0 }
 0x620   :  { %20311 = vst [vmem:[#allocation17_spill] sm:$0xff] %v18243_v33  ;;  %v18245_v13 = vpop.f32.mrf.mxu1 }
 0x621   :  { %20312 = vst [vmem:[#allocation71_spill] sm:$0xff] %v18245_v13  ;;  %v15624_v18 = vpop.f32.mrf.mxu0  ;;  %v18355_v38 = vpop.permute.xlu1 %8283 }
 0x622   :  { %v15629_v7 = vpop.f32.mrf.mxu1 }
 0x623   :  { %v18247_v29 = vpop.f32.mrf.mxu0 }
 0x624   :  { %20313 = vst [vmem:[#allocation72_spill] sm:$0xff] %v18247_v29 }
 0x625   :  { %v15634_v17 = vpop.f32.mrf.mxu0 }
 0x65c   :  { %v18249_v11 = vpop.f32.mrf.mxu1 }
 0x65d   :  { %20314 = vst [vmem:[#allocation21_spill] sm:$0xff] %v18249_v11 }
 0x65e   :  { %v15639_v2 = vpop.f32.mrf.mxu1 }
 0x660   :  { %v18251_v35 = vpop.f32.mrf.mxu0 }
 0x661   :  { %20315 = vst [vmem:[#allocation73_spill] sm:$0xff] %v18251_v35 }
 0x662   :  { %v15644_v5 = vpop.f32.mrf.mxu0 }
 0x664   :  { %v18253_v20 = vpop.f32.mrf.mxu1  ;;  %v18255_v62 = vpop.f32.mrf.mxu0 }
 0x665   :  { %20316 = vst [vmem:[#allocation74_spill] sm:$0xff] %v18253_v20  ;;  %v7043_v39 = vsel %vm1698_vm4, %v18255_v62, -inf }
 0x666   :  { %7044 = vmax.xlane.f32.xlu0 %v7043_v39  ;;  %v15649_v36 = vpop.f32.mrf.mxu1  ;;  %v15654_v49 = vpop.f32.mrf.mxu0 }
 0x668   :  { %v18259_v58 = vpop.f32.mrf.mxu1  ;;  %v18261_v45 = vpop.f32.mrf.mxu0 }
 0x669   :  { %v7049_v42 = vsel %vm1698_vm4, %v18261_v45, -inf  ;;  %v7046_v55 = vsel %vm1698_vm4, %v18259_v58, -inf }
 0x66a   :  { %7050 = vmax.xlane.f32.xlu0 %v7049_v42  ;;  %v15664_v52 = vpop.f32.mrf.mxu0  ;;  %7047 = vmax.xlane.f32.xlu1 %v7046_v55  ;;  %v15659_v18 = vpop.f32.mrf.mxu1 }
 0x66c   :  { %v18267_v7 = vpop.f32.mrf.mxu1  ;;  %v18269_v17 = vpop.f32.mrf.mxu0 }
 0x66d   :  { %v7055_v2 = vsel %vm1698_vm4, %v18269_v17, -inf  ;;  %v7052_v5 = vsel %vm1698_vm4, %v18267_v7, -inf }
 0x66e   :  { %v15674_v39 = vpop.f32.mrf.mxu0  ;;  %7056 = vmax.xlane.f32.xlu1 %v7055_v2  ;;  %7053 = vmax.xlane.f32.xlu0 %v7052_v5  ;;  %v15669_v36 = vpop.f32.mrf.mxu1 }
 0x670   :  { %v18275_v49 = vpop.f32.mrf.mxu1  ;;  %v18277_v42 = vpop.f32.mrf.mxu0 }
 0x671   :  { %v7061_v55 = vsel %vm1698_vm4, %v18277_v42, -inf  ;;  %v7058_v52 = vsel %vm1698_vm4, %v18275_v49, -inf }
 0x672   :  { %v15684_v18 = vpop.f32.mrf.mxu0  ;;  %7062 = vmax.xlane.f32.xlu1 %v7061_v55  ;;  %7059 = vmax.xlane.f32.xlu0 %v7058_v52  ;;  %v15679_v35 = vpop.f32.mrf.mxu1 }
 0x674   :  { %v18283_v29 = vpop.f32.mrf.mxu1  ;;  %v18285_v39 = vpop.f32.mrf.mxu0 }
 0x675   :  { %v7067_v2 = vsel %vm1698_vm4, %v18285_v39, -inf  ;;  %v7064_v5 = vsel %vm1698_vm4, %v18283_v29, -inf }
 0x676   :  { %v15694_v36 = vpop.f32.mrf.mxu0  ;;  %7068 = vmax.xlane.f32.xlu1 %v7067_v2  ;;  %7065 = vmax.xlane.f32.xlu0 %v7064_v5  ;;  %v15689_v33 = vpop.f32.mrf.mxu1 }
 0x678   :  { %v18291_v48 = vpop.f32.mrf.mxu1  ;;  %v18293_v18 = vpop.f32.mrf.mxu0 }
 0x679   :  { %v7073_v35 = vsel %vm1698_vm4, %v18293_v18, -inf  ;;  %v7070_v55 = vsel %vm1698_vm4, %v18291_v48, -inf }
 0x67a   :  { %v15704_v52 = vpop.f32.mrf.mxu0  ;;  %7074 = vmax.xlane.f32.xlu1 %v7073_v35  ;;  %7071 = vmax.xlane.f32.xlu0 %v7070_v55  ;;  %v15699_v63 = vpop.f32.mrf.mxu1 }
 0x67c   :  { %v18299_v0 = vpop.f32.mrf.mxu1  ;;  %v18301_v36 = vpop.f32.mrf.mxu0 }
 0x67d   :  { %v7079_v33 = vsel %vm1698_vm4, %v18301_v36, -inf  ;;  %v7076_v2 = vsel %vm1698_vm4, %v18299_v0, -inf }
 0x67e   :  { %v15714_v5 = vpop.f32.mrf.mxu0  ;;  %7080 = vmax.xlane.f32.xlu1 %v7079_v33  ;;  %7077 = vmax.xlane.f32.xlu0 %v7076_v2  ;;  %v15709_v51 = vpop.f32.mrf.mxu1 }
 0x67f   :  { %v18319_v2 = vpop.permute.xlu0 %7371  ;;  %v20317_v5 = vld [vmem:[#allocation24_spill] sm:$0xff] }
 0x680   :  { %v18307_v59 = vpop.f32.mrf.mxu1  ;;  %v18309_v52 = vpop.f32.mrf.mxu0 }
 0x681   :  { %v7085_v63 = vsel %vm1698_vm4, %v18309_v52, -inf  ;;  %v7082_v35 = vsel %vm1698_vm4, %v18307_v59, -inf }
 0x682   :  { %v15724_v55 = vpop.f32.mrf.mxu0  ;;  %7086 = vmax.xlane.f32.xlu1 %v7085_v63  ;;  %7083 = vmax.xlane.f32.xlu0 %v7082_v35  ;;  %v15719_v20 = vpop.f32.mrf.mxu1  ;;  %v20319_v35 = vld [vmem:[#allocation28_spill] sm:$0xff] }
 0x683   :  { %v18323_v13 = vpop.permute.xlu0 %7447  ;;  %v20318_v20 = vld [vmem:[#allocation25_spill] sm:$0xff] }
 0x684   :  { %v18315_v11 = vpop.f32.mrf.mxu1 }
 0x685   :  { %v7088_v33 = vsel %vm1698_vm4, %v18315_v11, -inf }
 0x686   :  { %7089 = vmax.xlane.f32.xlu0 %v7088_v33  ;;  %v15729_v51 = vpop.f32.mrf.mxu1 }
 0x687   :  { %v18331_v63 = vpop.permute.xlu0 %7523 }
 0x68b   :  { %v18335_v55 = vpop.permute.xlu0 %7599 }
 0x68f   :  { %v18339_v33 = vpop.permute.xlu0 %7675 }
 0x693   :  { %8827 = vrot.lane.b32.xlu1 %v20317_v5, %s16661_s25  ;;  %v18341_v51 = vpop.permute.xlu0 %7751 }
 0x697   :  { %8985 = vrot.lane.b32.xlu1 %v20270_v9, %s16661_s25  ;;  %v18343_v9 = vpop.permute.xlu0 %7827 }
 0x69b   :  { %8983 = vrot.lane.b32.xlu1 %v17025_v27, %s16661_s25  ;;  %v18345_v27 = vpop.permute.xlu0 %7979 }
 0x69c   :  { %8907 = vrot.lane.b32.xlu0 %v20318_v20, %s16661_s25 }
 0x69f   :  { %v18347_v5 = vpop.permute.xlu0 %8055 }
 0x6a0   :  { %8905 = vrot.lane.b32.xlu0 %v20319_v35, %s16661_s25 }
 0x6a3   :  { %v18349_v20 = vpop.permute.xlu0 %8131 }
 0x6a4   :  { %9063 = vrot.lane.b32.xlu0 %v20269_v21, %s16661_s25  ;;  %v18359_v21 = vpop.permute.xlu1 %8517 }
 0x6a7   :  { %v18353_v35 = vpop.permute.xlu0 %8207 }
 0x6a8   :  { %v18363_v28 = vpop.permute.xlu1 %8515 }
 0x6ab   :  { %v18357_v31 = vpop.permute.xlu0 %8359 }
 0x6ac   :  { %v18367_v56 = vpop.permute.xlu1 %8673 }
 0x6ad   :  { %20322 = vst [vmem:[#allocation84_spill] sm:$0xff] %v18367_v56 }
 0x6af   :  { %v18361_v15 = vpop.permute.xlu0 %8595 }
 0x6b0   :  { %20320 = vst [vmem:[#allocation75_spill] sm:$0xff] %v18361_v15  ;;  %v18371_v19 = vpop.permute.xlu1 %8671 }
 0x6b1   :  { %20324 = vst [vmem:[#allocation78_spill] sm:$0xff] %v18371_v19 }
 0x6b3   :  { %v18365_v22 = vpop.permute.xlu0 %8593 }
 0x6b4   :  { %20321 = vst [vmem:[#allocation76_spill] sm:$0xff] %v18365_v22  ;;  %v18375_v24 = vpop.permute.xlu1 %8829 }
 0x6b5   :  { %20326 = vst [vmem:[#allocation80_spill] sm:$0xff] %v18375_v24 }
 0x6b7   :  { %v18369_v61 = vpop.permute.xlu0 %8751 }
 0x6b8   :  { %20323 = vst [vmem:[#allocation77_spill] sm:$0xff] %v18369_v61 }
 0x6bb   :  { %v18373_v57 = vpop.permute.xlu0 %8749 }
 0x6bc   :  { %20325 = vst [vmem:[#allocation79_spill] sm:$0xff] %v18373_v57 }
 0x6ef   :  { %v7045_v12 = vpop.xlane.xlu0 %7044 }
 0x6f0   :  { %v7091_v16 = vsub.f32 %v18255_v62, %v7045_v12 }
 0x6f2   :  { %v7107_v3 = vmul.f32 1.442695, %v7091_v16 }
 0x6f3   :  { %v7051_v4 = vpop.xlane.xlu0 %7050  ;;  %v7048_v8 = vpop.xlane.xlu1 %7047 }
 0x6f4   :  { %16417 = vpow2.f32 %v7107_v3  ;;  %v7093_v34 = vsub.f32 %v18261_v45, %v7051_v4  ;;  %v7092_v54 = vsub.f32 %v18259_v58, %v7048_v8 }
 0x6f6   :  { %v7111_v22 = vmul.f32 1.442695, %v7093_v34  ;;  %v7109_v15 = vmul.f32 1.442695, %v7092_v54 }
 0x6f7   :  { %v7057_v61 = vpop.xlane.xlu1 %7056  ;;  %v7054_v56 = vpop.xlane.xlu0 %7053 }
 0x6f8   :  { %16419 = vpow2.f32 %v7111_v22  ;;  %v7095_v57 = vsub.f32 %v18269_v17, %v7057_v61  ;;  %v7094_v24 = vsub.f32 %v18267_v7, %v7054_v56 }
 0x6f9   :  { %16421 = vpow2.f32 %v7109_v15 }
 0x6fa   :  { %v7115_v19 = vmul.f32 1.442695, %v7095_v57  ;;  %v7113_v12 = vmul.f32 1.442695, %v7094_v24 }
 0x6fb   :  { %v7063_v16 = vpop.xlane.xlu1 %7062  ;;  %v7060_v62 = vpop.xlane.xlu0 %7059 }
 0x6fc   :  { %16423 = vpow2.f32 %v7115_v19  ;;  %v7097_v3 = vsub.f32 %v18277_v42, %v7063_v16  ;;  %v7096_v4 = vsub.f32 %v18275_v49, %v7060_v62 }
 0x6fd   :  { %16425 = vpow2.f32 %v7113_v12 }
 0x6fe   :  { %v7119_v8 = vmul.f32 1.442695, %v7097_v3  ;;  %v7117_v54 = vmul.f32 1.442695, %v7096_v4 }
 0x6ff   :  { %v7069_v34 = vpop.xlane.xlu1 %7068  ;;  %v7066_v58 = vpop.xlane.xlu0 %7065 }
 0x700   :  { %16427 = vpow2.f32 %v7119_v8  ;;  %v7099_v61 = vsub.f32 %v18285_v39, %v7069_v34  ;;  %v7098_v22 = vsub.f32 %v18283_v29, %v7066_v58 }
 0x701   :  { %v18386_v56 = vpop.eup %16417  ;;  %16429 = vpow2.f32 %v7117_v54 }
 0x702   :  { %v7123_v24 = vmul.f32 1.442695, %v7099_v61  ;;  %v7121_v57 = vmul.f32 1.442695, %v7098_v22  ;;  %v7139_v19 = vsel %vm1698_vm4, %v18386_v56, 0.0 }
 0x703   :  { %7140 = vadd.xlane.f32.xlu1 %v7139_v19  ;;  %v7075_v15 = vpop.xlane.xlu1 %7074  ;;  %v7072_v45 = vpop.xlane.xlu0 %7071 }
 0x704   :  { %16431 = vpow2.f32 %v7123_v24  ;;  %v7101_v7 = vsub.f32 %v18293_v18, %v7075_v15  ;;  %v7100_v17 = vsub.f32 %v18291_v48, %v7072_v45 }
 0x705   :  { %v18392_v49 = vpop.eup %16419  ;;  %16433 = vpow2.f32 %v7121_v57 }
 0x706   :  { %v18394_v29 = vpop.eup %16421  ;;  %v7127_v42 = vmul.f32 1.442695, %v7101_v7  ;;  %v7125_v39 = vmul.f32 1.442695, %v7100_v17  ;;  %v7145_v12 = vsel %vm1698_vm4, %v18392_v49, 0.0 }
 0x707   :  { %7146 = vadd.xlane.f32.xlu1 %v7145_v12  ;;  %v7081_v16 = vpop.xlane.xlu1 %7080  ;;  %v7078_v62 = vpop.xlane.xlu0 %7077  ;;  %v7142_v3 = vsel %vm1698_vm4, %v18394_v29, 0.0 }
 0x708   :  { %16435 = vpow2.f32 %v7127_v42  ;;  %v7103_v18 = vsub.f32 %v18301_v36, %v7081_v16  ;;  %v7102_v48 = vsub.f32 %v18299_v0, %v7078_v62  ;;  %7143 = vadd.xlane.f32.xlu0 %v7142_v3 }
 0x709   :  { %v18402_v4 = vpop.eup %16423  ;;  %16437 = vpow2.f32 %v7125_v39 }
 0x70a   :  { %v18404_v8 = vpop.eup %16425  ;;  %v7131_v54 = vmul.f32 1.442695, %v7103_v18  ;;  %v7129_v34 = vmul.f32 1.442695, %v7102_v48  ;;  %v7151_v58 = vsel %vm1698_vm4, %v18402_v4, 0.0 }
 0x70b   :  { %7152 = vadd.xlane.f32.xlu1 %v7151_v58  ;;  %v7087_v61 = vpop.xlane.xlu1 %7086  ;;  %v7084_v22 = vpop.xlane.xlu0 %7083  ;;  %v7148_v24 = vsel %vm1698_vm4, %v18404_v8, 0.0 }
 0x70c   :  { %16439 = vpow2.f32 %v7131_v54  ;;  %v7105_v0 = vsub.f32 %v18309_v52, %v7087_v61  ;;  %v7104_v36 = vsub.f32 %v18307_v59, %v7084_v22  ;;  %7149 = vadd.xlane.f32.xlu0 %v7148_v24 }
 0x70d   :  { %v18412_v57 = vpop.eup %16427  ;;  %16441 = vpow2.f32 %v7129_v34 }
 0x70e   :  { %v18414_v19 = vpop.eup %16429  ;;  %v7133_v15 = vmul.f32 1.442695, %v7104_v36  ;;  %v7157_v45 = vsel %vm1698_vm4, %v18412_v57, 0.0  ;;  %v7135_v7 = vmul.f32 1.442695, %v7105_v0 }
 0x70f   :  { %7158 = vadd.xlane.f32.xlu1 %v7157_v45  ;;  %v7154_v17 = vsel %vm1698_vm4, %v18414_v19, 0.0  ;;  %v7090_v0 = vpop.xlane.xlu0 %7089 }
 0x710   :  { %7155 = vadd.xlane.f32.xlu0 %v7154_v17  ;;  %16443 = vpow2.f32 %v7133_v15  ;;  %v7106_v36 = vsub.f32 %v18315_v11, %v7090_v0 }
 0x711   :  { %v18420_v42 = vpop.eup %16431  ;;  %16445 = vpow2.f32 %v7135_v7 }
 0x712   :  { %v18422_v59 = vpop.eup %16433  ;;  %v7163_v52 = vsel %vm1698_vm4, %v18420_v42, 0.0  ;;  %v7137_v15 = vmul.f32 1.442695, %v7106_v36 }
 0x713   :  { %7164 = vadd.xlane.f32.xlu1 %v7163_v52  ;;  %v7160_v39 = vsel %vm1698_vm4, %v18422_v59, 0.0 }
 0x714   :  { %7161 = vadd.xlane.f32.xlu0 %v7160_v39  ;;  %16447 = vpow2.f32 %v7137_v15 }
 0x715   :  { %v18428_v12 = vpop.eup %16435 }
 0x716   :  { %v18430_v16 = vpop.eup %16437  ;;  %v7169_v62 = vsel %vm1698_vm4, %v18428_v12, 0.0 }
 0x717   :  { %7170 = vadd.xlane.f32.xlu1 %v7169_v62  ;;  %v7166_v3 = vsel %vm1698_vm4, %v18430_v16, 0.0 }
 0x718   :  { %7167 = vadd.xlane.f32.xlu0 %v7166_v3 }
 0x719   :  { %v18436_v18 = vpop.eup %16439 }
 0x71a   :  { %v18438_v48 = vpop.eup %16441  ;;  %v7175_v54 = vsel %vm1698_vm4, %v18436_v18, 0.0 }
 0x71b   :  { %7176 = vadd.xlane.f32.xlu1 %v7175_v54  ;;  %v7172_v34 = vsel %vm1698_vm4, %v18438_v48, 0.0 }
 0x71c   :  { %7173 = vadd.xlane.f32.xlu0 %v7172_v34 }
 0x71d   :  { %v18444_v58 = vpop.eup %16443 }
 0x71e   :  { %v7178_v61 = vsel %vm1698_vm4, %v18444_v58, 0.0  ;;  %v18448_v22 = vpop.eup %16445 }
 0x71f   :  { %v7181_v24 = vsel %vm1698_vm4, %v18448_v22, 0.0 }
 0x720   :  { %7179 = vadd.xlane.f32.xlu0 %v7178_v61 }
 0x724   :  { %7182 = vadd.xlane.f32.xlu0 %v7181_v24 }
 0x72c   :  { %9141 = vrot.lane.b32.xlu1 %v17052_v53, %s16661_s25  ;;  %v18465_v53 = vpop.eup %16447 }
 0x73a   :  { %9061 = vrot.lane.b32.xlu0 %v17046_v46, %s16661_s25  ;;  %v7184_v46 = vsel %vm1698_vm4, %v18465_v53, 0.0 }
 0x73e   :  { %9219 = vrot.lane.b32.xlu0 %v17073_v14, %s16661_s25 }
 0x742   :  { %9217 = vrot.lane.b32.xlu0 %v17088_v30, %s16661_s25 }
 0x746   :  { %9375 = vrot.lane.b32.xlu0 %v17121_v60, %s16661_s25 }
 0x74a   :  { %9373 = vrot.lane.b32.xlu0 %v17144_v47, %s16661_s25 }
 0x74e   :  { %9531 = vrot.lane.b32.xlu0 %v17152_v23, %s16661_s25 }
 0x750   :  { %7185 = vadd.xlane.f32.xlu1 %v7184_v46 }
 0x752   :  { %9529 = vrot.lane.b32.xlu0 %v17179_v25, %s16661_s25  ;;  %v18491_v25 = vpop.permute.xlu1 %8827 }
 0x756   :  { %9687 = vrot.lane.b32.xlu0 %v17172_v44, %s16661_s25  ;;  %v18495_v14 = vpop.permute.xlu1 %8985 }
 0x75a   :  { %9685 = vrot.lane.b32.xlu0 %v17192_v32, %s16661_s25 }
 0x761   :  { %9139 = vrot.lane.b32.xlu1 %v17064_v1, %s16661_s25  ;;  %v18493_v1 = vpop.permute.xlu0 %8907 }
 0x765   :  { %9297 = vrot.lane.b32.xlu1 %v17094_v43, %s16661_s25  ;;  %v18497_v23 = vpop.permute.xlu0 %8905 }
 0x769   :  { %9295 = vrot.lane.b32.xlu1 %v17113_v6, %s16661_s25  ;;  %v18499_v6 = vpop.permute.xlu1 %8983  ;;  %v18501_v30 = vpop.permute.xlu0 %9063 }
 0x76d   :  { %9453 = vrot.lane.b32.xlu1 %v17118_v40, %s16661_s25 }
 0x771   :  { %9451 = vrot.lane.b32.xlu1 %v17147_v26, %s16661_s25 }
 0x775   :  { %9609 = vrot.lane.b32.xlu1 %v17135_v37, %s16661_s25 }
 0x779   :  { %9607 = vrot.lane.b32.xlu1 %v17160_v41, %s16661_s25 }
 0x78c   :  { %v7141_v40 = vpop.xlane.xlu1 %7140 }
 0x78d   :  { %16449 = vrcp.f32 %v7141_v40 }
 0x790   :  { %v7147_v43 = vpop.xlane.xlu1 %7146 }
 0x791   :  { %16451 = vrcp.f32 %v7147_v43  ;;  %v7144_v60 = vpop.xlane.xlu0 %7143  ;;  %v20330_v43 = vld [vmem:[#allocation75_spill] sm:$0xff] }
 0x792   :  { %16453 = vrcp.f32 %v7144_v60 }
 0x794   :  { %v7153_v37 = vpop.xlane.xlu1 %7152 }
 0x795   :  { %16455 = vrcp.f32 %v7153_v37  ;;  %v7150_v47 = vpop.xlane.xlu0 %7149  ;;  %v20331_v37 = vld [vmem:[#allocation76_spill] sm:$0xff] }
 0x796   :  { %16457 = vrcp.f32 %v7150_v47 }
 0x798   :  { %v7159_v26 = vpop.xlane.xlu1 %7158 }
 0x799   :  { %16459 = vrcp.f32 %v7159_v26  ;;  %v7156_v41 = vpop.xlane.xlu0 %7155 }
 0x79a   :  { %v16450_v44 = vpop.eup %16449  ;;  %16461 = vrcp.f32 %v7156_v41  ;;  %v20333_v41 = vld [vmem:[#allocation79_spill] sm:$0xff] }
 0x79b   :  { %v7188_v32 = vmul.f32 %v16450_v44, %v18386_v56 }
 0x79c   :  { %v7165_v11 = vpop.xlane.xlu1 %7164 }
 0x79d   :  { %16463 = vrcp.f32 %v7165_v11  ;;  %v7162_v45 = vpop.xlane.xlu0 %7161  ;;  %15733 = vmatmul.mubr.msk.f32.vlgmr.msra.gmra.mxu0 %vm1698_vm4, %v7188_v32 }
 0x79e   :  { %v16452_v7 = vpop.eup %16451  ;;  %16465 = vrcp.f32 %v7162_v45  ;;  %15741 = vmatpush3.msra.mxu0 %v18319_v2  ;;  %15742 = vmatprep.mubr.msk.f32.mxu0 %vm16658_vm2, %v20214_v10 }
 0x79f   :  { %v16454_v17 = vpop.eup %16453  ;;  %15750 = vmatprep.subr.mxu0 %v20214_v10  ;;  %v7192_v52 = vmul.f32 %v16452_v7, %v18392_v49 }
 0x7a0   :  { %v7190_v39 = vmul.f32 %v16454_v17, %v18394_v29  ;;  %v7171_v56 = vpop.xlane.xlu1 %7170 }
 0x7a1   :  { %16467 = vrcp.f32 %v7171_v56  ;;  %v7168_v62 = vpop.xlane.xlu0 %7167  ;;  %15743 = vmatmul.mubr.msk.f32.vlgmr.msra.gmra.mxu0 %vm1698_vm4, %v7192_v52 }
 0x7a2   :  { %v16456_v3 = vpop.eup %16455  ;;  %16469 = vrcp.f32 %v7168_v62  ;;  %15738 = vmatmul.mubr.msk.f32.vlgmr.msra.gmra.mxu1 %vm1698_vm4, %v7190_v39  ;;  %15751 = vmatpush3.msra.mxu0 %v18331_v63 }
 0x7a3   :  { %v16458_v2 = vpop.eup %16457  ;;  %15746 = vmatpush3.msra.mxu1 %v18323_v13  ;;  %15752 = vmatprep.mubr.msk.f32.mxu0 %vm16658_vm2, %v20214_v10  ;;  %v7196_v49 = vmul.f32 %v16456_v3, %v18402_v4 }
 0x7a4   :  { %v7194_v29 = vmul.f32 %v16458_v2, %v18404_v8  ;;  %15760 = vmatprep.subr.mxu0 %v20214_v10  ;;  %v7177_v54 = vpop.xlane.xlu1 %7176  ;;  %15747 = vmatprep.mubr.msk.f32.mxu1 %vm16658_vm2, %v20214_v10 }
 0x7a5   :  { %16471 = vrcp.f32 %v7177_v54  ;;  %15755 = vmatprep.subr.mxu1 %v20214_v10  ;;  %v7174_v63 = vpop.xlane.xlu0 %7173  ;;  %15753 = vmatmul.mubr.msk.f32.vlgmr.msra.gmra.mxu0 %vm1698_vm4, %v7196_v49 }
 0x7a6   :  { %v16460_v13 = vpop.eup %16459  ;;  %16473 = vrcp.f32 %v7174_v63  ;;  %15748 = vmatmul.mubr.msk.f32.vlgmr.msra.gmra.mxu1 %vm1698_vm4, %v7194_v29  ;;  %15761 = vmatpush3.msra.mxu0 %v18339_v33 }
 0x7a7   :  { %v16462_v4 = vpop.eup %16461  ;;  %15756 = vmatpush3.msra.mxu1 %v18335_v55  ;;  %15762 = vmatprep.mubr.msk.f32.mxu0 %vm16658_vm2, %v20214_v10  ;;  %v7200_v8 = vmul.f32 %v16460_v13, %v18412_v57 }
 0x7a8   :  { %v7198_v34 = vmul.f32 %v16462_v4, %v18414_v19  ;;  %15770 = vmatprep.subr.mxu0 %v20214_v10  ;;  %15757 = vmatprep.mubr.msk.f32.mxu1 %vm16658_vm2, %v20214_v10 }
 0x7a9   :  { %15765 = vmatprep.subr.mxu1 %v20214_v10  ;;  %v7180_v61 = vpop.xlane.xlu0 %7179  ;;  %15763 = vmatmul.mubr.msk.f32.vlgmr.msra.gmra.mxu0 %vm1698_vm4, %v7200_v8 }
 0x7aa   :  { %v16464_v33 = vpop.eup %16463  ;;  %16475 = vrcp.f32 %v7180_v61  ;;  %15758 = vmatmul.mubr.msk.f32.vlgmr.msra.gmra.mxu1 %vm1698_vm4, %v7198_v34  ;;  %15771 = vmatpush3.msra.mxu0 %v18343_v9 }
 0x7ab   :  { %v16466_v55 = vpop.eup %16465  ;;  %15766 = vmatpush3.msra.mxu1 %v18341_v51  ;;  %15767 = vmatprep.mubr.msk.f32.mxu1 %vm16658_vm2, %v20214_v10  ;;  %v7204_v57 = vmul.f32 %v16464_v33, %v18420_v42 }
 0x7ac   :  { %v7202_v19 = vmul.f32 %v16466_v55, %v18422_v59  ;;  %15772 = vmatprep.mubr.msk.f32.mxu0 %vm16658_vm2, %v20214_v10  ;;  %15775 = vmatprep.subr.mxu1 %v20214_v10 }
 0x7ad   :  { %15780 = vmatprep.subr.mxu0 %v20214_v10  ;;  %v7183_v24 = vpop.xlane.xlu0 %7182  ;;  %15773 = vmatmul.mubr.msk.f32.vlgmr.msra.gmra.mxu0 %vm1698_vm4, %v7204_v57 }
 0x7ae   :  { %v16468_v9 = vpop.eup %16467  ;;  %16477 = vrcp.f32 %v7183_v24  ;;  %15768 = vmatmul.mubr.msk.f32.vlgmr.msra.gmra.mxu1 %vm1698_vm4, %v7202_v19  ;;  %15781 = vmatpush3.msra.mxu0 %v18345_v27 }
 0x7af   :  { %v16470_v51 = vpop.eup %16469  ;;  %15776 = vmatpush3.msra.mxu1 %v18351_v50  ;;  %15777 = vmatprep.mubr.msk.f32.mxu1 %vm16658_vm2, %v20214_v10  ;;  %v7208_v42 = vmul.f32 %v16468_v9, %v18428_v12 }
 0x7b0   :  { %v7206_v59 = vmul.f32 %v16470_v51, %v18430_v16  ;;  %15782 = vmatprep.mubr.msk.f32.mxu0 %vm16658_vm2, %v20214_v10  ;;  %15785 = vmatprep.subr.mxu1 %v20214_v10 }
 0x7b1   :  { %15790 = vmatprep.subr.mxu0 %v20214_v10  ;;  %15783 = vmatmul.mubr.msk.f32.vlgmr.msra.gmra.mxu0 %vm1698_vm4, %v7208_v42 }
 0x7b2   :  { %v16472_v27 = vpop.eup %16471  ;;  %15778 = vmatmul.mubr.msk.f32.vlgmr.msra.gmra.mxu1 %vm1698_vm4, %v7206_v59  ;;  %15791 = vmatpush3.msra.mxu0 %v18349_v20 }
 0x7b3   :  { %v16474_v50 = vpop.eup %16473  ;;  %15786 = vmatpush3.msra.mxu1 %v18347_v5  ;;  %15787 = vmatprep.mubr.msk.f32.mxu1 %vm16658_vm2, %v20214_v10  ;;  %v7212_v12 = vmul.f32 %v16472_v27, %v18436_v18 }
 0x7b4   :  { %v7210_v16 = vmul.f32 %v16474_v50, %v18438_v48  ;;  %15792 = vmatprep.mubr.msk.f32.mxu0 %vm16658_vm2, %v20214_v10  ;;  %15795 = vmatprep.subr.mxu1 %v20214_v10  ;;  %v9062_v48 = vpop.permute.xlu0 %9061 }
 0x7b5   :  { %15800 = vmatprep.subr.mxu0 %v20214_v10  ;;  %15793 = vmatmul.mubr.msk.f32.vlgmr.msra.gmra.mxu0 %vm1698_vm4, %v7212_v12 }
 0x7b6   :  { %15788 = vmatmul.mubr.msk.f32.vlgmr.msra.gmra.mxu1 %vm1698_vm4, %v7210_v16  ;;  %15801 = vmatpush3.msra.mxu0 %v18355_v38 }
 0x7b7   :  { %v16476_v5 = vpop.eup %16475  ;;  %15796 = vmatpush3.msra.mxu1 %v18353_v35  ;;  %15797 = vmatprep.mubr.msk.f32.mxu1 %vm16658_vm2, %v20214_v10  ;;  %v20328_v35 = vld [vmem:[#allocation78_spill] sm:$0xff] }
 0x7b8   :  { %v7214_v20 = vmul.f32 %v16476_v5, %v18444_v58  ;;  %15805 = vmatprep.subr.mxu1 %v20214_v10  ;;  %15802 = vmatprep.mubr.msk.f32.mxu0 %vm16658_vm2, %v20214_v10  ;;  %v9220_v0 = vpop.permute.xlu0 %9219 }
 0x7b9   :  { %15810 = vmatprep.subr.mxu0 %v20214_v10 }
 0x7ba   :  { %15798 = vmatmul.mubr.msk.f32.vlgmr.msra.gmra.mxu1 %vm1698_vm4, %v7214_v20 }
 0x7bb   :  { %v16478_v18 = vpop.eup %16477  ;;  %15806 = vmatpush3.msra.mxu1 %v18357_v31  ;;  %15807 = vmatprep.mubr.msk.f32.mxu1 %vm16658_vm2, %v20214_v10  ;;  %v20327_v31 = vld [vmem:[#allocation84_spill] sm:$0xff] }
 0x7bc   :  { %v7216_v38 = vmul.f32 %v16478_v18, %v18448_v22  ;;  %15815 = vmatprep.subr.mxu1 %v20214_v10  ;;  %v9218_v15 = vpop.permute.xlu0 %9217 }
 0x7be   :  { %15803 = vmatmul.mubr.msk.f32.vlgmr.msra.gmra.mxu0 %vm1698_vm4, %v7216_v38 }
 0x7bf   :  { %15811 = vmatpush3.xpose.msk.msra.mxu0 %vm481_vm3, %v18359_v21  ;;  %15812 = vmatprep.mubr.msk.f32.mxu0 %vm16658_vm2, %v20214_v10  ;;  %v20329_v21 = vld [vmem:[#allocation80_spill] sm:$0xff] }
 0x7c0   :  { %15820 = vmatprep.subr.mxu0 %v20214_v10  ;;  %v9376_v40 = vpop.permute.xlu0 %9375 }
 0x7c2   :  { %15813 = vmatmul.mubr.msk.f32.vlgmr.msra.gmra.mxu0 %vm481_vm3, %v18363_v28  ;;  %v9142_v28 = vpop.permute.xlu1 %9141 }
 0x7c3   :  { %15821 = vmatpush3.xpose.msk.msra.mxu0 %vm481_vm3, %v20327_v31  ;;  %15822 = vmatprep.mubr.msk.f32.mxu0 %vm16658_vm2, %v20214_v10 }
 0x7c4   :  { %15830 = vmatprep.subr.mxu0 %v20214_v10  ;;  %v9374_v47 = vpop.permute.xlu0 %9373 }
 0x7c6   :  { %15823 = vmatmul.mubr.msk.f32.vlgmr.msra.gmra.mxu0 %vm481_vm3, %v20328_v35 }
 0x7c7   :  { %15831 = vmatpush3.xpose.msk.msra.mxu0 %vm481_vm3, %v20329_v21  ;;  %15832 = vmatprep.mubr.msk.f32.mxu0 %vm16658_vm2, %v20214_v10 }
 0x7c8   :  { %15840 = vmatprep.subr.mxu0 %v20214_v10  ;;  %v9532_v32 = vpop.permute.xlu0 %9531 }
 0x7ca   :  { %15833 = vmatmul.mubr.msk.f32.vlgmr.msra.gmra.mxu0 %vm481_vm3, %v18491_v25 }
 0x7cb   :  { %15841 = vmatpush3.xpose.msk.msra.mxu0 %vm481_vm3, %v18495_v14  ;;  %15842 = vmatprep.mubr.msk.f32.mxu0 %vm16658_vm2, %v20214_v10 }
 0x7cc   :  { %15850 = vmatprep.subr.mxu0 %v20214_v10 }
 0x7ce   :  { %15843 = vmatmul.mubr.msk.f32.vlgmr.msra.gmra.mxu0 %vm481_vm3, %v18499_v6 }
 0x7cf   :  { %15851 = vmatpush3.xpose.msk.msra.mxu0 %vm481_vm3, %v9142_v28  ;;  %15852 = vmatprep.mubr.msk.f32.mxu0 %vm16658_vm2, %v20214_v10 }
 0x7d0   :  { %15860 = vmatprep.subr.mxu0 %v20214_v10 }
 0x7d9   :  { %v7186_v58 = vpop.xlane.xlu1 %7185 }
 0x7da   :  { %16479 = vrcp.f32 %v7186_v58 }
 0x7dd   :  { %v9140_v22 = vpop.permute.xlu1 %9139 }
 0x7de   :  { %15853 = vmatmul.mubr.msk.f32.vlgmr.msra.gmra.mxu0 %vm481_vm3, %v9140_v22 }
 0x7df   :  { %15862 = vmatprep.mubr.msk.f32.mxu0 %vm16658_vm2, %v20214_v10 }
 0x7e1   :  { %v9298_v36 = vpop.permute.xlu1 %9297 }
 0x7e2   :  { %15861 = vmatpush3.xpose.msk.msra.mxu0 %vm481_vm3, %v9298_v36 }
 0x7e3   :  { %15870 = vmatprep.subr.mxu0 %v20214_v10 }
 0x7e5   :  { %v9296_v46 = vpop.permute.xlu1 %9295 }
 0x7e6   :  { %15863 = vmatmul.mubr.msk.f32.vlgmr.msra.gmra.mxu0 %vm481_vm3, %v9296_v46 }
 0x7e7   :  { %v16480_v25 = vpop.eup %16479  ;;  %15872 = vmatprep.mubr.msk.f32.mxu0 %vm16658_vm2, %v20214_v10 }
 0x7e8   :  { %v7218_v14 = vmul.f32 %v16480_v25, %v18465_v53  ;;  %v20332_v53 = vld [vmem:[#allocation77_spill] sm:$0xff] }
 0x7e9   :  { %v9454_v6 = vpop.permute.xlu1 %9453 }
 0x7ea   :  { %15808 = vmatmul.mubr.msk.f32.vlgmr.msra.gmra.mxu1 %vm1698_vm4, %v7218_v14  ;;  %15871 = vmatpush3.xpose.msk.msra.mxu0 %vm481_vm3, %v9454_v6 }
 0x7eb   :  { %15816 = vmatpush3.xpose.msk.msra.mxu1 %vm481_vm3, %v20330_v43  ;;  %15817 = vmatprep.mubr.msk.f32.mxu1 %vm16658_vm2, %v20214_v10 }
 0x7ec   :  { %15825 = vmatprep.subr.mxu1 %v20214_v10  ;;  %15880 = vmatprep.subr.mxu0 %v20214_v10 }
 0x7ed   :  { %v9452_v60 = vpop.permute.xlu1 %9451 }
 0x7ee   :  { %15818 = vmatmul.mubr.msk.f32.vlgmr.msra.gmra.mxu1 %vm481_vm3, %v20331_v37  ;;  %15873 = vmatmul.mubr.msk.f32.vlgmr.msra.gmra.mxu0 %vm481_vm3, %v9452_v60 }
 0x7ef   :  { %15826 = vmatpush3.xpose.msk.msra.mxu1 %vm481_vm3, %v20332_v53  ;;  %15827 = vmatprep.mubr.msk.f32.mxu1 %vm16658_vm2, %v20214_v10 }
 0x7f0   :  { %15835 = vmatprep.subr.mxu1 %v20214_v10  ;;  %15882 = vmatprep.mubr.msk.f32.mxu0 %vm16658_vm2, %v20214_v10 }
 0x7f1   :  { %v9610_v26 = vpop.permute.xlu1 %9609 }
 0x7f2   :  { %15828 = vmatmul.mubr.msk.f32.vlgmr.msra.gmra.mxu1 %vm481_vm3, %v20333_v41  ;;  %15881 = vmatpush3.xpose.msk.msra.mxu0 %vm481_vm3, %v9610_v26 }
 0x7f3   :  { %15836 = vmatpush3.xpose.msk.msra.mxu1 %vm481_vm3, %v18493_v1  ;;  %15837 = vmatprep.mubr.msk.f32.mxu1 %vm16658_vm2, %v20214_v10  ;;  %v9530_v1 = vpop.permute.xlu0 %9529 }
 0x7f4   :  { %15845 = vmatprep.subr.mxu1 %v20214_v10  ;;  %15890 = vmatprep.subr.mxu0 %v20214_v10 }
 0x7f5   :  { %v9608_v44 = vpop.permute.xlu1 %9607 }
 0x7f6   :  { %15838 = vmatmul.mubr.msk.f32.vlgmr.msra.gmra.mxu1 %vm481_vm3, %v18497_v23  ;;  %15883 = vmatmul.mubr.msk.f32.vlgmr.msra.gmra.mxu0 %vm481_vm3, %v9608_v44 }
 0x7f7   :  { %15846 = vmatpush3.xpose.msk.msra.mxu1 %vm481_vm3, %v18501_v30  ;;  %15847 = vmatprep.mubr.msk.f32.mxu1 %vm16658_vm2, %v20214_v10  ;;  %v9688_v23 = vpop.permute.xlu0 %9687 }
 0x7f8   :  { %15855 = vmatprep.subr.mxu1 %v20214_v10  ;;  %15892 = vmatprep.mubr.msk.f32.mxu0 %vm16658_vm2, %v20214_v10 }
 0x7fa   :  { %15848 = vmatmul.mubr.msk.f32.vlgmr.msra.gmra.mxu1 %vm481_vm3, %v9062_v48 }
 0x7fb   :  { %15856 = vmatpush3.xpose.msk.msra.mxu1 %vm481_vm3, %v9220_v0  ;;  %15857 = vmatprep.mubr.msk.f32.mxu1 %vm16658_vm2, %v20214_v10  ;;  %v9686_v30 = vpop.permute.xlu0 %9685 }
 0x7fc   :  { %15865 = vmatprep.subr.mxu1 %v20214_v10 }
 0x7fe   :  { %15858 = vmatmul.mubr.msk.f32.vlgmr.msra.gmra.mxu1 %vm481_vm3, %v9218_v15 }
 0x7ff   :  { %15866 = vmatpush3.xpose.msk.msra.mxu1 %vm481_vm3, %v9376_v40  ;;  %15867 = vmatprep.mubr.msk.f32.mxu1 %vm16658_vm2, %v20214_v10 }
 0x800   :  { %15875 = vmatprep.subr.mxu1 %v20214_v10 }
 0x802   :  { %15868 = vmatmul.mubr.msk.f32.vlgmr.msra.gmra.mxu1 %vm481_vm3, %v9374_v47 }
 0x803   :  { %15876 = vmatpush3.xpose.msk.msra.mxu1 %vm481_vm3, %v9532_v32  ;;  %15877 = vmatprep.mubr.msk.f32.mxu1 %vm16658_vm2, %v20214_v10 }
 0x804   :  { %15885 = vmatprep.subr.mxu1 %v20214_v10 }
 0x806   :  { %15878 = vmatmul.mubr.msk.f32.vlgmr.msra.gmra.mxu1 %vm481_vm3, %v9530_v1 }
 0x807   :  { %15886 = vmatpush3.xpose.msk.msra.mxu1 %vm481_vm3, %v9688_v23  ;;  %15887 = vmatprep.mubr.msk.f32.mxu1 %vm16658_vm2, %v20214_v10 }
 0x808   :  { %15895 = vmatprep.subr.mxu1 %v20214_v10 }
 0x80a   :  { %15888 = vmatmul.mubr.msk.f32.vlgmr.msra.gmra.mxu1 %vm481_vm3, %v9686_v30 }
 0x80b   :  { %15897 = vmatprep.mubr.msk.f32.mxu1 %vm16658_vm2, %v20214_v10 }
 0x85d   :  { %v18690_v11 = vpop.f32.mrf.mxu0 }
 0x85f   :  { %v15734_v45 = vpop.f32.mrf.mxu0 }
 0x861   :  { %v18692_v7 = vpop.f32.mrf.mxu0 }
 0x862   :  { %v18694_v17 = vpop.f32.mrf.mxu1 }
 0x863   :  { %v15744_v52 = vpop.f32.mrf.mxu0 }
 0x864   :  { %v15739_v39 = vpop.f32.mrf.mxu1 }
 0x865   :  { %v18696_v56 = vpop.f32.mrf.mxu0 }
 0x866   :  { %v18698_v62 = vpop.f32.mrf.mxu1 }
 0x867   :  { %v15754_v3 = vpop.f32.mrf.mxu0 }
 0x868   :  { %v15749_v2 = vpop.f32.mrf.mxu1 }
 0x869   :  { %v18700_v49 = vpop.f32.mrf.mxu0 }
 0x86a   :  { %v18702_v29 = vpop.f32.mrf.mxu1 }
 0x86b   :  { %v15764_v54 = vpop.f32.mrf.mxu0 }
 0x86c   :  { %v15759_v63 = vpop.f32.mrf.mxu1 }
 0x86d   :  { %v18704_v13 = vpop.f32.mrf.mxu0 }
 0x86e   :  { %v18706_v4 = vpop.f32.mrf.mxu1 }
 0x86f   :  { %v15774_v8 = vpop.f32.mrf.mxu0 }
 0x870   :  { %v15769_v34 = vpop.f32.mrf.mxu1 }
 0x871   :  { %v18708_v61 = vpop.f32.mrf.mxu0 }
 0x872   :  { %v18710_v33 = vpop.f32.mrf.mxu1 }
 0x873   :  { %v15784_v55 = vpop.f32.mrf.mxu0 }
 0x874   :  { %v15779_v57 = vpop.f32.mrf.mxu1 }
 0x875   :  { %v18712_v19 = vpop.f32.mrf.mxu0 }
 0x876   :  { %v18714_v24 = vpop.f32.mrf.mxu1 }
 0x877   :  { %v15794_v9 = vpop.f32.mrf.mxu0 }
 0x878   :  { %v15789_v51 = vpop.f32.mrf.mxu1 }
 0x87a   :  { %v18716_v42 = vpop.f32.mrf.mxu1 }
 0x87c   :  { %v15799_v59 = vpop.f32.mrf.mxu1 }
 0x87e   :  { %v18718_v27 = vpop.f32.mrf.mxu0 }
 0x880   :  { %v15804_v50 = vpop.f32.mrf.mxu0 }
 0x882   :  { %v18720_v12 = vpop.f32.mrf.mxu0 }
 0x883   :  { %v9763_v16 = vsel %vm1698_vm4, %v18720_v12, -inf }
 0x884   :  { %9764 = vmax.xlane.f32.xlu1 %v9763_v16  ;;  %v15814_v5 = vpop.f32.mrf.mxu0 }
 0x885   :  { %v20334_v5 = vld [vmem:[#allocation46_spill] sm:$0xff] }
 0x886   :  { %v18724_v20 = vpop.f32.mrf.mxu0 }
 0x887   :  { %v9769_v43 = vsel %vm1698_vm4, %v18724_v20, -inf }
 0x888   :  { %v15824_v18 = vpop.f32.mrf.mxu0 }
 0x889   :  { %v20335_v18 = vld [vmem:[#allocation54_spill] sm:$0xff] }
 0x88a   :  { %v18726_v38 = vpop.f32.mrf.mxu0 }
 0x88b   :  { %v9775_v26 = vsel %vm1698_vm4, %v18726_v38, -inf }
 0x88c   :  { %v15834_v31 = vpop.f32.mrf.mxu0 }
 0x88d   :  { %v20336_v31 = vld [vmem:[#allocation22_spill] sm:$0xff] }
 0x88e   :  { %v18728_v35 = vpop.f32.mrf.mxu0 }
 0x88f   :  { %v9781_v23 = vsel %vm1698_vm4, %v18728_v35, -inf }
 0x890   :  { %v15844_v21 = vpop.f32.mrf.mxu0 }
 0x891   :  { %v20337_v21 = vld [vmem:[#allocation45_spill] sm:$0xff] }
 0x89e   :  { %v18730_v28 = vpop.f32.mrf.mxu0 }
 0x89f   :  { %v9787_v39 = vsel %vm1698_vm4, %v18730_v28, -inf }
 0x8a0   :  { %v15854_v48 = vpop.f32.mrf.mxu0 }
 0x8a1   :  { %v20338_v48 = vld [vmem:[#allocation55_spill] sm:$0xff] }
 0x8a6   :  { %v18732_v58 = vpop.f32.mrf.mxu0 }
 0x8a7   :  { %v9793_v63 = vsel %vm1698_vm4, %v18732_v58, -inf }
 0x8a8   :  { %v15864_v22 = vpop.f32.mrf.mxu0 }
 0x8a9   :  { %v20339_v22 = vld [vmem:[#allocation26_spill] sm:$0xff] }
 0x8aa   :  { %v18734_v0 = vpop.f32.mrf.mxu1 }
 0x8ac   :  { %v15809_v36 = vpop.f32.mrf.mxu1 }
 0x8ad   :  { %v20340_v36 = vld [vmem:[#allocation56_spill] sm:$0xff] }
 0x8ae   :  { %v18736_v15 = vpop.f32.mrf.mxu1  ;;  %v18738_v46 = vpop.f32.mrf.mxu0 }
 0x8af   :  { %v9766_v25 = vsel %vm1698_vm4, %v18736_v15, -inf  ;;  %v9799_v57 = vsel %vm1698_vm4, %v18738_v46, -inf }
 0x8b0   :  { %v15874_v14 = vpop.f32.mrf.mxu0  ;;  %9767 = vmax.xlane.f32.xlu0 %v9766_v25  ;;  %v15819_v6 = vpop.f32.mrf.mxu1  ;;  %v20341_v25 = vld [vmem:[#allocation30_spill] sm:$0xff] }
 0x8b1   :  { %v20342_v14 = vld [vmem:[#allocation57_spill] sm:$0xff] }
 0x8b2   :  { %v18742_v40 = vpop.f32.mrf.mxu1 }
 0x8b3   :  { %v9772_v60 = vsel %vm1698_vm4, %v18742_v40, -inf }
 0x8b4   :  { %9770 = vmax.xlane.f32.xlu0 %v9769_v43  ;;  %9773 = vmax.xlane.f32.xlu1 %v9772_v60  ;;  %v15829_v37 = vpop.f32.mrf.mxu1 }
 0x8b6   :  { %v18748_v53 = vpop.f32.mrf.mxu1  ;;  %v18750_v47 = vpop.f32.mrf.mxu0 }
 0x8b7   :  { %v9778_v41 = vsel %vm1698_vm4, %v18748_v53, -inf  ;;  %v9805_v50 = vsel %vm1698_vm4, %v18750_v47, -inf }
 0x8b8   :  { %v15884_v44 = vpop.f32.mrf.mxu0  ;;  %9776 = vmax.xlane.f32.xlu0 %v9775_v26  ;;  %9779 = vmax.xlane.f32.xlu1 %v9778_v41  ;;  %v15839_v32 = vpop.f32.mrf.mxu1 }
 0x8b9   :  { %v20343_v44 = vld [vmem:[#allocation33_spill] sm:$0xff] }
 0x8ba   :  { %v18756_v1 = vpop.f32.mrf.mxu1 }
 0x8bb   :  { %v9784_v30 = vsel %vm1698_vm4, %v18756_v1, -inf }
 0x8bc   :  { %9782 = vmax.xlane.f32.xlu0 %v9781_v23  ;;  %9785 = vmax.xlane.f32.xlu1 %v9784_v30  ;;  %v15849_v45 = vpop.f32.mrf.mxu1 }
 0x8be   :  { %v18762_v52 = vpop.f32.mrf.mxu1 }
 0x8bf   :  { %v9790_v3 = vsel %vm1698_vm4, %v18762_v52, -inf }
 0x8c0   :  { %9788 = vmax.xlane.f32.xlu0 %v9787_v39  ;;  %9791 = vmax.xlane.f32.xlu1 %v9790_v3  ;;  %v15859_v2 = vpop.f32.mrf.mxu1 }
 0x8c2   :  { %v18768_v54 = vpop.f32.mrf.mxu1 }
 0x8c3   :  { %v9796_v8 = vsel %vm1698_vm4, %v18768_v54, -inf }
 0x8c4   :  { %9794 = vmax.xlane.f32.xlu0 %v9793_v63  ;;  %9797 = vmax.xlane.f32.xlu1 %v9796_v8  ;;  %v15869_v34 = vpop.f32.mrf.mxu1 }
 0x8c6   :  { %v18774_v55 = vpop.f32.mrf.mxu1 }
 0x8c7   :  { %v9802_v9 = vsel %vm1698_vm4, %v18774_v55, -inf }
 0x8c8   :  { %9800 = vmax.xlane.f32.xlu0 %v9799_v57  ;;  %9803 = vmax.xlane.f32.xlu1 %v9802_v9  ;;  %v15879_v51 = vpop.f32.mrf.mxu1 }
 0x8ca   :  { %v18780_v59 = vpop.f32.mrf.mxu1 }
 0x8cb   :  { %v9808_v37 = vsel %vm1698_vm4, %v18780_v59, -inf }
 0x8cc   :  { %9806 = vmax.xlane.f32.xlu0 %v9805_v50  ;;  %v15889_v16 = vpop.f32.mrf.mxu1 }
 0x8d9   :  { %10015 = vrot.lane.b32.xlu1 %v20334_v5, %s16661_s25 }
 0x8dd   :  { %10091 = vrot.lane.b32.xlu1 %v20335_v18, %s16661_s25 }
 0x8e1   :  { %10167 = vrot.lane.b32.xlu1 %v20336_v31, %s16661_s25 }
 0x8e2   :  { %9939 = vrot.lane.b32.xlu0 %v20337_v21, %s16661_s25 }
 0x8e5   :  { %10243 = vrot.lane.b32.xlu1 %v20338_v48, %s16661_s25 }
 0x8e9   :  { %10319 = vrot.lane.b32.xlu1 %v20339_v22, %s16661_s25 }
 0x8ed   :  { %10395 = vrot.lane.b32.xlu1 %v20340_v36, %s16661_s25 }
 0x8f1   :  { %10471 = vrot.lane.b32.xlu1 %v20341_v25, %s16661_s25 }
 0x8f5   :  { %10547 = vrot.lane.b32.xlu1 %v20342_v14, %s16661_s25 }
 0x90d   :  { %v9765_v6 = vpop.xlane.xlu1 %9764 }
 0x90e   :  { %v9811_v43 = vsub.f32 %v18720_v12, %v9765_v6 }
 0x910   :  { %v9827_v60 = vmul.f32 1.442695, %v9811_v43 }
 0x912   :  { %16481 = vpow2.f32 %v9827_v60 }
 0x919   :  { %9809 = vmax.xlane.f32.xlu1 %v9808_v37 }
 0x91f   :  { %v18805_v26 = vpop.eup %16481 }
 0x920   :  { %v9859_v41 = vsel %vm1698_vm4, %v18805_v26, 0.0 }
 0x921   :  { %9860 = vadd.xlane.f32.xlu0 %v9859_v41 }
 0x92a   :  { %10623 = vrot.lane.b32.xlu1 %v20343_v44, %s16661_s25 }
 0x939   :  { %v9768_v32 = vpop.xlane.xlu0 %9767 }
 0x93a   :  { %v9812_v23 = vsub.f32 %v18736_v15, %v9768_v32 }
 0x93c   :  { %v9829_v30 = vmul.f32 1.442695, %v9812_v23 }
 0x93d   :  { %v9771_v12 = vpop.xlane.xlu0 %9770  ;;  %v9774_v45 = vpop.xlane.xlu1 %9773 }
 0x93e   :  { %16483 = vpow2.f32 %v9829_v30  ;;  %v9813_v39 = vsub.f32 %v18724_v20, %v9771_v12  ;;  %v9814_v3 = vsub.f32 %v18742_v40, %v9774_v45 }
 0x940   :  { %v9831_v2 = vmul.f32 1.442695, %v9813_v39  ;;  %v9833_v63 = vmul.f32 1.442695, %v9814_v3 }
 0x941   :  { %v9777_v8 = vpop.xlane.xlu0 %9776  ;;  %v9780_v34 = vpop.xlane.xlu1 %9779 }
 0x942   :  { %16485 = vpow2.f32 %v9831_v2  ;;  %v9815_v57 = vsub.f32 %v18726_v38, %v9777_v8  ;;  %v9816_v9 = vsub.f32 %v18748_v53, %v9780_v34 }
 0x943   :  { %16487 = vpow2.f32 %v9833_v63 }
 0x944   :  { %v9835_v51 = vmul.f32 1.442695, %v9815_v57  ;;  %v9837_v15 = vmul.f32 1.442695, %v9816_v9 }
 0x945   :  { %v9783_v50 = vpop.xlane.xlu0 %9782  ;;  %v9786_v16 = vpop.xlane.xlu1 %9785 }
 0x946   :  { %16489 = vpow2.f32 %v9835_v51  ;;  %v9817_v5 = vsub.f32 %v18728_v35, %v9783_v50  ;;  %v9818_v20 = vsub.f32 %v18756_v1, %v9786_v16 }
 0x947   :  { %16491 = vpow2.f32 %v9837_v15 }
 0x948   :  { %v9839_v40 = vmul.f32 1.442695, %v9817_v5  ;;  %v9841_v18 = vmul.f32 1.442695, %v9818_v20 }
 0x949   :  { %v9789_v31 = vpop.xlane.xlu0 %9788  ;;  %v9792_v21 = vpop.xlane.xlu1 %9791 }
 0x94a   :  { %16493 = vpow2.f32 %v9839_v40  ;;  %v9819_v38 = vsub.f32 %v18730_v28, %v9789_v31  ;;  %v9820_v53 = vsub.f32 %v18762_v52, %v9792_v21 }
 0x94b   :  { %v18820_v48 = vpop.eup %16483  ;;  %16495 = vpow2.f32 %v9841_v18 }
 0x94c   :  { %v9843_v22 = vmul.f32 1.442695, %v9819_v38  ;;  %v9845_v36 = vmul.f32 1.442695, %v9820_v53  ;;  %v9862_v35 = vsel %vm1698_vm4, %v18820_v48, 0.0 }
 0x94d   :  { %v9795_v25 = vpop.xlane.xlu0 %9794  ;;  %v9798_v1 = vpop.xlane.xlu1 %9797 }
 0x94e   :  { %16497 = vpow2.f32 %v9843_v22  ;;  %v9821_v14 = vsub.f32 %v18732_v58, %v9795_v25  ;;  %v9822_v6 = vsub.f32 %v18768_v54, %v9798_v1  ;;  %9863 = vadd.xlane.f32.xlu1 %v9862_v35  ;;  %v20344_v25 = vld [vmem:[#allocation35_spill] sm:$0xff] }
 0x94f   :  { %v18826_v43 = vpop.eup %16485  ;;  %16499 = vpow2.f32 %v9845_v36  ;;  %v20345_v1 = vld [vmem:[#allocation59_spill] sm:$0xff] }
 0x950   :  { %v18828_v28 = vpop.eup %16487  ;;  %v9847_v52 = vmul.f32 1.442695, %v9821_v14  ;;  %v9849_v60 = vmul.f32 1.442695, %v9822_v6  ;;  %v9865_v37 = vsel %vm1698_vm4, %v18826_v43, 0.0  ;;  %v20346_v6 = vld [vmem:[#allocation37_spill] sm:$0xff] }
 0x951   :  { %9866 = vadd.xlane.f32.xlu0 %v9865_v37  ;;  %v9801_v41 = vpop.xlane.xlu0 %9800  ;;  %v9804_v44 = vpop.xlane.xlu1 %9803  ;;  %v9868_v32 = vsel %vm1698_vm4, %v18828_v28, 0.0  ;;  %v20348_v37 = vld [vmem:[#allocation39_spill] sm:$0xff] }
 0x952   :  { %16501 = vpow2.f32 %v9847_v52  ;;  %v9823_v58 = vsub.f32 %v18738_v46, %v9801_v41  ;;  %v9824_v54 = vsub.f32 %v18774_v55, %v9804_v44  ;;  %9869 = vadd.xlane.f32.xlu1 %v9868_v32  ;;  %v20349_v44 = vld [vmem:[#allocation12_spill] sm:$0xff] }
 0x953   :  { %v18836_v23 = vpop.eup %16489  ;;  %16503 = vpow2.f32 %v9849_v60  ;;  %v20347_v60 = vld [vmem:[#allocation60_spill] sm:$0xff] }
 0x954   :  { %v18838_v30 = vpop.eup %16491  ;;  %v9851_v12 = vmul.f32 1.442695, %v9823_v58  ;;  %v9853_v45 = vmul.f32 1.442695, %v9824_v54  ;;  %v9871_v39 = vsel %vm1698_vm4, %v18836_v23, 0.0  ;;  %v20350_v58 = vld [vmem:[#allocation14_spill] sm:$0xff] }
 0x955   :  { %9872 = vadd.xlane.f32.xlu0 %v9871_v39  ;;  %v9807_v3 = vpop.xlane.xlu0 %9806  ;;  %v10016_v2 = vpop.permute.xlu1 %10015  ;;  %v9874_v63 = vsel %vm1698_vm4, %v18838_v30, 0.0 }
 0x956   :  { %16505 = vpow2.f32 %v9851_v12  ;;  %v9825_v46 = vsub.f32 %v18750_v47, %v9807_v3  ;;  %15896 = vmatpush3.msra.mxu1 %v10016_v2  ;;  %9875 = vadd.xlane.f32.xlu1 %v9874_v63  ;;  %v20352_v2 = vld [vmem:[#allocation10_spill] sm:$0xff] }
 0x957   :  { %v18845_v55 = vpop.eup %16493  ;;  %16507 = vpow2.f32 %v9853_v45  ;;  %15905 = vmatprep.subr.mxu1 %v20214_v10  ;;  %v20351_v45 = vld [vmem:[#allocation9_spill] sm:$0xff] }
 0x958   :  { %v18848_v8 = vpop.eup %16495  ;;  %v9855_v34 = vmul.f32 1.442695, %v9825_v46  ;;  %v9877_v57 = vsel %vm1698_vm4, %v18845_v55, 0.0  ;;  %v20354_v46 = vld [vmem:[#allocation71_spill] sm:$0xff] }
 0x959   :  { %9878 = vadd.xlane.f32.xlu0 %v9877_v57  ;;  %v9940_v9 = vpop.permute.xlu0 %9939  ;;  %v9880_v51 = vsel %vm1698_vm4, %v18848_v8, 0.0  ;;  %v10092_v35 = vpop.permute.xlu1 %10091 }
 0x95a   :  { %16509 = vpow2.f32 %v9855_v34  ;;  %15891 = vmatpush3.msra.mxu0 %v9940_v9  ;;  %9881 = vadd.xlane.f32.xlu1 %v9880_v51 }
 0x95b   :  { %v18854_v47 = vpop.eup %16497  ;;  %15900 = vmatprep.subr.mxu0 %v20214_v10 }
 0x95c   :  { %v18857_v15 = vpop.eup %16499  ;;  %v9883_v50 = vsel %vm1698_vm4, %v18854_v47, 0.0 }
 0x95d   :  { %9884 = vadd.xlane.f32.xlu0 %v9883_v50  ;;  %v9886_v16 = vsel %vm1698_vm4, %v18857_v15, 0.0  ;;  %v18887_v14 = vpop.permute.xlu1 %10167 }
 0x95e   :  { %9887 = vadd.xlane.f32.xlu1 %v9886_v16 }
 0x95f   :  { %v18863_v5 = vpop.eup %16501 }
 0x960   :  { %v18865_v20 = vpop.eup %16503  ;;  %v9889_v40 = vsel %vm1698_vm4, %v18863_v5, 0.0 }
 0x961   :  { %9890 = vadd.xlane.f32.xlu0 %v9889_v40  ;;  %v9892_v18 = vsel %vm1698_vm4, %v18865_v20, 0.0  ;;  %v18891_v52 = vpop.permute.xlu1 %10243 }
 0x962   :  { %9893 = vadd.xlane.f32.xlu1 %v9892_v18  ;;  %v20360_v18 = vld [vmem:[#allocation18_spill] sm:$0xff] }
 0x963   :  { %v18871_v31 = vpop.eup %16505 }
 0x964   :  { %v18873_v21 = vpop.eup %16507  ;;  %v9895_v38 = vsel %vm1698_vm4, %v18871_v31, 0.0 }
 0x965   :  { %9896 = vadd.xlane.f32.xlu0 %v9895_v38  ;;  %v9898_v53 = vsel %vm1698_vm4, %v18873_v21, 0.0  ;;  %v18897_v41 = vpop.permute.xlu1 %10319 }
 0x966   :  { %9899 = vadd.xlane.f32.xlu1 %v9898_v53 }
 0x967   :  { %v18879_v22 = vpop.eup %16509 }
 0x968   :  { %v9901_v36 = vsel %vm1698_vm4, %v18879_v22, 0.0 }
 0x969   :  { %v18901_v32 = vpop.permute.xlu1 %10395 }
 0x96a   :  { %9902 = vadd.xlane.f32.xlu1 %v9901_v36 }
 0x96d   :  { %v18907_v54 = vpop.permute.xlu1 %10471 }
 0x971   :  { %v18911_v12 = vpop.permute.xlu1 %10547 }
 0x97b   :  { %10775 = vrot.lane.b32.xlu1 %v20344_v25, %s16661_s25 }
 0x97f   :  { %10851 = vrot.lane.b32.xlu1 %v20345_v1, %s16661_s25  ;;  %v20361_v1 = vld [vmem:[#allocation20_spill] sm:$0xff] }
 0x983   :  { %10927 = vrot.lane.b32.xlu1 %v20346_v6, %s16661_s25 }
 0x987   :  { %11003 = vrot.lane.b32.xlu1 %v20347_v60, %s16661_s25 }
 0x98b   :  { %11079 = vrot.lane.b32.xlu1 %v20348_v37, %s16661_s25 }
 0x98f   :  { %5733 = vrot.lane.b32.xlu1 %v20349_v44, %s16661_s25 }
 0x993   :  { %8453 = vrot.lane.b32.xlu1 %v18694_v17, %s16660_s24 }
 0x997   :  { %5737 = vrot.lane.b32.xlu1 %v20350_v58, %s16661_s25 }
 0x99b   :  { %8457 = vrot.lane.b32.xlu1 %v18698_v62, %s16660_s24  ;;  %v20353_v62 = vld [vmem:[#allocation69_spill] sm:$0xff] }
 0x99f   :  { %5741 = vrot.lane.b32.xlu1 %v20351_v45, %s16661_s25 }
 0x9a2   :  { %v9810_v39 = vpop.xlane.xlu1 %9809 }
 0x9a3   :  { %v9826_v3 = vsub.f32 %v18780_v59, %v9810_v39  ;;  %8461 = vrot.lane.b32.xlu1 %v18702_v29, %s16660_s24 }
 0x9a5   :  { %v9857_v17 = vmul.f32 1.442695, %v9826_v3 }
 0x9a6   :  { %v18951_v9 = vpop.permute.xlu1 %10623 }
 0x9a7   :  { %16511 = vpow2.f32 %v9857_v17  ;;  %5745 = vrot.lane.b32.xlu1 %v20352_v2, %s16661_s25  ;;  %v20364_v17 = vld [vmem:[#allocation72_spill] sm:$0xff] }
 0x9aa   :  { %v9861_v63 = vpop.xlane.xlu0 %9860 }
 0x9ab   :  { %16513 = vrcp.f32 %v9861_v63  ;;  %8465 = vrot.lane.b32.xlu1 %v18706_v4, %s16660_s24  ;;  %v20355_v4 = vld [vmem:[#allocation21_spill] sm:$0xff] }
 0x9af   :  { %5749 = vrot.lane.b32.xlu1 %v20353_v62, %s16661_s25 }
 0x9b3   :  { %8469 = vrot.lane.b32.xlu1 %v18710_v33, %s16660_s24  ;;  %v20356_v33 = vld [vmem:[#allocation74_spill] sm:$0xff] }
 0x9b4   :  { %v18926_v59 = vpop.eup %16511 }
 0x9b5   :  { %v9904_v29 = vsel %vm1698_vm4, %v18926_v59, 0.0 }
 0x9b6   :  { %9905 = vadd.xlane.f32.xlu0 %v9904_v29 }
 0x9b7   :  { %5753 = vrot.lane.b32.xlu1 %v20354_v46, %s16661_s25 }
 0x9b8   :  { %v16514_v34 = vpop.eup %16513 }
 0x9b9   :  { %v9908_v57 = vmul.f32 %v16514_v34, %v18805_v26  ;;  %v20358_v26 = vld [vmem:[#allocation32_spill] sm:$0xff] }
 0x9bb   :  { %15893 = vmatmul.mubr.msk.f32.vlgmr.msra.gmra.mxu0 %vm1698_vm4, %v9908_v57  ;;  %8473 = vrot.lane.b32.xlu1 %v18714_v24, %s16660_s24  ;;  %v20357_v24 = vld [vmem:[#allocation58_spill] sm:$0xff] }
 0x9bc   :  { %15901 = vmatpush3.msra.mxu0 %v10092_v35  ;;  %15902 = vmatprep.mubr.msk.f32.mxu0 %vm16658_vm2, %v20214_v10 }
 0x9bd   :  { %15910 = vmatprep.subr.mxu0 %v20214_v10 }
 0x9bf   :  { %5757 = vrot.lane.b32.xlu1 %v20355_v4, %s16661_s25 }
 0x9c3   :  { %8477 = vrot.lane.b32.xlu1 %v18716_v42, %s16660_s24  ;;  %v20359_v42 = vld [vmem:[#allocation29_spill] sm:$0xff] }
 0x9c7   :  { %5761 = vrot.lane.b32.xlu1 %v20356_v33, %s16661_s25 }
 0x9cb   :  { %8481 = vrot.lane.b32.xlu1 %v18734_v0, %s16660_s24 }
 0x9cc   :  { %10699 = vrot.lane.b32.xlu0 %v20357_v24, %s16661_s25 }
 0x9d0   :  { %5731 = vrot.lane.b32.xlu0 %v20358_v26, %s16661_s25 }
 0x9d4   :  { %8451 = vrot.lane.b32.xlu0 %v18690_v11, %s16660_s24 }
 0x9d7   :  { %v9864_v51 = vpop.xlane.xlu1 %9863 }
 0x9d8   :  { %16515 = vrcp.f32 %v9864_v51  ;;  %5735 = vrot.lane.b32.xlu0 %v20359_v42, %s16661_s25  ;;  %v20367_v51 = vld [vmem:[#allocation66_spill] sm:$0xff] }
 0x9da   :  { %v9867_v50 = vpop.xlane.xlu0 %9866 }
 0x9db   :  { %16517 = vrcp.f32 %v9867_v50  ;;  %v9870_v16 = vpop.xlane.xlu1 %9869 }
 0x9dc   :  { %16519 = vrcp.f32 %v9870_v16  ;;  %8455 = vrot.lane.b32.xlu0 %v18692_v7, %s16660_s24 }
 0x9de   :  { %v9873_v0 = vpop.xlane.xlu0 %9872 }
 0x9df   :  { %16521 = vrcp.f32 %v9873_v0  ;;  %v9876_v40 = vpop.xlane.xlu1 %9875 }
 0x9e0   :  { %16523 = vrcp.f32 %v9876_v40  ;;  %5739 = vrot.lane.b32.xlu0 %v20360_v18, %s16661_s25 }
 0x9e2   :  { %v9879_v11 = vpop.xlane.xlu0 %9878 }
 0x9e3   :  { %16525 = vrcp.f32 %v9879_v11  ;;  %v9882_v38 = vpop.xlane.xlu1 %9881 }
 0x9e4   :  { %16527 = vrcp.f32 %v9882_v38  ;;  %8459 = vrot.lane.b32.xlu0 %v18696_v56, %s16660_s24 }
 0x9e5   :  { %v16516_v53 = vpop.eup %16515 }
 0x9e6   :  { %v9910_v36 = vmul.f32 %v16516_v53, %v18820_v48  ;;  %v9885_v35 = vpop.xlane.xlu0 %9884  ;;  %v20368_v53 = vld [vmem:[#allocation43_spill] sm:$0xff] }
 0x9e7   :  { %16529 = vrcp.f32 %v9885_v35  ;;  %v9888_v7 = vpop.xlane.xlu1 %9887 }
 0x9e8   :  { %v16518_v25 = vpop.eup %16517  ;;  %16531 = vrcp.f32 %v9888_v7  ;;  %5743 = vrot.lane.b32.xlu0 %v20361_v1, %s16661_s25  ;;  %15898 = vmatmul.mubr.msk.f32.vlgmr.msra.gmra.mxu1 %vm1698_vm4, %v9910_v36  ;;  %v20369_v36 = vld [vmem:[#allocation68_spill] sm:$0xff] }
 0x9e9   :  { %v16520_v6 = vpop.eup %16519  ;;  %v9912_v60 = vmul.f32 %v16518_v25, %v18826_v43  ;;  %15906 = vmatpush3.msra.mxu1 %v18887_v14  ;;  %15907 = vmatprep.mubr.msk.f32.mxu1 %vm16658_vm2, %v20214_v10  ;;  %v3056_v35 = vadd.f32 %v20369_v36, %v20368_v53  ;;  %v20374_v36 = vld [vmem:[#allocation42_spill] sm:$0xff] }
 0x9ea   :  { %v9914_v56 = vmul.f32 %v16520_v6, %v18828_v28  ;;  %15915 = vmatprep.subr.mxu1 %v20214_v10  ;;  %v9891_v24 = vpop.xlane.xlu0 %9890 }
 0x9eb   :  { %15903 = vmatmul.mubr.msk.f32.vlgmr.msra.gmra.mxu0 %vm1698_vm4, %v9912_v60  ;;  %v9894_v48 = vpop.xlane.xlu1 %9893 }
 0x9ec   :  { %v16522_v37 = vpop.eup %16521  ;;  %15911 = vmatpush3.msra.mxu0 %v18891_v52  ;;  %16533 = vrcp.f32 %v9894_v48  ;;  %8463 = vrot.lane.b32.xlu0 %v18700_v49, %s16660_s24 }
 0x9ed   :  { %v16524_v43 = vpop.eup %16523  ;;  %v9916_v14 = vmul.f32 %v16522_v37, %v18836_v23  ;;  %15908 = vmatmul.mubr.msk.f32.vlgmr.msra.gmra.mxu1 %vm1698_vm4, %v9914_v56  ;;  %15912 = vmatprep.mubr.msk.f32.mxu0 %vm16658_vm2, %v20214_v10 }
 0x9ee   :  { %v9918_v28 = vmul.f32 %v16524_v43, %v18838_v30  ;;  %15916 = vmatpush3.msra.mxu1 %v18897_v41  ;;  %15920 = vmatprep.subr.mxu0 %v20214_v10  ;;  %v20362_v30 = vld [vmem:[#allocation15_spill] sm:$0xff]  ;;  %v9897_v50 = vpop.xlane.xlu0 %9896 }
 0x9ef   :  { %15913 = vmatmul.mubr.msk.f32.vlgmr.msra.gmra.mxu0 %vm1698_vm4, %v9916_v14  ;;  %15917 = vmatprep.mubr.msk.f32.mxu1 %vm16658_vm2, %v20214_v10  ;;  %v9900_v49 = vpop.xlane.xlu1 %9899 }
 0x9f0   :  { %v16526_v52 = vpop.eup %16525  ;;  %15921 = vmatpush3.msra.mxu0 %v18901_v32  ;;  %15925 = vmatprep.subr.mxu1 %v20214_v10  ;;  %16535 = vrcp.f32 %v9900_v49  ;;  %v20370_v49 = vld [vmem:[#allocation44_spill] sm:$0xff] }
 0x9f1   :  { %v16528_v23 = vpop.eup %16527  ;;  %v9920_v44 = vmul.f32 %v16526_v52, %v18845_v55  ;;  %5747 = vrot.lane.b32.xlu0 %v20362_v30, %s16661_s25  ;;  %15918 = vmatmul.mubr.msk.f32.vlgmr.msra.gmra.mxu1 %vm1698_vm4, %v9918_v28  ;;  %16537 = vrcp.f32 %v9891_v24  ;;  %v20371_v52 = vld [vmem:[#allocation70_spill] sm:$0xff] }
 0x9f2   :  { %v9922_v41 = vmul.f32 %v16528_v23, %v18848_v8  ;;  %15926 = vmatpush3.msra.mxu1 %v18907_v54  ;;  %15922 = vmatprep.mubr.msk.f32.mxu0 %vm16658_vm2, %v20214_v10  ;;  %16539 = vrcp.f32 %v9897_v50  ;;  %v3058_v23 = vadd.f32 %v20371_v52, %v20370_v49  ;;  %v11290_v52 = vld [vmem:[#allocation4 + $0x28] sm:$0xff] }
 0x9f3   :  { %15930 = vmatprep.subr.mxu0 %v20214_v10  ;;  %15923 = vmatmul.mubr.msk.f32.vlgmr.msra.gmra.mxu0 %vm1698_vm4, %v9920_v44  ;;  %v18999_v32 = vpop.xlane.xlu1 %9902 }
 0x9f4   :  { %v16530_v58 = vpop.eup %16529  ;;  %15927 = vmatprep.mubr.msk.f32.mxu1 %vm16658_vm2, %v20214_v10  ;;  %15931 = vmatpush3.msra.mxu0 %v18911_v12  ;;  %16541 = vrcp.f32 %v18999_v32 }
 0x9f5   :  { %v16532_v55 = vpop.eup %16531  ;;  %v9924_v8 = vmul.f32 %v16530_v58, %v18854_v47  ;;  %15935 = vmatprep.subr.mxu1 %v20214_v10  ;;  %8467 = vrot.lane.b32.xlu0 %v18704_v13, %s16660_s24  ;;  %v20363_v13 = vld [vmem:[#allocation17_spill] sm:$0xff] }
 0x9f6   :  { %v9926_v54 = vmul.f32 %v16532_v55, %v18857_v15  ;;  %15928 = vmatmul.mubr.msk.f32.vlgmr.msra.gmra.mxu1 %vm1698_vm4, %v9922_v41  ;;  %15932 = vmatprep.mubr.msk.f32.mxu0 %vm16658_vm2, %v20214_v10 }
 0x9f7   :  { %15936 = vmatpush3.msra.mxu1 %v18951_v9  ;;  %15933 = vmatmul.mubr.msk.f32.vlgmr.msra.gmra.mxu0 %vm1698_vm4, %v9924_v8  ;;  %v10776_v12 = vpop.permute.xlu1 %10775  ;;  %v20366_v9 = vld [vmem:[#allocation41_spill] sm:$0xff] }
 0x9f8   :  { %15937 = vmatprep.mubr.msk.f32.mxu1 %vm16658_vm2, %v20214_v10  ;;  %15945 = vmatprep.subr.mxu1 %v20214_v10  ;;  %v3054_v42 = vadd.f32 %v20367_v51, %v20366_v9 }
 0x9f9   :  { %v16534_v47 = vpop.eup %16533  ;;  %5751 = vrot.lane.b32.xlu0 %v20363_v13, %s16661_s25  ;;  %15940 = vmatprep.subr.mxu0 %v20214_v10 }
 0x9fa   :  { %v9930_v15 = vmul.f32 %v16534_v47, %v18865_v20  ;;  %15938 = vmatmul.mubr.msk.f32.vlgmr.msra.gmra.mxu1 %vm1698_vm4, %v9926_v54  ;;  %15942 = vmatprep.mubr.msk.f32.mxu0 %vm16658_vm2, %v20214_v10 }
 0x9fb   :  { %15946 = vmatpush3.msra.mxu1 %v10776_v12  ;;  %15947 = vmatprep.mubr.msk.f32.mxu1 %vm16658_vm2, %v20214_v10  ;;  %v19026_v45 = vpop.permute.xlu1 %10851 }
 0x9fc   :  { %15955 = vmatprep.subr.mxu1 %v20214_v10 }
 0x9fd   :  { %v16536_v39 = vpop.eup %16535  ;;  %8471 = vrot.lane.b32.xlu0 %v18708_v61, %s16660_s24 }
 0x9fe   :  { %v9934_v3 = vmul.f32 %v16536_v39, %v18873_v21  ;;  %15948 = vmatmul.mubr.msk.f32.vlgmr.msra.gmra.mxu1 %vm1698_vm4, %v9930_v15  ;;  %v20365_v21 = vld [vmem:[#allocation73_spill] sm:$0xff]  ;;  %v16538_v60 = vpop.eup %16537 }
 0x9ff   :  { %v10928_v20 = vpop.permute.xlu1 %10927  ;;  %15957 = vmatprep.mubr.msk.f32.mxu1 %vm16658_vm2, %v20214_v10  ;;  %v9928_v37 = vmul.f32 %v16538_v60, %v18863_v5  ;;  %v16540_v28 = vpop.eup %16539  ;;  %v11296_v60 = vld [vmem:[#allocation4 + $0x58] sm:$0xff] }
 0xa00   :  { %15956 = vmatpush3.msra.mxu1 %v10928_v20  ;;  %v9932_v5 = vmul.f32 %v16540_v28, %v18871_v31  ;;  %v11299_v20 = vld [vmem:[#allocation4 + $0x70] sm:$0xff] }
 0xa01   :  { %5755 = vrot.lane.b32.xlu0 %v20364_v17, %s16661_s25  ;;  %15965 = vmatprep.subr.mxu1 %v20214_v10  ;;  %v16542_v32 = vpop.eup %16541  ;;  %v11291_v28 = vld [vmem:[#allocation4 + $0x30] sm:$0xff] }
 0xa02   :  { %15958 = vmatmul.mubr.msk.f32.vlgmr.msra.gmra.mxu1 %vm1698_vm4, %v9934_v3  ;;  %v9936_v58 = vmul.f32 %v16542_v32, %v18879_v22  ;;  %v11286_v32 = vld [vmem:[#allocation4 + $0x8] sm:$0xff] }
 0xa03   :  { %v11004_v2 = vpop.permute.xlu1 %11003  ;;  %15967 = vmatprep.mubr.msk.f32.mxu1 %vm16658_vm2, %v20214_v10 }
 0xa05   :  { %8475 = vrot.lane.b32.xlu0 %v18712_v19, %s16660_s24 }
 0xa07   :  { %v11080_v61 = vpop.permute.xlu1 %11079 }
 0xa08   :  { %15966 = vmatpush3.msra.mxu1 %v11080_v61 }
 0xa09   :  { %5759 = vrot.lane.b32.xlu0 %v20365_v21, %s16661_s25  ;;  %v20372_v21 = vld [vmem:[#allocation40_spill] sm:$0xff] }
 0xa0b   :  { %v19045_v63 = vpop.permute.xlu1 %5733 }
 0xa0d   :  { %8479 = vrot.lane.b32.xlu0 %v18718_v27, %s16660_s24 }
 0xa0f   :  { %v19049_v62 = vpop.permute.xlu1 %8453 }
 0xa13   :  { %v19051_v29 = vpop.permute.xlu1 %5737 }
 0xa17   :  { %v19053_v46 = vpop.permute.xlu1 %8457 }
 0xa1b   :  { %v19055_v34 = vpop.permute.xlu1 %5741 }
 0xa1f   :  { %v19057_v57 = vpop.permute.xlu1 %8461 }
 0xa23   :  { %v19059_v19 = vpop.permute.xlu1 %5745 }
 0xa27   :  { %v19061_v4 = vpop.permute.xlu1 %8465 }
 0xa2b   :  { %v19063_v33 = vpop.permute.xlu1 %5749 }
 0xa2f   :  { %v19065_v26 = vpop.permute.xlu1 %8469 }
 0xa33   :  { %v5754_v27 = vpop.permute.xlu1 %5753 }
 0xa34   :  { %v5790_v16 = vadd.f32 %v5754_v27, %v20366_v9  ;;  %v20373_v27 = vld [vmem:[#allocation65_spill] sm:$0xff] }
 0xa35   :  { %v3055_v51 = vadd.f32 %v20373_v27, %v20372_v21 }
 0xa36   :  { %v11246_v0 = vsel %vm481_vm3, %v3054_v42, %v5790_v16 }
 0xa37   :  { %v8474_v40 = vpop.permute.xlu1 %8473 }
 0xa38   :  { %v8510_v18 = vadd.f32 %v8474_v40, %v20366_v9 }
 0xa3a   :  { %v19073_v11 = vsel %vm11251_vm5, %v11246_v0, %v8510_v18 }
 0xa3b   :  { %v5758_v38 = vpop.permute.xlu1 %5757 }
 0xa3c   :  { %v5792_v7 = vadd.f32 %v5758_v38, %v20368_v53 }
 0xa3e   :  { %v11248_v25 = vsel %vm481_vm3, %v3056_v35, %v5792_v7  ;;  %v20375_v35 = vld [vmem:[#allocation67_spill] sm:$0xff] }
 0xa3f   :  { %v9906_v1 = vpop.xlane.xlu0 %9905  ;;  %v8478_v6 = vpop.permute.xlu1 %8477  ;;  %v3057_v7 = vadd.f32 %v20375_v35, %v20374_v36 }
 0xa40   :  { %16543 = vrcp.f32 %v9906_v1  ;;  %v8512_v56 = vadd.f32 %v8478_v6, %v20368_v53  ;;  %v11297_v6 = vld [vmem:[#allocation4 + $0x60] sm:$0xff] }
 0xa42   :  { %v19082_v48 = vsel %vm11251_vm5, %v11248_v25, %v8512_v56  ;;  %v11295_v56 = vld [vmem:[#allocation4 + $0x50] sm:$0xff] }
 0xa43   :  { %v10700_v43 = vpop.permute.xlu0 %10699  ;;  %v5762_v14 = vpop.permute.xlu1 %5761 }
 0xa44   :  { %v5794_v44 = vadd.f32 %v5762_v14, %v20370_v49  ;;  %15941 = vmatpush3.msra.mxu0 %v10700_v43  ;;  %v11293_v43 = vld [vmem:[#allocation4 + $0x40] sm:$0xff]  ;;  %v11292_v14 = vld [vmem:[#allocation4 + $0x38] sm:$0xff] }
 0xa45   :  { %15943 = vmatmul.mubr.msk.f32.vlgmr.msra.gmra.mxu0 %vm1698_vm4, %v9928_v37  ;;  %15950 = vmatprep.subr.mxu0 %v20214_v10  ;;  %v11294_v37 = vld [vmem:[#allocation4 + $0x48] sm:$0xff] }
 0xa46   :  { %v19091_v30 = vsel %vm481_vm3, %v3058_v23, %v5794_v44  ;;  %15951 = vmatpush3.msra.mxu0 %v19026_v45  ;;  %15952 = vmatprep.mubr.msk.f32.mxu0 %vm16658_vm2, %v20214_v10  ;;  %v11289_v23 = vld [vmem:[#allocation4 + $0x20] sm:$0xff]  ;;  %v11288_v44 = vld [vmem:[#allocation4 + $0x18] sm:$0xff] }
 0xa47   :  { %v19097_v41 = vpop.permute.xlu0 %5731  ;;  %15960 = vmatprep.subr.mxu0 %v20214_v10 }
 0xa49   :  { %15953 = vmatmul.mubr.msk.f32.vlgmr.msra.gmra.mxu0 %vm1698_vm4, %v9932_v5  ;;  %v11287_v5 = vld [vmem:[#allocation4 + $0x10] sm:$0xff] }
 0xa4a   :  { %15961 = vmatpush3.msra.mxu0 %v11004_v2  ;;  %15962 = vmatprep.mubr.msk.f32.mxu0 %vm16658_vm2, %v20214_v10  ;;  %v11298_v2 = vld [vmem:[#allocation4 + $0x68] sm:$0xff] }
 0xa4b   :  { %v19104_v55 = vpop.permute.xlu0 %8451 }
 0xa4d   :  { %v16544_v8 = vpop.eup %16543  ;;  %15963 = vmatmul.mubr.msk.f32.vlgmr.msra.gmra.mxu0 %vm1698_vm4, %v9936_v58  ;;  %v11285_v58 = vld [vmem:[#allocation4] sm:$0xff] }
 0xa4e   :  { %v9938_v31 = vmul.f32 %v16544_v8, %v18926_v59  ;;  %v11300_v59 = vld [vmem:[#allocation4 + $0x78] sm:$0xff] }
 0xa4f   :  { %v19108_v54 = vpop.permute.xlu0 %5735  ;;  %15970 = vmatprep.subr.mxu0 %v11300_v59 }
 0xa50   :  { %15968 = vmatmul.mubr.msk.f32.vlgmr.msra.gmra.mxu1 %vm1698_vm4, %v9938_v31  ;;  %15971 = vmatpush3.msra.mxu0 %v11300_v59 }
 0xa51   :  { %15972 = vmatprep.subr.mxu0 %v11299_v20 }
 0xa52   :  { %15973 = vmatpush3.msra.mxu0 %v11299_v20 }
 0xa53   :  { %v19111_v12 = vpop.permute.xlu0 %8455  ;;  %15974 = vmatprep.subr.mxu0 %v11298_v2 }
 0xa54   :  { %15975 = vmatpush3.msra.mxu0 %v11298_v2 }
 0xa55   :  { %15976 = vmatprep.subr.mxu0 %v11297_v6 }
 0xa56   :  { %15977 = vmatpush3.msra.mxu0 %v11297_v6 }
 0xa57   :  { %v19113_v47 = vpop.permute.xlu0 %5739  ;;  %15978 = vmatprep.subr.mxu0 %v11296_v60 }
 0xa58   :  { %15979 = vmatpush3.msra.mxu0 %v11296_v60 }
 0xa59   :  { %15980 = vmatprep.subr.mxu0 %v11295_v56 }
 0xa5a   :  { %15981 = vmatpush3.msra.mxu0 %v11295_v56 }
 0xa5b   :  { %v19115_v13 = vpop.permute.xlu0 %8459  ;;  %15982 = vmatprep.subr.mxu0 %v11294_v37 }
 0xa5c   :  { %15983 = vmatpush3.msra.mxu0 %v11294_v37 }
 0xa5d   :  { %15984 = vmatprep.subr.mxu0 %v11293_v43 }
 0xa5e   :  { %15985 = vmatpush3.msra.mxu0 %v11293_v43 }
 0xa5f   :  { %v19117_v15 = vpop.permute.xlu0 %5743  ;;  %15986 = vmatprep.subr.mxu0 %v11292_v14 }
 0xa60   :  { %15987 = vmatpush3.msra.mxu0 %v11292_v14  ;;  %v20376_v14 = vld [vmem:[#allocation8_spill] sm:$0xff] }
 0xa61   :  { %15988 = vmatprep.subr.mxu0 %v11291_v28 }
 0xa62   :  { %15989 = vmatpush3.msra.mxu0 %v11291_v28  ;;  %v5779_v28 = vadd.f32 %v19097_v41, %v20376_v14 }
 0xa63   :  { %v19119_v22 = vpop.permute.xlu0 %8463  ;;  %15990 = vmatprep.subr.mxu0 %v11290_v52 }
 0xa64   :  { %15991 = vmatpush3.msra.mxu0 %v11290_v52  ;;  %v8499_v52 = vadd.f32 %v19104_v55, %v20376_v14 }
 0xa65   :  { %15992 = vmatprep.subr.mxu0 %v11289_v23 }
 0xa66   :  { %15993 = vmatpush3.msra.mxu0 %v11289_v23  ;;  %v20377_v23 = vld [vmem:[#allocation48_spill] sm:$0xff] }
 0xa67   :  { %v19121_v45 = vpop.permute.xlu0 %5747  ;;  %15994 = vmatprep.subr.mxu0 %v11288_v44 }
 0xa68   :  { %15995 = vmatpush3.msra.mxu0 %v11288_v44  ;;  %v3043_v44 = vadd.f32 %v20377_v23, %v20376_v14  ;;  %v20380_v23 = vld [vmem:[#allocation13_spill] sm:$0xff] }
 0xa69   :  { %15996 = vmatprep.subr.mxu0 %v11287_v5 }
 0xa6a   :  { %15997 = vmatpush3.msra.mxu0 %v11287_v5 }
 0xa6b   :  { %v19123_v39 = vpop.permute.xlu0 %8467  ;;  %15998 = vmatprep.subr.mxu0 %v11286_v32 }
 0xa6c   :  { %15999 = vmatpush3.msra.mxu0 %v11286_v32 }
 0xa6d   :  { %16000 = vmatprep.subr.mxu0 %v11285_v58 }
 0xa6e   :  { %16001 = vmatpush3.msra.mxu0 %v11285_v58  ;;  %v11235_v58 = vsel %vm481_vm3, %v3043_v44, %v5779_v28  ;;  %v20379_v28 = vld [vmem:[#allocation47_spill] sm:$0xff]  ;;  %v5781_v44 = vadd.f32 %v19108_v54, %v20380_v23 }
 0xa6f   :  { %v19125_v3 = vpop.permute.xlu0 %5751  ;;  %16082 = vmatprep.subr.mxu0 %v20214_v10 }
 0xa73   :  { %v19127_v17 = vpop.permute.xlu0 %8471 }
 0xa77   :  { %v5756_v61 = vpop.permute.xlu0 %5755 }
 0xa78   :  { %v5791_v24 = vadd.f32 %v5756_v61, %v20372_v21 }
 0xa7a   :  { %v11247_v40 = vsel %vm481_vm3, %v3055_v51, %v5791_v24 }
 0xa7b   :  { %v10011_v42 = vpop.f32.mrf.mxu0  ;;  %v8476_v50 = vpop.permute.xlu0 %8475 }
 0xa7c   :  { %11171 = vrot.lane.b32.xlu0 %v10011_v42, %s16659_s0  ;;  %v8511_v16 = vadd.f32 %v8476_v50, %v20372_v21 }
 0xa7d   :  { %v15894_v0 = vpop.f32.mrf.mxu0 }
 0xa7e   :  { %v19136_v18 = vsel %vm11251_vm5, %v11247_v40, %v8511_v16 }
 0xa7f   :  { %v5760_v38 = vpop.permute.xlu0 %5759 }
 0xa80   :  { %v5793_v25 = vadd.f32 %v5760_v38, %v20374_v36 }
 0xa82   :  { %v19142_v1 = vsel %vm481_vm3, %v3057_v7, %v5793_v25 }
 0xa83   :  { %v19156_v43 = vpop.permute.xlu0 %8479 }
 0xaa8   :  { %v10087_v8 = vpop.f32.mrf.mxu1 }
 0xaa9   :  { %11173 = vrot.lane.b32.xlu1 %v10087_v8, %s16659_s0  ;;  %v11252_v8 = vsel %vm11251_vm5, %v11235_v58, %v8499_v52  ;;  %v20381_v58 = vld [vmem:[#allocation50_spill] sm:$0xff] }
 0xaaa   :  { %v15899_v31 = vpop.f32.mrf.mxu1 }
 0xaab   :  { %v10163_v59 = vpop.f32.mrf.mxu0 }
 0xaac   :  { %11175 = vrot.lane.b32.xlu0 %v10163_v59, %s16659_s0  ;;  %v11500_v59 = vld [vmem:[%s20074_s5 + $0x78] sm:$0xff] }
 0xaad   :  { %v10239_v20 = vpop.f32.mrf.mxu1  ;;  %v15904_v2 = vpop.f32.mrf.mxu0  ;;  %16026 = vmatprep.subr.mxu1 %v11500_v59 }
 0xaae   :  { %11177 = vrot.lane.b32.xlu1 %v10239_v20, %s16659_s0  ;;  %v11499_v20 = vld [vmem:[%s20074_s5 + $0x70] sm:$0xff]  ;;  %16027 = vmatpush3.msra.mxu1 %v11500_v59 }
 0xaaf   :  { %v15909_v61 = vpop.f32.mrf.mxu1  ;;  %v10315_v24 = vpop.f32.mrf.mxu0  ;;  %16028 = vmatprep.subr.mxu1 %v11499_v20 }
 0xab0   :  { %11179 = vrot.lane.b32.xlu0 %v10315_v24, %s16659_s0  ;;  %v11498_v61 = vld [vmem:[%s20074_s5 + $0x68] sm:$0xff]  ;;  %16029 = vmatpush3.msra.mxu1 %v11499_v20 }
 0xab1   :  { %v10391_v27 = vpop.f32.mrf.mxu1  ;;  %v15914_v51 = vpop.f32.mrf.mxu0  ;;  %16030 = vmatprep.subr.mxu1 %v11498_v61 }
 0xab2   :  { %11181 = vrot.lane.b32.xlu1 %v10391_v27, %s16659_s0  ;;  %v11497_v27 = vld [vmem:[%s20074_s5 + $0x60] sm:$0xff]  ;;  %16031 = vmatpush3.msra.mxu1 %v11498_v61 }
 0xab3   :  { %v15919_v42 = vpop.f32.mrf.mxu1  ;;  %v10467_v50 = vpop.f32.mrf.mxu0  ;;  %16032 = vmatprep.subr.mxu1 %v11497_v27 }
 0xab4   :  { %11183 = vrot.lane.b32.xlu0 %v10467_v50, %s16659_s0  ;;  %v11496_v42 = vld [vmem:[%s20074_s5 + $0x58] sm:$0xff]  ;;  %16033 = vmatpush3.msra.mxu1 %v11497_v27 }
 0xab5   :  { %v15924_v16 = vpop.f32.mrf.mxu0  ;;  %16034 = vmatprep.subr.mxu1 %v11496_v42 }
 0xab6   :  { %v10543_v0 = vpop.f32.mrf.mxu1  ;;  %v11495_v16 = vld [vmem:[%s20074_s5 + $0x50] sm:$0xff]  ;;  %16035 = vmatpush3.msra.mxu1 %v11496_v42 }
 0xab7   :  { %11185 = vrot.lane.b32.xlu1 %v10543_v0, %s16659_s0  ;;  %v10619_v40 = vpop.f32.mrf.mxu0  ;;  %16036 = vmatprep.subr.mxu1 %v11495_v16  ;;  %v20385_v42 = vld [vmem:[#allocation49_spill] sm:$0xff] }
 0xab8   :  { %v15929_v38 = vpop.f32.mrf.mxu1  ;;  %11187 = vrot.lane.b32.xlu0 %v10619_v40, %s16659_s0  ;;  %v11494_v40 = vld [vmem:[%s20074_s5 + $0x48] sm:$0xff]  ;;  %16037 = vmatpush3.msra.mxu1 %v11495_v16 }
 0xab9   :  { %v15934_v35 = vpop.f32.mrf.mxu0  ;;  %16038 = vmatprep.subr.mxu1 %v11494_v40 }
 0xaba   :  { %v10695_v7 = vpop.f32.mrf.mxu1  ;;  %v11493_v35 = vld [vmem:[%s20074_s5 + $0x40] sm:$0xff]  ;;  %16039 = vmatpush3.msra.mxu1 %v11494_v40 }
 0xabb   :  { %11189 = vrot.lane.b32.xlu1 %v10695_v7, %s16659_s0  ;;  %v11492_v7 = vld [vmem:[%s20074_s5 + $0x38] sm:$0xff]  ;;  %16040 = vmatprep.subr.mxu1 %v11493_v35 }
 0xabc   :  { %v15939_v25 = vpop.f32.mrf.mxu1  ;;  %16041 = vmatpush3.msra.mxu1 %v11493_v35 }
 0xabd   :  { %v19202_v25 = vpop.permute.xlu1 %8481  ;;  %16042 = vmatprep.subr.mxu1 %v11492_v7 }
 0xabe   :  { %v10847_v6 = vpop.f32.mrf.mxu1  ;;  %16043 = vmatpush3.msra.mxu1 %v11492_v7 }
 0xabf   :  { %11193 = vrot.lane.b32.xlu1 %v10847_v6, %s16659_s0  ;;  %v11491_v6 = vld [vmem:[%s20074_s5 + $0x30] sm:$0xff] }
 0xac0   :  { %v15949_v60 = vpop.f32.mrf.mxu1  ;;  %16044 = vmatprep.subr.mxu1 %v11491_v6 }
 0xac1   :  { %v20378_v60 = vld [vmem:[#allocation11_spill] sm:$0xff]  ;;  %16045 = vmatpush3.msra.mxu1 %v11491_v6 }
 0xac2   :  { %v10999_v56 = vpop.f32.mrf.mxu1  ;;  %v3044_v52 = vadd.f32 %v20379_v28, %v20378_v60  ;;  %v20387_v6 = vld [vmem:[#allocation51_spill] sm:$0xff] }
 0xac3   :  { %11197 = vrot.lane.b32.xlu1 %v10999_v56, %s16659_s0  ;;  %v5780_v56 = vadd.f32 %v19045_v63, %v20378_v60 }
 0xac4   :  { %v15959_v37 = vpop.f32.mrf.mxu1 }
 0xac5   :  { %v8500_v37 = vadd.f32 %v19049_v62, %v20378_v60  ;;  %v11236_v63 = vsel %vm481_vm3, %v3044_v52, %v5780_v56 }
 0xaee   :  { %v11172_v5 = vpop.permute.xlu0 %11171 }
 0xaef   :  { %v11219_v32 = vadd.f32 %v11172_v5, %v20376_v14  ;;  %v11490_v14 = vld [vmem:[%s20074_s5 + $0x28] sm:$0xff] }
 0xaf0   :  { %16046 = vmatprep.subr.mxu1 %v11490_v14 }
 0xaf1   :  { %v19168_v31 = vsel %vm11268_vm6, %v11252_v8, %v11219_v32  ;;  %v8501_v32 = vadd.f32 %v19111_v12, %v20380_v23  ;;  %v3045_v8 = vadd.f32 %v20381_v58, %v20380_v23  ;;  %16047 = vmatpush3.msra.mxu1 %v11490_v14  ;;  %v20383_v12 = vld [vmem:[#allocation52_spill] sm:$0xff]  ;;  %v20388_v14 = vld [vmem:[#allocation27_spill] sm:$0xff] }
 0xaf2   :  { %16002 = vmatprep.mubr.f32.mxu0 %v19168_v31  ;;  %v5785_v28 = vadd.f32 %v19117_v15, %v20388_v14 }
 0xb05   :  { %v10771_v41 = vpop.f32.mrf.mxu0 }
 0xb06   :  { %11191 = vrot.lane.b32.xlu0 %v10771_v41, %s16659_s0  ;;  %v11253_v41 = vsel %vm11251_vm5, %v11236_v63, %v8500_v37  ;;  %v20389_v63 = vld [vmem:[#allocation53_spill] sm:$0xff] }
 0xb07   :  { %v15944_v55 = vpop.f32.mrf.mxu0 }
 0xb08   :  { %v20382_v55 = vld [vmem:[#allocation16_spill] sm:$0xff] }
 0xb09   :  { %v10923_v2 = vpop.f32.mrf.mxu0  ;;  %v5782_v59 = vadd.f32 %v19051_v29, %v20382_v55  ;;  %v8502_v54 = vadd.f32 %v19053_v46, %v20382_v55  ;;  %v3046_v61 = vadd.f32 %v20383_v12, %v20382_v55  ;;  %v11237_v29 = vsel %vm481_vm3, %v3045_v8, %v5781_v44 }
 0xb0a   :  { %11195 = vrot.lane.b32.xlu0 %v10923_v2, %s16659_s0  ;;  %v8505_v44 = vadd.f32 %v19119_v22, %v20388_v14 }
 0xb0b   :  { %v15954_v24 = vpop.f32.mrf.mxu0  ;;  %v11238_v40 = vsel %vm481_vm3, %v3046_v61, %v5782_v59 }
 0xb0c   :  { %v20384_v24 = vld [vmem:[#allocation19_spill] sm:$0xff]  ;;  %v11255_v56 = vsel %vm11251_vm5, %v11238_v40, %v8502_v54  ;;  %v20391_v54 = vld [vmem:[#allocation34_spill] sm:$0xff] }
 0xb0d   :  { %v11075_v51 = vpop.f32.mrf.mxu0  ;;  %v5783_v27 = vadd.f32 %v19113_v47, %v20384_v24  ;;  %v8503_v46 = vadd.f32 %v19115_v13, %v20384_v24 }
 0xb0e   :  { %11199 = vrot.lane.b32.xlu0 %v11075_v51, %s16659_s0 }
 0xb0f   :  { %v15964_v50 = vpop.f32.mrf.mxu0 }
 0xb10   :  { %v11151_v0 = vpop.f32.mrf.mxu1  ;;  %v3047_v50 = vadd.f32 %v20385_v42, %v20384_v24 }
 0xb11   :  { %11201 = vrot.lane.b32.xlu1 %v11151_v0, %s16659_s0  ;;  %v11254_v0 = vsel %vm11251_vm5, %v11237_v29, %v8501_v32  ;;  %v3049_v32 = vadd.f32 %v20389_v63, %v20388_v14  ;;  %v20393_v29 = vld [vmem:[#allocation62_spill] sm:$0xff]  ;;  %v11486_v63 = vld [vmem:[%s20074_s5 + $0x8] sm:$0xff] }
 0xb12   :  { %v15969_v38 = vpop.f32.mrf.mxu1 }
 0xb13   :  { %v20386_v38 = vld [vmem:[#allocation23_spill] sm:$0xff] }
 0xb14   :  { %v5784_v47 = vadd.f32 %v19055_v34, %v20386_v38  ;;  %v8504_v13 = vadd.f32 %v19057_v57, %v20386_v38 }
 0xb1b   :  { %v11174_v5 = vpop.permute.xlu1 %11173 }
 0xb1c   :  { %v11220_v62 = vadd.f32 %v11174_v5, %v20378_v60  ;;  %v3048_v60 = vadd.f32 %v20387_v6, %v20386_v38 }
 0xb1e   :  { %v19230_v20 = vsel %vm11268_vm6, %v11253_v41, %v11220_v62  ;;  %v11176_v2 = vpop.permute.xlu0 %11175  ;;  %v11240_v15 = vsel %vm481_vm3, %v3048_v60, %v5784_v47  ;;  %v20390_v41 = vld [vmem:[#allocation31_spill] sm:$0xff] }
 0xb1f   :  { %v11221_v51 = vadd.f32 %v11176_v2, %v20380_v23  ;;  %16003 = vmatmul.mubr.f32.vlgmr.msra.gmra.mxu0 %v19230_v20  ;;  %v11239_v23 = vsel %vm481_vm3, %v3047_v50, %v5783_v27  ;;  %v11257_v8 = vsel %vm11251_vm5, %v11240_v15, %v8504_v13  ;;  %v5786_v22 = vadd.f32 %v19059_v19, %v20390_v41  ;;  %v20392_v27 = vld [vmem:[#allocation61_spill] sm:$0xff]  ;;  %v20395_v60 = vld [vmem:[#allocation63_spill] sm:$0xff] }
 0xb20   :  { %v11178_v16 = vpop.permute.xlu1 %11177  ;;  %v11256_v57 = vsel %vm11251_vm5, %v11239_v23, %v8503_v46  ;;  %v5787_v2 = vadd.f32 %v19121_v45, %v20391_v54  ;;  %v8507_v19 = vadd.f32 %v19123_v39, %v20391_v54  ;;  %v3051_v45 = vadd.f32 %v20393_v29, %v20391_v54 }
 0xb21   :  { %v11222_v35 = vadd.f32 %v11178_v16, %v20382_v55  ;;  %v19249_v7 = vsel %vm11268_vm6, %v11254_v0, %v11221_v51  ;;  %v8506_v55 = vadd.f32 %v19061_v4, %v20390_v41  ;;  %v3050_v51 = vadd.f32 %v20392_v27, %v20390_v41  ;;  %v20394_v16 = vld [vmem:[#allocation36_spill] sm:$0xff] }
 0xb22   :  { %v11180_v37 = vpop.permute.xlu0 %11179  ;;  %16005 = vmatprep.mubr.f32.mxu0 %v19249_v7  ;;  %v5788_v0 = vadd.f32 %v19063_v33, %v20394_v16  ;;  %v8508_v47 = vadd.f32 %v19065_v26, %v20394_v16  ;;  %v11243_v6 = vsel %vm481_vm3, %v3051_v45, %v5787_v2 }
 0xb23   :  { %v11223_v34 = vadd.f32 %v11180_v37, %v20384_v24  ;;  %v19261_v52 = vsel %vm11268_vm6, %v11255_v56, %v11222_v35  ;;  %v11241_v24 = vsel %vm481_vm3, %v3049_v32, %v5785_v28  ;;  %v11242_v46 = vsel %vm481_vm3, %v3050_v51, %v5786_v22  ;;  %v11485_v32 = vld [vmem:[%s20074_s5] sm:$0xff] }
 0xb24   :  { %16006 = vmatmul.mubr.f32.gmra.mxu0 %v19261_v52  ;;  %v11182_v5 = vpop.permute.xlu1 %11181  ;;  %v11258_v4 = vsel %vm11251_vm5, %v11241_v24, %v8505_v44  ;;  %v11259_v39 = vsel %vm11251_vm5, %v11242_v46, %v8506_v55  ;;  %v3052_v56 = vadd.f32 %v20395_v60, %v20394_v16  ;;  %v11260_v33 = vsel %vm11251_vm5, %v11243_v6, %v8507_v19  ;;  %v11489_v44 = vld [vmem:[%s20074_s5 + $0x20] sm:$0xff] }
 0xb25   :  { %v11224_v62 = vadd.f32 %v11182_v5, %v20386_v38  ;;  %v19273_v58 = vsel %vm11268_vm6, %v11256_v57, %v11223_v34  ;;  %16048 = vmatprep.subr.mxu1 %v11489_v44  ;;  %v11488_v5 = vld [vmem:[%s20074_s5 + $0x18] sm:$0xff]  ;;  %v11487_v57 = vld [vmem:[%s20074_s5 + $0x10] sm:$0xff]  ;;  %v20397_v22 = vld [vmem:[#allocation64_spill] sm:$0xff] }
 0xb26   :  { %v11184_v59 = vpop.permute.xlu0 %11183  ;;  %16008 = vmatprep.mubr.f32.mxu0 %v19273_v58  ;;  %v11244_v26 = vsel %vm481_vm3, %v3052_v56, %v5788_v0  ;;  %16049 = vmatpush3.msra.mxu1 %v11489_v44 }
 0xb27   :  { %v11225_v12 = vadd.f32 %v11184_v59, %v20388_v14  ;;  %v19285_v61 = vsel %vm11268_vm6, %v11257_v8, %v11224_v62  ;;  %v11261_v34 = vsel %vm11251_vm5, %v11244_v26, %v8508_v47  ;;  %16050 = vmatprep.subr.mxu1 %v11488_v5  ;;  %v20396_v62 = vld [vmem:[#allocation38_spill] sm:$0xff] }
 0xb28   :  { %16009 = vmatmul.mubr.f32.gmra.mxu0 %v19285_v61  ;;  %16051 = vmatpush3.msra.mxu1 %v11488_v5  ;;  %v5789_v8 = vadd.f32 %v19125_v3, %v20396_v62  ;;  %v3053_v55 = vadd.f32 %v20397_v22, %v20396_v62 }
 0xb29   :  { %v11186_v42 = vpop.permute.xlu1 %11185  ;;  %v19297_v50 = vsel %vm11268_vm6, %v11258_v4, %v11225_v12  ;;  %16052 = vmatprep.subr.mxu1 %v11487_v57  ;;  %v8513_v4 = vadd.f32 %v19156_v43, %v20374_v36 }
 0xb2a   :  { %v11226_v40 = vadd.f32 %v11186_v42, %v20390_v41  ;;  %v11188_v38 = vpop.permute.xlu0 %11187  ;;  %16011 = vmatprep.mubr.f32.mxu0 %v19297_v50  ;;  %16053 = vmatpush3.msra.mxu1 %v11487_v57  ;;  %v8509_v41 = vadd.f32 %v19127_v17, %v20396_v62  ;;  %v11245_v24 = vsel %vm481_vm3, %v3053_v55, %v5789_v8 }
 0xb2b   :  { %v11227_v35 = vadd.f32 %v11188_v38, %v20391_v54  ;;  %16054 = vmatprep.subr.mxu1 %v11486_v63  ;;  %v11266_v43 = vsel %vm11251_vm5, %v19142_v1, %v8513_v4 }
 0xb2c   :  { %v19312_v13 = vsel %vm11268_vm6, %v11259_v39, %v11226_v40  ;;  %16055 = vmatpush3.msra.mxu1 %v11486_v63  ;;  %v11262_v27 = vsel %vm11251_vm5, %v11245_v24, %v8509_v41 }
 0xb2d   :  { %16012 = vmatmul.mubr.f32.gmra.mxu0 %v19312_v13  ;;  %v11190_v37 = vpop.permute.xlu1 %11189  ;;  %v19317_v14 = vsel %vm11268_vm6, %v11260_v33, %v11227_v35  ;;  %16056 = vmatprep.subr.mxu1 %v11485_v32 }
 0xb2e   :  { %v11228_v28 = vadd.f32 %v11190_v37, %v20394_v16  ;;  %16014 = vmatprep.mubr.f32.mxu0 %v19317_v14  ;;  %16057 = vmatpush3.msra.mxu1 %v11485_v32 }
 0xb2f   :  { %16087 = vmatprep.subr.mxu1 %v20214_v10 }
 0xb30   :  { %v19324_v23 = vsel %vm11268_vm6, %v11261_v34, %v11228_v28 }
 0xb31   :  { %16015 = vmatmul.mubr.f32.gmra.mxu0 %v19324_v23  ;;  %v11194_v15 = vpop.permute.xlu1 %11193 }
 0xb32   :  { %v11230_v59 = vadd.f32 %v11194_v15, %v20366_v9 }
 0xb34   :  { %v19360_v17 = vsel %vm11268_vm6, %v19073_v11, %v11230_v59  ;;  %v8514_v11 = vadd.f32 %v19202_v25, %v20370_v49 }
 0xb35   :  { %v11198_v2 = vpop.permute.xlu1 %11197 }
 0xb36   :  { %v11232_v3 = vadd.f32 %v11198_v2, %v20368_v53 }
 0xb38   :  { %v19373_v53 = vsel %vm11268_vm6, %v19082_v48, %v11232_v3  ;;  %v11267_v48 = vsel %vm11251_vm5, %v19091_v30, %v8514_v11 }
 0xb78   :  { %v11192_v54 = vpop.permute.xlu0 %11191 }
 0xb79   :  { %v11229_v12 = vadd.f32 %v11192_v54, %v20396_v62 }
 0xb7b   :  { %v19354_v51 = vsel %vm11268_vm6, %v11262_v27, %v11229_v12 }
 0xb7c   :  { %v11196_v19 = vpop.permute.xlu0 %11195  ;;  %16017 = vmatprep.mubr.f32.mxu0 %v19354_v51 }
 0xb7d   :  { %v11231_v9 = vadd.f32 %v11196_v19, %v20372_v21  ;;  %16018 = vmatmul.mubr.f32.gmra.mxu0 %v19360_v17 }
 0xb7f   :  { %v19368_v29 = vsel %vm11268_vm6, %v19136_v18, %v11231_v9 }
 0xb80   :  { %v11200_v45 = vpop.permute.xlu0 %11199  ;;  %16020 = vmatprep.mubr.f32.mxu0 %v19368_v29 }
 0xb81   :  { %v11233_v21 = vadd.f32 %v11200_v45, %v20374_v36  ;;  %16021 = vmatmul.mubr.f32.gmra.mxu0 %v19373_v53  ;;  %v19397_v36 = vld [vmem:[%s20073_s4] ss:$0 sm:$0xff] }
 0xb83   :  { %v11202_v42 = vpop.permute.xlu1 %11201  ;;  %v19382_v18 = vsel %vm11268_vm6, %v11266_v43, %v11233_v21 }
 0xb84   :  { %v11234_v46 = vadd.f32 %v11202_v42, %v20370_v49  ;;  %16023 = vmatprep.mubr.f32.mxu0 %v19382_v18 }
 0xb86   :  { %v19389_v25 = vsel %vm11268_vm6, %v11267_v48, %v11234_v46 }
 0xb87   :  { %16024 = vmatmul.mubr.f32.gmra.mxu0 %v19389_v25 }
 0xb88   :  { %16084 = vmatprep.mubr.msk.f32.mxu0 %vm16658_vm2, %v20214_v10 }
 0xbdf   :  { %v16004_v1 = vpop.f32.mrf.mxu0 }
 0xbe0   :  { %v11380_v49 = vadd.f32 %v16004_v1, %v19397_v36 }
 0xbe1   :  { %v11374_v16 = vpop.f32.mrf.mxu0 }
 0xbe2   :  { %v11375_v0 = vadd.f32 %v19397_v36, %v11374_v16  ;;  %v11454_v30 = vmax.f32 %v11380_v49, 0.0 }
 0xbe4   :  { %v11453_v40 = vmax.f32 %v11375_v0, 0.0  ;;  %v16007_v38 = vpop.f32.mrf.mxu0  ;;  %v11470_v6 = vadd.f32 %v11454_v30, %v19230_v20 }
 0xbe5   :  { %v11390_v39 = vadd.f32 %v16007_v38, %v19397_v36 }
 0xbe6   :  { %v11469_v47 = vadd.f32 %v11453_v40, %v19168_v31  ;;  %v11384_v35 = vpop.f32.mrf.mxu0 }
 0xbe7   :  { %v11385_v60 = vadd.f32 %v19397_v36, %v11384_v35  ;;  %v11456_v56 = vmax.f32 %v11390_v39, 0.0 }
 0xbe8   :  { %v16010_v33 = vpop.f32.mrf.mxu0  ;;  %16058 = vmatprep.mubr.f32.mxu1 %v11469_v47 }
 0xbe9   :  { %v11455_v37 = vmax.f32 %v11385_v60, 0.0  ;;  %v11400_v26 = vadd.f32 %v16010_v33, %v19397_v36  ;;  %16059 = vmatmul.mubr.f32.vlgmr.msra.gmra.mxu1 %v11470_v6  ;;  %v11472_v5 = vadd.f32 %v11456_v56, %v19261_v52 }
 0xbea   :  { %v11394_v28 = vpop.f32.mrf.mxu0 }
 0xbeb   :  { %v11471_v34 = vadd.f32 %v11455_v37, %v19249_v7  ;;  %v11395_v44 = vadd.f32 %v19397_v36, %v11394_v28  ;;  %v11458_v31 = vmax.f32 %v11400_v26, 0.0 }
 0xbed   :  { %v11457_v57 = vmax.f32 %v11395_v44, 0.0  ;;  %v16013_v63 = vpop.f32.mrf.mxu0  ;;  %16061 = vmatprep.mubr.f32.mxu1 %v11471_v34  ;;  %v11474_v62 = vadd.f32 %v11458_v31, %v19285_v61 }
 0xbee   :  { %v11410_v20 = vadd.f32 %v16013_v63, %v19397_v36  ;;  %16062 = vmatmul.mubr.f32.gmra.mxu1 %v11472_v5 }
 0xbef   :  { %v11473_v32 = vadd.f32 %v11457_v57, %v19273_v58  ;;  %v11404_v15 = vpop.f32.mrf.mxu0 }
 0xbf0   :  { %v11405_v8 = vadd.f32 %v19397_v36, %v11404_v15  ;;  %v11460_v41 = vmax.f32 %v11410_v20, 0.0 }
 0xbf1   :  { %v16016_v7 = vpop.f32.mrf.mxu0  ;;  %16064 = vmatprep.mubr.f32.mxu1 %v11473_v32 }
 0xbf2   :  { %v11459_v22 = vmax.f32 %v11405_v8, 0.0  ;;  %v11420_v52 = vadd.f32 %v16016_v7, %v19397_v36  ;;  %16065 = vmatmul.mubr.f32.gmra.mxu1 %v11474_v62  ;;  %v11476_v2 = vadd.f32 %v11460_v41, %v19312_v13 }
 0xbf3   :  { %v11414_v55 = vpop.f32.mrf.mxu0 }
 0xbf4   :  { %v11475_v59 = vadd.f32 %v11459_v22, %v19297_v50  ;;  %v11415_v54 = vadd.f32 %v19397_v36, %v11414_v55  ;;  %v11462_v58 = vmax.f32 %v11420_v52, 0.0 }
 0xbf6   :  { %v11461_v12 = vmax.f32 %v11415_v54, 0.0  ;;  %16067 = vmatprep.mubr.f32.mxu1 %v11475_v59  ;;  %v11478_v24 = vadd.f32 %v11462_v58, %v19324_v23 }
 0xbf7   :  { %16068 = vmatmul.mubr.f32.gmra.mxu1 %v11476_v2 }
 0xbf8   :  { %v11477_v61 = vadd.f32 %v11461_v12, %v19317_v14 }
 0xbfa   :  { %16070 = vmatprep.mubr.f32.mxu1 %v11477_v61 }
 0xbfb   :  { %16071 = vmatmul.mubr.f32.gmra.mxu1 %v11478_v24 }
 0xc3d   :  { %v16019_v27 = vpop.f32.mrf.mxu0 }
 0xc3e   :  { %v11430_v3 = vadd.f32 %v16019_v27, %v19397_v36 }
 0xc3f   :  { %v11424_v19 = vpop.f32.mrf.mxu0 }
 0xc40   :  { %v11425_v50 = vadd.f32 %v19397_v36, %v11424_v19  ;;  %v11464_v9 = vmax.f32 %v11430_v3, 0.0 }
 0xc41   :  { %v16022_v4 = vpop.f32.mrf.mxu0 }
 0xc42   :  { %v11463_v45 = vmax.f32 %v11425_v50, 0.0  ;;  %v11440_v13 = vadd.f32 %v16022_v4, %v19397_v36  ;;  %v11480_v23 = vadd.f32 %v11464_v9, %v19360_v17 }
 0xc43   :  { %v11434_v11 = vpop.f32.mrf.mxu0 }
 0xc44   :  { %v11479_v21 = vadd.f32 %v11463_v45, %v19354_v51  ;;  %v11435_v14 = vadd.f32 %v19397_v36, %v11434_v11  ;;  %v11466_v43 = vmax.f32 %v11440_v13, 0.0 }
 0xc46   :  { %v11465_v42 = vmax.f32 %v11435_v14, 0.0  ;;  %16073 = vmatprep.mubr.f32.mxu1 %v11479_v21  ;;  %v11482_v49 = vadd.f32 %v11466_v43, %v19373_v53 }
 0xc47   :  { %v16025_v46 = vpop.f32.mrf.mxu0  ;;  %16074 = vmatmul.mubr.f32.gmra.mxu1 %v11480_v23 }
 0xc48   :  { %v11481_v48 = vadd.f32 %v11465_v42, %v19368_v29  ;;  %v11450_v1 = vadd.f32 %v16025_v46, %v19397_v36  ;;  %v14811_v29 = vld [vmem:[%s20075_s6] ss:$0 sm:$0xff] }
 0xc49   :  { %v11444_v16 = vpop.f32.mrf.mxu0 }
 0xc4a   :  { %v11445_v0 = vadd.f32 %v19397_v36, %v11444_v16  ;;  %16076 = vmatprep.mubr.f32.mxu1 %v11481_v48  ;;  %v11468_v51 = vmax.f32 %v11450_v1, 0.0 }
 0xc4b   :  { %16077 = vmatmul.mubr.f32.gmra.mxu1 %v11482_v49 }
 0xc4c   :  { %v11467_v30 = vmax.f32 %v11445_v0, 0.0  ;;  %v11484_v40 = vadd.f32 %v11468_v51, %v19389_v25 }
 0xc4e   :  { %v11483_v17 = vadd.f32 %v11467_v30, %v19382_v18 }
 0xc50   :  { %16079 = vmatprep.mubr.f32.mxu1 %v11483_v17 }
 0xc51   :  { %16080 = vmatmul.mubr.f32.gmra.mxu1 %v11484_v40 }
 0xc52   :  { %16089 = vmatprep.mubr.msk.f32.mxu1 %vm16658_vm2, %v20214_v10 }
 0xca9   :  { %v16060_v53 = vpop.f32.mrf.mxu1 }
 0xcaa   :  { %v19436_v38 = vadd.f32 %v16060_v53, %v14811_v29 }
 0xcab   :  { %v11574_v36 = vpop.f32.mrf.mxu1 }
 0xcac   :  { %v19438_v39 = vadd.f32 %v14811_v29, %v11574_v36  ;;  %11748 = vrot.lane.b32.xlu1 %v19436_v38, %s16659_s0  ;;  %v11654_v2 = vmul.f32 0.17677669, %v19436_v38 }
 0xcae   :  { %v16063_v18 = vpop.f32.mrf.mxu1  ;;  %11670 = vrot.lane.b32.xlu0 %v19438_v39, %s16659_s0  ;;  %v11653_v12 = vmul.f32 0.17677669, %v19438_v39 }
 0xcaf   :  { %v19444_v25 = vadd.f32 %v16063_v18, %v14811_v29 }
 0xcb0   :  { %v11584_v47 = vpop.f32.mrf.mxu1 }
 0xcb1   :  { %v19446_v35 = vadd.f32 %v14811_v29, %v11584_v47  ;;  %11904 = vrot.lane.b32.xlu1 %v19444_v25, %s16659_s0  ;;  %v11656_v24 = vmul.f32 0.17677669, %v19444_v25 }
 0xcb2   :  { %v16066_v6 = vpop.f32.mrf.mxu1 }
 0xcb3   :  { %v19450_v60 = vadd.f32 %v16066_v6, %v14811_v29  ;;  %11826 = vrot.lane.b32.xlu0 %v19446_v35, %s16659_s0  ;;  %v11655_v3 = vmul.f32 0.17677669, %v19446_v35 }
 0xcb4   :  { %v11594_v56 = vpop.f32.mrf.mxu1 }
 0xcb5   :  { %v19454_v33 = vadd.f32 %v14811_v29, %v11594_v56  ;;  %12060 = vrot.lane.b32.xlu1 %v19450_v60, %s16659_s0  ;;  %v11658_v50 = vmul.f32 0.17677669, %v19450_v60 }
 0xcb7   :  { %v16069_v37 = vpop.f32.mrf.mxu1  ;;  %11982 = vrot.lane.b32.xlu0 %v19454_v33, %s16659_s0  ;;  %v11657_v4 = vmul.f32 0.17677669, %v19454_v33 }
 0xcb8   :  { %v19460_v26 = vadd.f32 %v16069_v37, %v14811_v29 }
 0xcb9   :  { %v11604_v28 = vpop.f32.mrf.mxu1 }
 0xcba   :  { %v19462_v34 = vadd.f32 %v14811_v29, %v11604_v28  ;;  %12216 = vrot.lane.b32.xlu1 %v19460_v26, %s16659_s0  ;;  %v11660_v13 = vmul.f32 0.17677669, %v19460_v26 }
 0xcbb   :  { %v16072_v44 = vpop.f32.mrf.mxu1 }
 0xcbc   :  { %v19466_v5 = vadd.f32 %v16072_v44, %v14811_v29  ;;  %12138 = vrot.lane.b32.xlu0 %v19462_v34, %s16659_s0  ;;  %v11659_v21 = vmul.f32 0.17677669, %v19462_v34 }
 0xcbd   :  { %v11614_v31 = vpop.f32.mrf.mxu1 }
 0xcbe   :  { %v19470_v57 = vadd.f32 %v14811_v29, %v11614_v31  ;;  %12372 = vrot.lane.b32.xlu1 %v19466_v5, %s16659_s0  ;;  %v11662_v23 = vmul.f32 0.17677669, %v19466_v5 }
 0xcc0   :  { %12294 = vrot.lane.b32.xlu0 %v19470_v57, %s16659_s0  ;;  %v11661_v42 = vmul.f32 0.17677669, %v19470_v57 }
 0xd07   :  { %v16075_v63 = vpop.f32.mrf.mxu1 }
 0xd08   :  { %v19476_v20 = vadd.f32 %v16075_v63, %v14811_v29 }
 0xd09   :  { %v11624_v32 = vpop.f32.mrf.mxu1 }
 0xd0a   :  { %v19478_v15 = vadd.f32 %v14811_v29, %v11624_v32  ;;  %12528 = vrot.lane.b32.xlu1 %v19476_v20, %s16659_s0  ;;  %v11664_v48 = vmul.f32 0.17677669, %v19476_v20 }
 0xd0b   :  { %v16078_v62 = vpop.f32.mrf.mxu1 }
 0xd0c   :  { %v19482_v8 = vadd.f32 %v16078_v62, %v14811_v29  ;;  %12450 = vrot.lane.b32.xlu0 %v19478_v15, %s16659_s0  ;;  %v11663_v49 = vmul.f32 0.17677669, %v19478_v15 }
 0xd0d   :  { %v11634_v41 = vpop.f32.mrf.mxu1 }
 0xd0e   :  { %v19486_v7 = vadd.f32 %v14811_v29, %v11634_v41  ;;  %12684 = vrot.lane.b32.xlu1 %v19482_v8, %s16659_s0  ;;  %v11666_v0 = vmul.f32 0.17677669, %v19482_v8 }
 0xd10   :  { %12606 = vrot.lane.b32.xlu0 %v19486_v7, %s16659_s0  ;;  %v11665_v30 = vmul.f32 0.17677669, %v19486_v7 }
 0xd11   :  { %v16081_v22 = vpop.f32.mrf.mxu1 }
 0xd12   :  { %v19492_v52 = vadd.f32 %v16081_v22, %v14811_v29 }
 0xd13   :  { %v11644_v55 = vpop.f32.mrf.mxu1 }
 0xd14   :  { %v19494_v59 = vadd.f32 %v14811_v29, %v11644_v55  ;;  %12840 = vrot.lane.b32.xlu1 %v19492_v52, %s16659_s0  ;;  %v11668_v40 = vmul.f32 0.17677669, %v19492_v52 }
 0xd16   :  { %12762 = vrot.lane.b32.xlu0 %v19494_v59, %s16659_s0  ;;  %v11667_v53 = vmul.f32 0.17677669, %v19494_v59 }
 0xd1a   :  { %13169 = vrot.lane.b32.xlu0 %v19436_v38, %s16660_s24 }
 0xd1e   :  { %v11749_v54 = vpop.permute.xlu1 %11748  ;;  %13245 = vrot.lane.b32.xlu0 %v19446_v35, %s16660_s24 }
 0xd1f   :  { %16088 = vmatpush3.xpose.msk.msra.mxu1 %vm481_vm3, %v11749_v54 }
 0xd20   :  { %v11671_v58 = vpop.permute.xlu0 %11670  ;;  %16097 = vmatprep.subr.mxu1 %v20214_v10 }
 0xd21   :  { %16083 = vmatpush3.xpose.msk.msra.mxu0 %vm481_vm3, %v11671_v58 }
 0xd22   :  { %16090 = vmatmul.mubr.msk.f32.vlgmr.msra.gmra.mxu1 %vm481_vm3, %v11654_v2  ;;  %13321 = vrot.lane.b32.xlu0 %v19444_v25, %s16660_s24 }
 0xd23   :  { %v11905_v61 = vpop.permute.xlu1 %11904  ;;  %16092 = vmatprep.subr.mxu0 %v20214_v10  ;;  %16099 = vmatprep.mubr.msk.f32.mxu1 %vm16658_vm2, %v20214_v10 }
 0xd24   :  { %16098 = vmatpush3.xpose.msk.msra.mxu1 %vm481_vm3, %v11905_v61  ;;  %16085 = vmatmul.mubr.msk.f32.vlgmr.msra.gmra.mxu0 %vm481_vm3, %v11653_v12 }
 0xd25   :  { %v11827_v27 = vpop.permute.xlu0 %11826  ;;  %16107 = vmatprep.subr.mxu1 %v20214_v10  ;;  %16094 = vmatprep.mubr.msk.f32.mxu0 %vm16658_vm2, %v20214_v10 }
 0xd26   :  { %16093 = vmatpush3.xpose.msk.msra.mxu0 %vm481_vm3, %v11827_v27  ;;  %13397 = vrot.lane.b32.xlu0 %v19454_v33, %s16660_s24 }
 0xd27   :  { %16100 = vmatmul.mubr.msk.f32.vlgmr.msra.gmra.mxu1 %vm481_vm3, %v11656_v24  ;;  %v12061_v19 = vpop.permute.xlu1 %12060  ;;  %16102 = vmatprep.subr.mxu0 %v20214_v10 }
 0xd28   :  { %16108 = vmatpush3.xpose.msk.msra.mxu1 %vm481_vm3, %v12061_v19  ;;  %16109 = vmatprep.mubr.msk.f32.mxu1 %vm16658_vm2, %v20214_v10 }
 0xd29   :  { %v11983_v9 = vpop.permute.xlu0 %11982  ;;  %16095 = vmatmul.mubr.msk.f32.vlgmr.msra.gmra.mxu0 %vm481_vm3, %v11655_v3  ;;  %16117 = vmatprep.subr.mxu1 %v20214_v10 }
 0xd2a   :  { %16103 = vmatpush3.xpose.msk.msra.mxu0 %vm481_vm3, %v11983_v9  ;;  %13473 = vrot.lane.b32.xlu0 %v19450_v60, %s16660_s24 }
 0xd2b   :  { %16110 = vmatmul.mubr.msk.f32.vlgmr.msra.gmra.mxu1 %vm481_vm3, %v11658_v50  ;;  %16104 = vmatprep.mubr.msk.f32.mxu0 %vm16658_vm2, %v20214_v10 }
 0xd2c   :  { %v12217_v45 = vpop.permute.xlu1 %12216  ;;  %16112 = vmatprep.subr.mxu0 %v20214_v10  ;;  %16119 = vmatprep.mubr.msk.f32.mxu1 %vm16658_vm2, %v20214_v10 }
 0xd2d   :  { %16118 = vmatpush3.xpose.msk.msra.mxu1 %vm481_vm3, %v12217_v45  ;;  %16105 = vmatmul.mubr.msk.f32.vlgmr.msra.gmra.mxu0 %vm481_vm3, %v11657_v4 }
 0xd2e   :  { %v12139_v11 = vpop.permute.xlu0 %12138  ;;  %16127 = vmatprep.subr.mxu1 %v20214_v10  ;;  %13549 = vrot.lane.b32.xlu0 %v19462_v34, %s16660_s24 }
 0xd2f   :  { %16113 = vmatpush3.xpose.msk.msra.mxu0 %vm481_vm3, %v12139_v11  ;;  %16114 = vmatprep.mubr.msk.f32.mxu0 %vm16658_vm2, %v20214_v10 }
 0xd30   :  { %16120 = vmatmul.mubr.msk.f32.vlgmr.msra.gmra.mxu1 %vm481_vm3, %v11660_v13  ;;  %v12373_v14 = vpop.permute.xlu1 %12372  ;;  %16122 = vmatprep.subr.mxu0 %v20214_v10 }
 0xd31   :  { %16128 = vmatpush3.xpose.msk.msra.mxu1 %vm481_vm3, %v12373_v14  ;;  %16129 = vmatprep.mubr.msk.f32.mxu1 %vm16658_vm2, %v20214_v10 }
 0xd32   :  { %v12295_v43 = vpop.permute.xlu0 %12294  ;;  %16115 = vmatmul.mubr.msk.f32.vlgmr.msra.gmra.mxu0 %vm481_vm3, %v11659_v21  ;;  %13625 = vrot.lane.b32.xlu0 %v19460_v26, %s16660_s24 }
 0xd33   :  { %16123 = vmatpush3.xpose.msk.msra.mxu0 %vm481_vm3, %v12295_v43  ;;  %16124 = vmatprep.mubr.msk.f32.mxu0 %vm16658_vm2, %v20214_v10 }
 0xd34   :  { %16130 = vmatmul.mubr.msk.f32.vlgmr.msra.gmra.mxu1 %vm481_vm3, %v11662_v23  ;;  %16137 = vmatprep.subr.mxu1 %v20214_v10 }
 0xd35   :  { %16132 = vmatprep.subr.mxu0 %v20214_v10  ;;  %16139 = vmatprep.mubr.msk.f32.mxu1 %vm16658_vm2, %v20214_v10 }
 0xd36   :  { %16125 = vmatmul.mubr.msk.f32.vlgmr.msra.gmra.mxu0 %vm481_vm3, %v11661_v42  ;;  %13701 = vrot.lane.b32.xlu0 %v19470_v57, %s16660_s24 }
 0xd37   :  { %16134 = vmatprep.mubr.msk.f32.mxu0 %vm16658_vm2, %v20214_v10 }
 0xd7c   :  { %v12529_v46 = vpop.permute.xlu1 %12528 }
 0xd7d   :  { %16138 = vmatpush3.xpose.msk.msra.mxu1 %vm481_vm3, %v12529_v46 }
 0xd7e   :  { %v12451_v1 = vpop.permute.xlu0 %12450  ;;  %16147 = vmatprep.subr.mxu1 %v20214_v10 }
 0xd7f   :  { %16133 = vmatpush3.xpose.msk.msra.mxu0 %vm481_vm3, %v12451_v1 }
 0xd80   :  { %16140 = vmatmul.mubr.msk.f32.vlgmr.msra.gmra.mxu1 %vm481_vm3, %v11664_v48  ;;  %v12685_v16 = vpop.permute.xlu1 %12684  ;;  %16142 = vmatprep.subr.mxu0 %v20214_v10 }
 0xd81   :  { %16148 = vmatpush3.xpose.msk.msra.mxu1 %vm481_vm3, %v12685_v16  ;;  %16149 = vmatprep.mubr.msk.f32.mxu1 %vm16658_vm2, %v20214_v10 }
 0xd82   :  { %v12607_v51 = vpop.permute.xlu0 %12606  ;;  %16135 = vmatmul.mubr.msk.f32.vlgmr.msra.gmra.mxu0 %vm481_vm3, %v11663_v49  ;;  %16157 = vmatprep.subr.mxu1 %v20214_v10 }
 0xd83   :  { %16143 = vmatpush3.xpose.msk.msra.mxu0 %vm481_vm3, %v12607_v51  ;;  %16144 = vmatprep.mubr.msk.f32.mxu0 %vm16658_vm2, %v20214_v10 }
 0xd84   :  { %16150 = vmatmul.mubr.msk.f32.vlgmr.msra.gmra.mxu1 %vm481_vm3, %v11666_v0  ;;  %16152 = vmatprep.subr.mxu0 %v20214_v10 }
 0xd85   :  { %16159 = vmatprep.mubr.msk.f32.mxu1 %vm16658_vm2, %v20214_v10 }
 0xd86   :  { %v12841_v17 = vpop.permute.xlu1 %12840  ;;  %16145 = vmatmul.mubr.msk.f32.vlgmr.msra.gmra.mxu0 %vm481_vm3, %v11665_v30 }
 0xd87   :  { %16158 = vmatpush3.xpose.msk.msra.mxu1 %vm481_vm3, %v12841_v17  ;;  %16154 = vmatprep.mubr.msk.f32.mxu0 %vm16658_vm2, %v20214_v10 }
 0xd88   :  { %v12763_v29 = vpop.permute.xlu0 %12762  ;;  %16167 = vmatprep.subr.mxu1 %v20214_v10 }
 0xd89   :  { %16153 = vmatpush3.xpose.msk.msra.mxu0 %vm481_vm3, %v12763_v29 }
 0xd8a   :  { %16160 = vmatmul.mubr.msk.f32.vlgmr.msra.gmra.mxu1 %vm481_vm3, %v11668_v40  ;;  %16162 = vmatprep.subr.mxu0 %v20214_v10 }
 0xd8b   :  { %16169 = vmatprep.mubr.msk.f32.mxu1 %vm16658_vm2, %v20214_v10 }
 0xd8c   :  { %v13170_v36 = vpop.permute.xlu0 %13169  ;;  %16155 = vmatmul.mubr.msk.f32.vlgmr.msra.gmra.mxu0 %vm481_vm3, %v11667_v53 }
 0xd8d   :  { %16168 = vmatpush3.msra.mxu1 %v13170_v36  ;;  %16164 = vmatprep.mubr.msk.f32.mxu0 %vm16658_vm2, %v20214_v10 }
 0xd8e   :  { %16177 = vmatprep.subr.mxu1 %v20214_v10 }
 0xd90   :  { %v19669_v51 = vpop.permute.xlu0 %13245 }
 0xde2   :  { %v19613_v18 = vpop.f32.mrf.mxu1 }
 0xde3   :  { %v12920_v47 = vsel %vm1698_vm4, %v19613_v18, -inf }
 0xde4   :  { %12921 = vmax.xlane.f32.xlu1 %v12920_v47  ;;  %v19617_v6 = vpop.f32.mrf.mxu0  ;;  %v16091_v56 = vpop.f32.mrf.mxu1 }
 0xde5   :  { %v12917_v37 = vsel %vm1698_vm4, %v19617_v6, -inf  ;;  %v19679_v47 = vpop.permute.xlu0 %13321 }
 0xde6   :  { %12918 = vmax.xlane.f32.xlu0 %v12917_v37  ;;  %v16086_v28 = vpop.f32.mrf.mxu0 }
 0xde7   :  { %v19621_v44 = vpop.f32.mrf.mxu1 }
 0xde8   :  { %v12926_v32 = vsel %vm1698_vm4, %v19621_v44, -inf }
 0xde9   :  { %v19623_v31 = vpop.f32.mrf.mxu0  ;;  %v16101_v63 = vpop.f32.mrf.mxu1 }
 0xdea   :  { %12927 = vmax.xlane.f32.xlu0 %v12926_v32  ;;  %v12923_v54 = vsel %vm1698_vm4, %v19623_v31, -inf  ;;  %v19683_v28 = vpop.permute.xlu0 %13397 }
 0xdeb   :  { %v19627_v62 = vpop.f32.mrf.mxu1  ;;  %v16096_v41 = vpop.f32.mrf.mxu0 }
 0xdec   :  { %v12932_v12 = vsel %vm1698_vm4, %v19627_v62, -inf }
 0xded   :  { %v19629_v22 = vpop.f32.mrf.mxu0  ;;  %v16111_v55 = vpop.f32.mrf.mxu1 }
 0xdee   :  { %12924 = vmax.xlane.f32.xlu0 %v12923_v54  ;;  %v12929_v13 = vsel %vm1698_vm4, %v19629_v22, -inf  ;;  %v19685_v63 = vpop.permute.xlu0 %13473 }
 0xdef   :  { %v16106_v2 = vpop.f32.mrf.mxu0 }
 0xdf0   :  { %v19633_v58 = vpop.f32.mrf.mxu1 }
 0xdf1   :  { %v12938_v19 = vsel %vm1698_vm4, %v19633_v58, -inf }
 0xdf2   :  { %v19637_v61 = vpop.f32.mrf.mxu0  ;;  %v16121_v24 = vpop.f32.mrf.mxu1  ;;  %12933 = vmax.xlane.f32.xlu0 %v12932_v12 }
 0xdf3   :  { %v12935_v11 = vsel %vm1698_vm4, %v19637_v61, -inf  ;;  %v19687_v32 = vpop.permute.xlu0 %13549 }
 0xdf4   :  { %v19639_v27 = vpop.f32.mrf.mxu1  ;;  %v16116_v3 = vpop.f32.mrf.mxu0 }
 0xdf5   :  { %13093 = vrot.lane.b32.xlu1 %v19438_v39, %s16660_s24  ;;  %v12944_v45 = vsel %vm1698_vm4, %v19639_v27, -inf }
 0xdf6   :  { %v19645_v50 = vpop.f32.mrf.mxu0  ;;  %v16131_v9 = vpop.f32.mrf.mxu1  ;;  %12939 = vmax.xlane.f32.xlu0 %v12938_v19 }
 0xdf7   :  { %v12941_v21 = vsel %vm1698_vm4, %v19645_v50, -inf  ;;  %v19693_v41 = vpop.permute.xlu0 %13625 }
 0xdf8   :  { %v16126_v4 = vpop.f32.mrf.mxu0 }
 0xdfa   :  { %12945 = vmax.xlane.f32.xlu0 %v12944_v45 }
 0xdfb   :  { %v19699_v55 = vpop.permute.xlu0 %13701 }
 0xe19   :  { %12930 = vmax.xlane.f32.xlu1 %v12929_v13 }
 0xe1d   :  { %12936 = vmax.xlane.f32.xlu1 %v12935_v11 }
 0xe21   :  { %12942 = vmax.xlane.f32.xlu1 %v12941_v21 }
 0xe40   :  { %v19655_v14 = vpop.f32.mrf.mxu1 }
 0xe41   :  { %v12950_v23 = vsel %vm1698_vm4, %v19655_v14, -inf }
 0xe42   :  { %v16141_v43 = vpop.f32.mrf.mxu1  ;;  %12951 = vmax.xlane.f32.xlu0 %v12950_v23  ;;  %v19659_v42 = vpop.f32.mrf.mxu0 }
 0xe43   :  { %v12947_v46 = vsel %vm1698_vm4, %v19659_v42, -inf }
 0xe44   :  { %v19663_v48 = vpop.f32.mrf.mxu1  ;;  %12948 = vmax.xlane.f32.xlu1 %v12947_v46  ;;  %v16136_v1 = vpop.f32.mrf.mxu0 }
 0xe45   :  { %v12956_v49 = vsel %vm1698_vm4, %v19663_v48, -inf }
 0xe46   :  { %v16151_v16 = vpop.f32.mrf.mxu1  ;;  %12957 = vmax.xlane.f32.xlu0 %v12956_v49  ;;  %v19667_v0 = vpop.f32.mrf.mxu0 }
 0xe47   :  { %v12953_v30 = vsel %vm1698_vm4, %v19667_v0, -inf }
 0xe48   :  { %12954 = vmax.xlane.f32.xlu1 %v12953_v30  ;;  %v16146_v17 = vpop.f32.mrf.mxu0 }
 0xe4a   :  { %v19673_v40 = vpop.f32.mrf.mxu1 }
 0xe4b   :  { %v12962_v29 = vsel %vm1698_vm4, %v19673_v40, -inf }
 0xe4c   :  { %v16161_v53 = vpop.f32.mrf.mxu1  ;;  %12963 = vmax.xlane.f32.xlu0 %v12962_v29  ;;  %v19677_v36 = vpop.f32.mrf.mxu0 }
 0xe4d   :  { %v12959_v56 = vsel %vm1698_vm4, %v19677_v36, -inf }
 0xe4e   :  { %12960 = vmax.xlane.f32.xlu1 %v12959_v56  ;;  %v16156_v37 = vpop.f32.mrf.mxu0 }
 0xe5f   :  { %13777 = vrot.lane.b32.xlu1 %v19466_v5, %s16660_s24 }
 0xe62   :  { %13853 = vrot.lane.b32.xlu0 %v19478_v15, %s16660_s24 }
 0xe66   :  { %13929 = vrot.lane.b32.xlu0 %v19476_v20, %s16660_s24 }
 0xe6a   :  { %14005 = vrot.lane.b32.xlu0 %v19486_v7, %s16660_s24 }
 0xe6d   :  { %v12922_v54 = vpop.xlane.xlu1 %12921 }
 0xe6e   :  { %14081 = vrot.lane.b32.xlu0 %v19482_v8, %s16660_s24  ;;  %v12966_v19 = vsub.f32 %v19613_v18, %v12922_v54 }
 0xe6f   :  { %v12919_v2 = vpop.xlane.xlu0 %12918 }
 0xe70   :  { %v12965_v12 = vsub.f32 %v19617_v6, %v12919_v2  ;;  %v12983_v4 = vmul.f32 1.442695, %v12966_v19 }
 0xe71   :  { %v13094_v24 = vpop.permute.xlu1 %13093 }
 0xe72   :  { %v12981_v3 = vmul.f32 1.442695, %v12965_v12  ;;  %16163 = vmatpush3.msra.mxu0 %v13094_v24 }
 0xe73   :  { %v12928_v9 = vpop.xlane.xlu0 %12927  ;;  %16172 = vmatprep.subr.mxu0 %v20214_v10 }
 0xe74   :  { %16545 = vpow2.f32 %v12981_v3  ;;  %v12968_v13 = vsub.f32 %v19621_v44, %v12928_v9 }
 0xe75   :  { %16547 = vpow2.f32 %v12983_v4 }
 0xe76   :  { %v12987_v43 = vmul.f32 1.442695, %v12968_v13 }
 0xe77   :  { %v12925_v45 = vpop.xlane.xlu0 %12924 }
 0xe78   :  { %v12967_v11 = vsub.f32 %v19623_v31, %v12925_v45 }
 0xe7a   :  { %v12985_v21 = vmul.f32 1.442695, %v12967_v11 }
 0xe7b   :  { %v12934_v23 = vpop.xlane.xlu0 %12933 }
 0xe7c   :  { %16549 = vpow2.f32 %v12985_v21  ;;  %v12970_v6 = vsub.f32 %v19627_v62, %v12934_v23 }
 0xe7d   :  { %16551 = vpow2.f32 %v12987_v43 }
 0xe7e   :  { %v12991_v18 = vmul.f32 1.442695, %v12970_v6 }
 0xe7f   :  { %v12940_v46 = vpop.xlane.xlu0 %12939 }
 0xe80   :  { %v12972_v1 = vsub.f32 %v19633_v58, %v12940_v46  ;;  %16553 = vpow2.f32 %v12991_v18 }
 0xe81   :  { %v19710_v49 = vpop.eup %16545 }
 0xe82   :  { %v13013_v16 = vsel %vm1698_vm4, %v19710_v49, 0.0  ;;  %v12995_v31 = vmul.f32 1.442695, %v12972_v1  ;;  %v19715_v17 = vpop.eup %16547 }
 0xe83   :  { %v12946_v44 = vpop.xlane.xlu0 %12945  ;;  %13014 = vadd.xlane.f32.xlu1 %v13013_v16  ;;  %v13016_v53 = vsel %vm1698_vm4, %v19715_v17, 0.0 }
 0xe84   :  { %v12974_v30 = vsub.f32 %v19639_v27, %v12946_v44  ;;  %16555 = vpow2.f32 %v12995_v31 }
 0xe86   :  { %v12999_v62 = vmul.f32 1.442695, %v12974_v30 }
 0xe88   :  { %16557 = vpow2.f32 %v12999_v62 }
 0xe89   :  { %v19717_v29 = vpop.eup %16549 }
 0xe8a   :  { %v13019_v58 = vsel %vm1698_vm4, %v19717_v29, 0.0  ;;  %v19723_v56 = vpop.eup %16551 }
 0xe8b   :  { %13020 = vadd.xlane.f32.xlu1 %v13019_v58  ;;  %v13022_v27 = vsel %vm1698_vm4, %v19723_v56, 0.0 }
 0xe8d   :  { %13017 = vadd.xlane.f32.xlu0 %v13016_v53  ;;  %v19727_v37 = vpop.eup %16553 }
 0xe8e   :  { %v13028_v54 = vsel %vm1698_vm4, %v19727_v37, 0.0 }
 0xe91   :  { %13023 = vadd.xlane.f32.xlu0 %v13022_v27  ;;  %v19731_v2 = vpop.eup %16555 }
 0xe92   :  { %v13034_v12 = vsel %vm1698_vm4, %v19731_v2, 0.0 }
 0xe95   :  { %13029 = vadd.xlane.f32.xlu0 %v13028_v54  ;;  %v19735_v24 = vpop.eup %16557 }
 0xe96   :  { %v13040_v3 = vsel %vm1698_vm4, %v19735_v24, 0.0 }
 0xe99   :  { %13035 = vadd.xlane.f32.xlu0 %v13034_v12 }
 0xe9d   :  { %13041 = vadd.xlane.f32.xlu0 %v13040_v3 }
 0xea2   :  { %v12931_v19 = vpop.xlane.xlu1 %12930 }
 0xea3   :  { %v12969_v9 = vsub.f32 %v19629_v22, %v12931_v19 }
 0xea5   :  { %v12989_v4 = vmul.f32 1.442695, %v12969_v9 }
 0xea6   :  { %v12937_v45 = vpop.xlane.xlu1 %12936 }
 0xea7   :  { %16559 = vpow2.f32 %v12989_v4  ;;  %v12971_v13 = vsub.f32 %v19637_v61, %v12937_v45 }
 0xea9   :  { %v12993_v11 = vmul.f32 1.442695, %v12971_v13 }
 0xeaa   :  { %v12943_v21 = vpop.xlane.xlu1 %12942 }
 0xeab   :  { %16561 = vpow2.f32 %v12993_v11  ;;  %v12973_v23 = vsub.f32 %v19645_v50, %v12943_v21 }
 0xead   :  { %v12997_v43 = vmul.f32 1.442695, %v12973_v23 }
 0xeaf   :  { %16563 = vpow2.f32 %v12997_v43 }
 0xeb4   :  { %v19742_v6 = vpop.eup %16559 }
 0xeb5   :  { %v13025_v46 = vsel %vm1698_vm4, %v19742_v6, 0.0 }
 0xeb6   :  { %13026 = vadd.xlane.f32.xlu1 %v13025_v46 }
 0xeb8   :  { %v19746_v18 = vpop.eup %16561 }
 0xeb9   :  { %v13031_v22 = vsel %vm1698_vm4, %v19746_v18, 0.0 }
 0xeba   :  { %13032 = vadd.xlane.f32.xlu1 %v13031_v22 }
 0xebc   :  { %v19750_v61 = vpop.eup %16563 }
 0xebd   :  { %v13037_v1 = vsel %vm1698_vm4, %v19750_v61, 0.0 }
 0xebe   :  { %13038 = vadd.xlane.f32.xlu1 %v13037_v1 }
 0xecb   :  { %v12952_v50 = vpop.xlane.xlu0 %12951 }
 0xecc   :  { %v12976_v16 = vsub.f32 %v19655_v14, %v12952_v50 }
 0xecd   :  { %v12949_v44 = vpop.xlane.xlu1 %12948 }
 0xece   :  { %v13003_v31 = vmul.f32 1.442695, %v12976_v16  ;;  %v12975_v30 = vsub.f32 %v19659_v42, %v12949_v44 }
 0xecf   :  { %v12958_v62 = vpop.xlane.xlu0 %12957 }
 0xed0   :  { %16565 = vpow2.f32 %v13003_v31  ;;  %v13001_v58 = vmul.f32 1.442695, %v12975_v30  ;;  %v12978_v53 = vsub.f32 %v19663_v48, %v12958_v62 }
 0xed1   :  { %v12955_v27 = vpop.xlane.xlu1 %12954 }
 0xed2   :  { %16567 = vpow2.f32 %v13001_v58  ;;  %v13007_v54 = vmul.f32 1.442695, %v12978_v53  ;;  %v12977_v12 = vsub.f32 %v19667_v0, %v12955_v27 }
 0xed4   :  { %16569 = vpow2.f32 %v13007_v54  ;;  %v13005_v3 = vmul.f32 1.442695, %v12977_v12 }
 0xed5   :  { %v12964_v19 = vpop.xlane.xlu0 %12963 }
 0xed6   :  { %16571 = vpow2.f32 %v13005_v3  ;;  %v12980_v14 = vsub.f32 %v19673_v40, %v12964_v19 }
 0xed7   :  { %v12961_v9 = vpop.xlane.xlu1 %12960 }
 0xed8   :  { %v13011_v4 = vmul.f32 1.442695, %v12980_v14  ;;  %v12979_v42 = vsub.f32 %v19677_v36, %v12961_v9 }
 0xed9   :  { %v19786_v50 = vpop.permute.xlu0 %13853 }
 0xeda   :  { %16573 = vpow2.f32 %v13011_v4  ;;  %v13009_v45 = vmul.f32 1.442695, %v12979_v42 }
 0xedb   :  { %v13778_v44 = vpop.permute.xlu1 %13777 }
 0xedc   :  { %16575 = vpow2.f32 %v13009_v45 }
 0xedd   :  { %v19760_v13 = vpop.eup %16565  ;;  %v13930_v16 = vpop.permute.xlu0 %13929 }
 0xede   :  { %v13046_v48 = vsel %vm1698_vm4, %v19760_v13, 0.0 }
 0xedf   :  { %v19764_v11 = vpop.eup %16567  ;;  %13047 = vadd.xlane.f32.xlu0 %v13046_v48 }
 0xee0   :  { %v13043_v0 = vsel %vm1698_vm4, %v19764_v11, 0.0 }
 0xee1   :  { %v19768_v21 = vpop.eup %16569  ;;  %13044 = vadd.xlane.f32.xlu1 %v13043_v0  ;;  %v19790_v31 = vpop.permute.xlu0 %14005 }
 0xee2   :  { %v13052_v40 = vsel %vm1698_vm4, %v19768_v21, 0.0 }
 0xee3   :  { %v19772_v36 = vpop.eup %16571  ;;  %13053 = vadd.xlane.f32.xlu0 %v13052_v40 }
 0xee4   :  { %v13049_v23 = vsel %vm1698_vm4, %v19772_v36, 0.0 }
 0xee5   :  { %13050 = vadd.xlane.f32.xlu1 %v13049_v23  ;;  %v19792_v62 = vpop.permute.xlu0 %14081 }
 0xee7   :  { %v19776_v43 = vpop.eup %16573 }
 0xee8   :  { %v13058_v46 = vsel %vm1698_vm4, %v19776_v43, 0.0 }
 0xee9   :  { %v19780_v22 = vpop.eup %16575  ;;  %13059 = vadd.xlane.f32.xlu1 %v13058_v46 }
 0xeea   :  { %v13055_v1 = vsel %vm1698_vm4, %v19780_v22, 0.0 }
 0xeeb   :  { %13056 = vadd.xlane.f32.xlu0 %v13055_v1 }
 0xefa   :  { %14157 = vrot.lane.b32.xlu1 %v19494_v59, %s16660_s24 }
 0xf01   :  { %14233 = vrot.lane.b32.xlu0 %v19492_v52, %s16660_s24 }
 0xf0c   :  { %v13015_v30 = vpop.xlane.xlu1 %13014 }
 0xf0d   :  { %16577 = vrcp.f32 %v13015_v30 }
 0xf14   :  { %v13021_v58 = vpop.xlane.xlu1 %13020 }
 0xf15   :  { %16579 = vrcp.f32 %v13021_v58 }
 0xf16   :  { %v13018_v53 = vpop.xlane.xlu0 %13017 }
 0xf17   :  { %16581 = vrcp.f32 %v13018_v53 }
 0xf1a   :  { %v16578_v27 = vpop.eup %16577  ;;  %v13024_v54 = vpop.xlane.xlu0 %13023 }
 0xf1b   :  { %v13062_v12 = vmul.f32 %v16578_v27, %v19710_v49  ;;  %16583 = vrcp.f32 %v13024_v54 }
 0xf1d   :  { %16165 = vmatmul.mubr.msk.f32.vlgmr.msra.gmra.mxu0 %vm1698_vm4, %v13062_v12 }
 0xf1e   :  { %16173 = vmatpush3.msra.mxu0 %v19669_v51  ;;  %v13030_v3 = vpop.xlane.xlu0 %13029  ;;  %16174 = vmatprep.mubr.msk.f32.mxu0 %vm16658_vm2, %v20214_v10 }
 0xf1f   :  { %16585 = vrcp.f32 %v13030_v3  ;;  %16182 = vmatprep.subr.mxu0 %v20214_v10  ;;  %v14327_v3 = vld [vmem:[%s20076_s7 + $0x10] sm:$0xff] }
 0xf22   :  { %v16580_v19 = vpop.eup %16579  ;;  %v13036_v14 = vpop.xlane.xlu0 %13035 }
 0xf23   :  { %v13066_v9 = vmul.f32 %v16580_v19, %v19717_v29  ;;  %16587 = vrcp.f32 %v13036_v14  ;;  %v14326_v19 = vld [vmem:[%s20076_s7 + $0x8] sm:$0xff] }
 0xf24   :  { %v16582_v4 = vpop.eup %16581 }
 0xf25   :  { %v13064_v49 = vmul.f32 %v16582_v4, %v19715_v17  ;;  %16175 = vmatmul.mubr.msk.f32.vlgmr.msra.gmra.mxu0 %vm1698_vm4, %v13066_v9 }
 0xf26   :  { %16183 = vmatpush3.msra.mxu0 %v19683_v28  ;;  %v13042_v51 = vpop.xlane.xlu0 %13041  ;;  %16184 = vmatprep.mubr.msk.f32.mxu0 %vm16658_vm2, %v20214_v10 }
 0xf27   :  { %16589 = vrcp.f32 %v13042_v51  ;;  %16170 = vmatmul.mubr.msk.f32.vlgmr.msra.gmra.mxu1 %vm1698_vm4, %v13064_v49  ;;  %16192 = vmatprep.subr.mxu0 %v20214_v10 }
 0xf28   :  { %v16584_v42 = vpop.eup %16583  ;;  %16178 = vmatpush3.msra.mxu1 %v19679_v47  ;;  %16179 = vmatprep.mubr.msk.f32.mxu1 %vm16658_vm2, %v20214_v10 }
 0xf29   :  { %v13068_v17 = vmul.f32 %v16584_v42, %v19723_v56  ;;  %16187 = vmatprep.subr.mxu1 %v20214_v10 }
 0xf2b   :  { %16180 = vmatmul.mubr.msk.f32.vlgmr.msra.gmra.mxu1 %vm1698_vm4, %v13068_v17 }
 0xf2c   :  { %v16586_v28 = vpop.eup %16585  ;;  %16188 = vmatpush3.msra.mxu1 %v19685_v63  ;;  %16189 = vmatprep.mubr.msk.f32.mxu1 %vm16658_vm2, %v20214_v10 }
 0xf2d   :  { %v13072_v29 = vmul.f32 %v16586_v28, %v19727_v37  ;;  %16197 = vmatprep.subr.mxu1 %v20214_v10 }
 0xf2f   :  { %16190 = vmatmul.mubr.msk.f32.vlgmr.msra.gmra.mxu1 %vm1698_vm4, %v13072_v29 }
 0xf30   :  { %v16588_v47 = vpop.eup %16587  ;;  %16198 = vmatpush3.msra.mxu1 %v19693_v41  ;;  %16199 = vmatprep.mubr.msk.f32.mxu1 %vm16658_vm2, %v20214_v10 }
 0xf31   :  { %v13076_v56 = vmul.f32 %v16588_v47, %v19731_v2  ;;  %16207 = vmatprep.subr.mxu1 %v20214_v10 }
 0xf33   :  { %16200 = vmatmul.mubr.msk.f32.vlgmr.msra.gmra.mxu1 %vm1698_vm4, %v13076_v56 }
 0xf34   :  { %v16590_v63 = vpop.eup %16589  ;;  %16208 = vmatpush3.msra.mxu1 %v13778_v44  ;;  %16209 = vmatprep.mubr.msk.f32.mxu1 %vm16658_vm2, %v20214_v10 }
 0xf35   :  { %v13080_v37 = vmul.f32 %v16590_v63, %v19735_v24  ;;  %16217 = vmatprep.subr.mxu1 %v20214_v10 }
 0xf37   :  { %16210 = vmatmul.mubr.msk.f32.vlgmr.msra.gmra.mxu1 %vm1698_vm4, %v13080_v37 }
 0xf38   :  { %16218 = vmatpush3.msra.mxu1 %v13930_v16  ;;  %16219 = vmatprep.mubr.msk.f32.mxu1 %vm16658_vm2, %v20214_v10 }
 0xf39   :  { %16227 = vmatprep.subr.mxu1 %v20214_v10 }
 0xf3f   :  { %v13027_v41 = vpop.xlane.xlu1 %13026 }
 0xf40   :  { %16591 = vrcp.f32 %v13027_v41 }
 0xf43   :  { %v13033_v2 = vpop.xlane.xlu1 %13032 }
 0xf44   :  { %16593 = vrcp.f32 %v13033_v2 }
 0xf47   :  { %v13039_v45 = vpop.xlane.xlu1 %13038 }
 0xf48   :  { %16595 = vrcp.f32 %v13039_v45 }
 0xf4d   :  { %v16592_v48 = vpop.eup %16591 }
 0xf4e   :  { %v13070_v0 = vmul.f32 %v16592_v48, %v19742_v6 }
 0xf50   :  { %16185 = vmatmul.mubr.msk.f32.vlgmr.msra.gmra.mxu0 %vm1698_vm4, %v13070_v0 }
 0xf51   :  { %v16594_v24 = vpop.eup %16593  ;;  %16193 = vmatpush3.msra.mxu0 %v19687_v32  ;;  %16194 = vmatprep.mubr.msk.f32.mxu0 %vm16658_vm2, %v20214_v10 }
 0xf52   :  { %v13074_v40 = vmul.f32 %v16594_v24, %v19746_v18  ;;  %16202 = vmatprep.subr.mxu0 %v20214_v10 }
 0xf54   :  { %16195 = vmatmul.mubr.msk.f32.vlgmr.msra.gmra.mxu0 %vm1698_vm4, %v13074_v40 }
 0xf55   :  { %v16596_v23 = vpop.eup %16595  ;;  %16203 = vmatpush3.msra.mxu0 %v19699_v55  ;;  %16204 = vmatprep.mubr.msk.f32.mxu0 %vm16658_vm2, %v20214_v10 }
 0xf56   :  { %v13078_v6 = vmul.f32 %v16596_v23, %v19750_v61  ;;  %16212 = vmatprep.subr.mxu0 %v20214_v10 }
 0xf58   :  { %16205 = vmatmul.mubr.msk.f32.vlgmr.msra.gmra.mxu0 %vm1698_vm4, %v13078_v6 }
 0xf59   :  { %16213 = vmatpush3.msra.mxu0 %v19786_v50  ;;  %16214 = vmatprep.mubr.msk.f32.mxu0 %vm16658_vm2, %v20214_v10 }
 0xf5a   :  { %16222 = vmatprep.subr.mxu0 %v20214_v10 }
 0xf68   :  { %v13048_v32 = vpop.xlane.xlu0 %13047 }
 0xf69   :  { %16597 = vrcp.f32 %v13048_v32 }
 0xf6a   :  { %v13045_v18 = vpop.xlane.xlu1 %13044 }
 0xf6b   :  { %16599 = vrcp.f32 %v13045_v18 }
 0xf6c   :  { %v13054_v55 = vpop.xlane.xlu0 %13053 }
 0xf6d   :  { %16601 = vrcp.f32 %v13054_v55 }
 0xf6e   :  { %v13051_v46 = vpop.xlane.xlu1 %13050 }
 0xf6f   :  { %16603 = vrcp.f32 %v13051_v46 }
 0xf72   :  { %v13060_v61 = vpop.xlane.xlu1 %13059 }
 0xf73   :  { %16605 = vrcp.f32 %v13060_v61 }
 0xf74   :  { %v13057_v1 = vpop.xlane.xlu0 %13056 }
 0xf75   :  { %16607 = vrcp.f32 %v13057_v1 }
 0xf76   :  { %v16598_v16 = vpop.eup %16597 }
 0xf77   :  { %v13084_v50 = vmul.f32 %v16598_v16, %v19760_v13 }
 0xf78   :  { %v16600_v44 = vpop.eup %16599 }
 0xf79   :  { %v13082_v30 = vmul.f32 %v16600_v44, %v19764_v11  ;;  %16220 = vmatmul.mubr.msk.f32.vlgmr.msra.gmra.mxu1 %vm1698_vm4, %v13084_v50  ;;  %v14234_v11 = vpop.permute.xlu0 %14233 }
 0xf7a   :  { %v16602_v58 = vpop.eup %16601  ;;  %16228 = vmatpush3.msra.mxu1 %v19792_v62  ;;  %16229 = vmatprep.mubr.msk.f32.mxu1 %vm16658_vm2, %v20214_v10  ;;  %v14158_v62 = vpop.permute.xlu1 %14157 }
 0xf7b   :  { %v13088_v53 = vmul.f32 %v16602_v58, %v19768_v21  ;;  %16215 = vmatmul.mubr.msk.f32.vlgmr.msra.gmra.mxu0 %vm1698_vm4, %v13082_v30  ;;  %16237 = vmatprep.subr.mxu1 %v20214_v10  ;;  %v14328_v21 = vld [vmem:[%s20076_s7 + $0x18] sm:$0xff] }
 0xf7c   :  { %v16604_v27 = vpop.eup %16603  ;;  %16223 = vmatpush3.msra.mxu0 %v19790_v31  ;;  %16224 = vmatprep.mubr.msk.f32.mxu0 %vm16658_vm2, %v20214_v10 }
 0xf7d   :  { %v13086_v13 = vmul.f32 %v16604_v27, %v19772_v36  ;;  %16230 = vmatmul.mubr.msk.f32.vlgmr.msra.gmra.mxu1 %vm1698_vm4, %v13088_v53  ;;  %16232 = vmatprep.subr.mxu0 %v20214_v10 }
 0xf7e   :  { %16238 = vmatpush3.msra.mxu1 %v14234_v11  ;;  %16239 = vmatprep.mubr.msk.f32.mxu1 %vm16658_vm2, %v20214_v10 }
 0xf7f   :  { %16225 = vmatmul.mubr.msk.f32.vlgmr.msra.gmra.mxu0 %vm1698_vm4, %v13086_v13 }
 0xf80   :  { %v16606_v31 = vpop.eup %16605  ;;  %16233 = vmatpush3.msra.mxu0 %v14158_v62  ;;  %16234 = vmatprep.mubr.msk.f32.mxu0 %vm16658_vm2, %v20214_v10  ;;  %v14325_v10 = vld [vmem:[%s20076_s7] sm:$0xff] }
 0xf81   :  { %v13092_v36 = vmul.f32 %v16606_v31, %v19776_v43  ;;  %16242 = vmatprep.subr.mxu0 %v14328_v21 }
 0xf82   :  { %v16608_v54 = vpop.eup %16607 }
 0xf83   :  { %v13090_v12 = vmul.f32 %v16608_v54, %v19780_v22  ;;  %16240 = vmatmul.mubr.msk.f32.vlgmr.msra.gmra.mxu1 %vm1698_vm4, %v13092_v36 }
 0xf85   :  { %16235 = vmatmul.mubr.msk.f32.vlgmr.msra.gmra.mxu0 %vm1698_vm4, %v13090_v12 }
 0xf86   :  { %16243 = vmatpush3.msra.mxu0 %v14328_v21 }
 0xf87   :  { %16244 = vmatprep.subr.mxu0 %v14327_v3 }
 0xf88   :  { %16245 = vmatpush3.msra.mxu0 %v14327_v3 }
 0xf89   :  { %16246 = vmatprep.subr.mxu0 %v14326_v19 }
 0xf8a   :  { %16247 = vmatpush3.msra.mxu0 %v14326_v19 }
 0xf8b   :  { %16248 = vmatprep.subr.mxu0 %v14325_v10 }
 0xf8c   :  { %16249 = vmatpush3.msra.mxu0 %v14325_v10 }
 0xfdd   :  { %v13165_v43 = vpop.f32.mrf.mxu0 }
 0xfde   :  { %v19889_v22 = vadd.f32 %v13165_v43, %v19438_v39 }
 0xfdf   :  { %v16166_v14 = vpop.f32.mrf.mxu0 }
 0xfe0   :  { %16250 = vmatprep.mubr.msk.f32.mxu0 %vm481_vm3, %v19889_v22 }
 0xfe5   :  { %v13317_v9 = vpop.f32.mrf.mxu0 }
 0xfe6   :  { %v19897_v42 = vadd.f32 %v13317_v9, %v19446_v35 }
 0xfe7   :  { %v13241_v4 = vpop.f32.mrf.mxu1  ;;  %v16176_v49 = vpop.f32.mrf.mxu0 }
 0xfe8   :  { %v19894_v51 = vadd.f32 %v13241_v4, %v19436_v38 }
 0xfe9   :  { %v16171_v17 = vpop.f32.mrf.mxu1 }
 0xfea   :  { %16251 = vmatmul.mubr.msk.f32.vlgmr.msra.gmra.mxu0 %vm481_vm3, %v19894_v51 }
 0xfeb   :  { %v13393_v28 = vpop.f32.mrf.mxu1  ;;  %16253 = vmatprep.mubr.msk.f32.mxu0 %vm481_vm3, %v19897_v42 }
 0xfec   :  { %v19904_v39 = vadd.f32 %v13393_v28, %v19444_v25 }
 0xfed   :  { %v16181_v29 = vpop.f32.mrf.mxu1 }
 0xfee   :  { %16254 = vmatmul.mubr.msk.f32.gmra.mxu0 %vm481_vm3, %v19904_v39 }
 0xfef   :  { %v13545_v38 = vpop.f32.mrf.mxu1 }
 0xff0   :  { %v19912_v45 = vadd.f32 %v13545_v38, %v19450_v60 }
 0xff1   :  { %v16191_v47 = vpop.f32.mrf.mxu1 }
 0xff3   :  { %v13697_v56 = vpop.f32.mrf.mxu1 }
 0xff4   :  { %v19922_v24 = vadd.f32 %v13697_v56, %v19460_v26 }
 0xff5   :  { %v16201_v35 = vpop.f32.mrf.mxu1 }
 0xff7   :  { %v13849_v63 = vpop.f32.mrf.mxu1 }
 0xff8   :  { %v19932_v23 = vadd.f32 %v13849_v63, %v19466_v5 }
 0xff9   :  { %v16211_v37 = vpop.f32.mrf.mxu1 }
0x1010   :  { %v13469_v41 = vpop.f32.mrf.mxu0 }
0x1011   :  { %v19909_v2 = vadd.f32 %v13469_v41, %v19454_v33 }
0x1012   :  { %v16186_v48 = vpop.f32.mrf.mxu0 }
0x1013   :  { %16256 = vmatprep.mubr.msk.f32.mxu0 %vm481_vm3, %v19909_v2 }
0x1014   :  { %v13621_v25 = vpop.f32.mrf.mxu0  ;;  %16257 = vmatmul.mubr.msk.f32.gmra.mxu0 %vm481_vm3, %v19912_v45 }
0x1015   :  { %v19919_v0 = vadd.f32 %v13621_v25, %v19462_v34 }
0x1016   :  { %v16196_v40 = vpop.f32.mrf.mxu0 }
0x1017   :  { %16259 = vmatprep.mubr.msk.f32.mxu0 %vm481_vm3, %v19919_v0 }
0x1018   :  { %v13773_v60 = vpop.f32.mrf.mxu0  ;;  %16260 = vmatmul.mubr.msk.f32.gmra.mxu0 %vm481_vm3, %v19922_v24 }
0x1019   :  { %v19929_v33 = vadd.f32 %v13773_v60, %v19470_v57 }
0x101a   :  { %v16206_v6 = vpop.f32.mrf.mxu0 }
0x101b   :  { %16262 = vmatprep.mubr.msk.f32.mxu0 %vm481_vm3, %v19929_v33 }
0x101c   :  { %16263 = vmatmul.mubr.msk.f32.gmra.mxu0 %vm481_vm3, %v19932_v23 }
0x1039   :  { %v14001_v26 = vpop.f32.mrf.mxu1 }
0x103a   :  { %v19942_v55 = vadd.f32 %v14001_v26, %v19476_v20 }
0x103b   :  { %v13925_v34 = vpop.f32.mrf.mxu0  ;;  %v16221_v32 = vpop.f32.mrf.mxu1 }
0x103c   :  { %v19939_v18 = vadd.f32 %v13925_v34, %v19478_v15 }
0x103d   :  { %v16216_v57 = vpop.f32.mrf.mxu0  ;;  %v14153_v46 = vpop.f32.mrf.mxu1 }
0x103e   :  { %16265 = vmatprep.mubr.msk.f32.mxu0 %vm481_vm3, %v19939_v18  ;;  %v19952_v16 = vadd.f32 %v14153_v46, %v19482_v8  ;;  %v19971_v8 = vld [vmem:[%s20077_s8] ss:$0 sm:$0xff] }
0x103f   :  { %v14077_v5 = vpop.f32.mrf.mxu0  ;;  %v16231_v61 = vpop.f32.mrf.mxu1  ;;  %16266 = vmatmul.mubr.msk.f32.gmra.mxu0 %vm481_vm3, %v19942_v55 }
0x1040   :  { %v19949_v1 = vadd.f32 %v14077_v5, %v19486_v7 }
0x1041   :  { %v16226_v15 = vpop.f32.mrf.mxu0 }
0x1042   :  { %16268 = vmatprep.mubr.msk.f32.mxu0 %vm481_vm3, %v19949_v1 }
0x1043   :  { %v14305_v20 = vpop.f32.mrf.mxu1  ;;  %16269 = vmatmul.mubr.msk.f32.gmra.mxu0 %vm481_vm3, %v19952_v16 }
0x1044   :  { %v19962_v58 = vadd.f32 %v14305_v20, %v19492_v52 }
0x1045   :  { %v14229_v50 = vpop.f32.mrf.mxu0  ;;  %v16241_v44 = vpop.f32.mrf.mxu1 }
0x1046   :  { %v19959_v30 = vadd.f32 %v14229_v50, %v19494_v59 }
0x1047   :  { %v16236_v7 = vpop.f32.mrf.mxu0 }
0x1048   :  { %16271 = vmatprep.mubr.msk.f32.mxu0 %vm481_vm3, %v19959_v30 }
0x1049   :  { %16272 = vmatmul.mubr.msk.f32.gmra.mxu0 %vm481_vm3, %v19962_v58 }
0x10aa   :  { %v16252_v53 = vpop.f32.mrf.mxu0 }
0x10ab   :  { %v14456_v27 = vadd.f32 %v16252_v53, %v19971_v8 }
0x10ac   :  { %v14450_v59 = vpop.f32.mrf.mxu0 }
0x10ad   :  { %v14530_v13 = vmax.f32 %v14456_v27, 0.0  ;;  %v14451_v52 = vadd.f32 %v19971_v8, %v14450_v59 }
0x10ae   :  { %v16255_v11 = vpop.f32.mrf.mxu0 }
0x10af   :  { %v14546_v21 = vadd.f32 %v14530_v13, %v19894_v51  ;;  %v14529_v62 = vmax.f32 %v14451_v52, 0.0  ;;  %v14466_v31 = vadd.f32 %v16255_v11, %v19971_v8 }
0x10b0   :  { %v14460_v36 = vpop.f32.mrf.mxu0 }
0x10b1   :  { %14562 = vst.msk [vmem:[%s20078_s9 + $0x8] sm:$0xff] %vm481_vm3, %v14546_v21  ;;  %v14545_v54 = vadd.f32 %v14529_v62, %v19889_v22  ;;  %v14532_v12 = vmax.f32 %v14466_v31, 0.0  ;;  %v14461_v3 = vadd.f32 %v19971_v8, %v14460_v36 }
0x10b3   :  { %14561 = vst.msk [vmem:[%s20078_s9] sm:$0xff] %vm481_vm3, %v14545_v54  ;;  %v14548_v19 = vadd.f32 %v14532_v12, %v19904_v39  ;;  %v14531_v10 = vmax.f32 %v14461_v3, 0.0 }
0x10b5   :  { %14564 = vst.msk [vmem:[%s20078_s9 + $0x18] sm:$0xff] %vm481_vm3, %v14548_v19  ;;  %v14547_v43 = vadd.f32 %v14531_v10, %v19897_v42 }
0x10b7   :  { %14563 = vst.msk [vmem:[%s20078_s9 + $0x10] sm:$0xff] %vm481_vm3, %v14547_v43 }
0x10d4   :  { %v16258_v22 = vpop.f32.mrf.mxu0 }
0x10d5   :  { %v14476_v14 = vadd.f32 %v16258_v22, %v19971_v8 }
0x10d6   :  { %v14470_v9 = vpop.f32.mrf.mxu0 }
0x10d7   :  { %v14534_v4 = vmax.f32 %v14476_v14, 0.0  ;;  %v14471_v49 = vadd.f32 %v19971_v8, %v14470_v9 }
0x10d8   :  { %v16261_v51 = vpop.f32.mrf.mxu0 }
0x10d9   :  { %v14550_v17 = vadd.f32 %v14534_v4, %v19912_v45  ;;  %v14533_v28 = vmax.f32 %v14471_v49, 0.0  ;;  %v14486_v39 = vadd.f32 %v16261_v51, %v19971_v8 }
0x10da   :  { %v14480_v29 = vpop.f32.mrf.mxu0 }
0x10db   :  { %14566 = vst.msk [vmem:[%s20078_s9 + $0x28] sm:$0xff] %vm481_vm3, %v14550_v17  ;;  %v14549_v42 = vadd.f32 %v14533_v28, %v19909_v2  ;;  %v14536_v38 = vmax.f32 %v14486_v39, 0.0  ;;  %v14481_v47 = vadd.f32 %v19971_v8, %v14480_v29 }
0x10dc   :  { %v16264_v56 = vpop.f32.mrf.mxu0 }
0x10dd   :  { %14565 = vst.msk [vmem:[%s20078_s9 + $0x20] sm:$0xff] %vm481_vm3, %v14549_v42  ;;  %v14552_v35 = vadd.f32 %v14536_v38, %v19922_v24  ;;  %v14535_v63 = vmax.f32 %v14481_v47, 0.0  ;;  %v14496_v37 = vadd.f32 %v16264_v56, %v19971_v8 }
0x10de   :  { %v14490_v41 = vpop.f32.mrf.mxu0 }
0x10df   :  { %14568 = vst.msk [vmem:[%s20078_s9 + $0x38] sm:$0xff] %vm481_vm3, %v14552_v35  ;;  %v14551_v2 = vadd.f32 %v14535_v63, %v19919_v0  ;;  %v14538_v45 = vmax.f32 %v14496_v37, 0.0  ;;  %v14491_v48 = vadd.f32 %v19971_v8, %v14490_v41 }
0x10e1   :  { %14567 = vst.msk [vmem:[%s20078_s9 + $0x30] sm:$0xff] %vm481_vm3, %v14551_v2  ;;  %v14554_v25 = vadd.f32 %v14538_v45, %v19932_v23  ;;  %v14537_v24 = vmax.f32 %v14491_v48, 0.0 }
0x10e3   :  { %14570 = vst.msk [vmem:[%s20078_s9 + $0x48] sm:$0xff] %vm481_vm3, %v14554_v25  ;;  %v14553_v40 = vadd.f32 %v14537_v24, %v19929_v33 }
0x10e5   :  { %14569 = vst.msk [vmem:[%s20078_s9 + $0x40] sm:$0xff] %vm481_vm3, %v14553_v40 }
0x10ff   :  { %v16267_v0 = vpop.f32.mrf.mxu0 }
0x1100   :  { %v14506_v60 = vadd.f32 %v16267_v0, %v19971_v8 }
0x1101   :  { %v14500_v6 = vpop.f32.mrf.mxu0 }
0x1102   :  { %v14540_v26 = vmax.f32 %v14506_v60, 0.0  ;;  %v14501_v23 = vadd.f32 %v19971_v8, %v14500_v6 }
0x1103   :  { %v16270_v34 = vpop.f32.mrf.mxu0 }
0x1104   :  { %v14556_v32 = vadd.f32 %v14540_v26, %v19942_v55  ;;  %v14539_v57 = vmax.f32 %v14501_v23, 0.0  ;;  %v14516_v46 = vadd.f32 %v16270_v34, %v19971_v8 }
0x1105   :  { %v14510_v5 = vpop.f32.mrf.mxu0 }
0x1106   :  { %14572 = vst.msk [vmem:[%s20078_s9 + $0x58] sm:$0xff] %vm481_vm3, %v14556_v32  ;;  %v14555_v33 = vadd.f32 %v14539_v57, %v19939_v18  ;;  %v14542_v61 = vmax.f32 %v14516_v46, 0.0  ;;  %v14511_v15 = vadd.f32 %v19971_v8, %v14510_v5 }
0x1108   :  { %14571 = vst.msk [vmem:[%s20078_s9 + $0x50] sm:$0xff] %vm481_vm3, %v14555_v33  ;;  %v14558_v55 = vadd.f32 %v14542_v61, %v19952_v16  ;;  %v14541_v20 = vmax.f32 %v14511_v15, 0.0 }
0x1109   :  { %v16273_v50 = vpop.f32.mrf.mxu0 }
0x110a   :  { %14574 = vst.msk [vmem:[%s20078_s9 + $0x68] sm:$0xff] %vm481_vm3, %v14558_v55  ;;  %v14557_v44 = vadd.f32 %v14541_v20, %v19949_v1  ;;  %v14526_v18 = vadd.f32 %v16273_v50, %v19971_v8 }
0x110b   :  { %v14520_v7 = vpop.f32.mrf.mxu0 }
0x110c   :  { %14573 = vst.msk [vmem:[%s20078_s9 + $0x60] sm:$0xff] %vm481_vm3, %v14557_v44  ;;  %v14544_v53 = vmax.f32 %v14526_v18, 0.0  ;;  %v14521_v16 = vadd.f32 %v19971_v8, %v14520_v7 }
0x110e   :  { %v14560_v27 = vadd.f32 %v14544_v53, %v19962_v58  ;;  %v14543_v59 = vmax.f32 %v14521_v16, 0.0 }
0x1110   :  { %14576 = vst.msk [vmem:[%s20078_s9 + $0x78] sm:$0xff] %vm481_vm3, %v14560_v27  ;;  %v14559_v1 = vadd.f32 %v14543_v59, %v19959_v30 }
0x1112   :  { %14575 = vst.msk [vmem:[%s20078_s9 + $0x70] sm:$0xff] %vm481_vm3, %v14559_v1 }
0x1113   :  { %14581 = vsyncpa [#allocation3], 1 }
0x1114   :  { %14582 = vsyncpa [#allocation5], 1 }

</bundles_post_ra>
